<compile_context>
chip_gen: v5e
topology: v5e:2x2
jax: 0.10.0
libtpu: 0.0.40
codegen_flags: <defaults>
</compile_context>

<pallas_src>
import functools

import jax
import jax.numpy as jnp
from jax.experimental import pallas as pl
from jax.experimental.pallas import tpu as pltpu

LEAKY_SLOPE = 0.01  # PyTorch F.leaky_relu default

# Max M-tile rows for the 1x1 GEMMs (memory-bound: 512-row tiles ~85% of HBM
# roofline).  VMEM per step at K=Cout<=512 is well under every generation's
# limit (incl. v7x's 64 MiB), so no vmem_limit_bytes override is needed here.
_TM = 512


def _pad_to_128(c):
    return ((c + 127) // 128) * 128


def _pick_tm(M):
    """Row-tile for the 1x1 GEMMs.

    Bigger is better for the HBM roofline, but cap at the largest multiple of
    8 <= M/2 so the grid always has >= 2 "parallel" steps and v7x's two
    TensorCores both get work (v5e/v6e have 1 TC and are unaffected).
    """
    if M <= 8:
        return M
    half = max(8, (M // 2) // 8 * 8)
    return min(_TM, half)


# ----------------------------------------------------------------------------
# 1x1 conv kernels: tiled GEMM + bias [+ residual | + fused projection]
# ----------------------------------------------------------------------------
def _gemm_kernel(x_ref, w_ref, b_ref, o_ref, *, apply_act, slope):
    acc = jnp.dot(x_ref[...], w_ref[...], preferred_element_type=jnp.float32)
    acc = acc + b_ref[...]
    if apply_act:
        acc = jnp.where(acc >= 0, acc, acc * slope)
    o_ref[...] = acc.astype(o_ref.dtype)


def _gemm_res_kernel(x_ref, w_ref, b_ref, r_ref, o_ref, *, apply_act, slope):
    acc = jnp.dot(x_ref[...], w_ref[...], preferred_element_type=jnp.float32)
    acc = acc + b_ref[...] + r_ref[...].astype(jnp.float32)
    if apply_act:
        acc = jnp.where(acc >= 0, acc, acc * slope)
    o_ref[...] = acc.astype(o_ref.dtype)


def _gemm_proj_kernel(h_ref, w_ref, b_ref, x_ref, ws_ref, bs_ref, o_ref, *,
                      apply_act, slope):
    # conv3(h) + projection_shortcut(x) fused: two MXU dots, one HBM store.
    acc = jnp.dot(h_ref[...], w_ref[...], preferred_element_type=jnp.float32)
    acc = acc + jnp.dot(x_ref[...], ws_ref[...],
                        preferred_element_type=jnp.float32)
    acc = acc + b_ref[...] + bs_ref[...]
    if apply_act:
        acc = jnp.where(acc >= 0, acc, acc * slope)
    o_ref[...] = acc.astype(o_ref.dtype)


def conv1x1(x2d, wmat, bmat, *, residual=None, apply_act=True,
            slope=LEAKY_SLOPE):
    """x2d: (M, K) bf16; wmat: (K, Cout) bf16; bmat: (1, Cout) f32."""
    M, K = x2d.shape
    Cout = wmat.shape[1]
    tm = _pick_tm(M)
    grid = (pl.cdiv(M, tm),)

    # Constant-index weight / bias blocks are DMA'd once (not re-fetched).
    # pipeline_mode=pl.Buffered(1) would halve their VMEM; negligible at
    # K=Cout=128, revisit for v7x (64 MiB VMEM) once channels grow to 512+.
    in_specs = [pl.BlockSpec((tm, K), lambda i: (i, 0)),
                pl.BlockSpec((K, Cout), lambda i: (0, 0)),
                pl.BlockSpec((1, Cout), lambda i: (0, 0))]
    args = [x2d, wmat, bmat]
    if residual is None:
        kernel = functools.partial(_gemm_kernel, apply_act=apply_act,
                                   slope=slope)
    else:
        in_specs.append(pl.BlockSpec((tm, Cout), lambda i: (i, 0)))
        args.append(residual)
        kernel = functools.partial(_gemm_res_kernel, apply_act=apply_act,
                                   slope=slope)

    return pl.pallas_call(
        kernel,
        out_shape=jax.ShapeDtypeStruct((M, Cout), x2d.dtype),
        grid=grid,
        in_specs=in_specs,
        out_specs=pl.BlockSpec((tm, Cout), lambda i: (i, 0)),
        compiler_params=pltpu.CompilerParams(
            dimension_semantics=("parallel",)),
    )(*args)


def conv1x1_proj(h2d, w3, b3, xs2d, ws, bs, *, apply_act=True,
                 slope=LEAKY_SLOPE):
    """Fused: leaky_relu(h2d @ w3 + b3 + xs2d @ ws + bs) in one kernel."""
    M, Kh = h2d.shape
    Kx = xs2d.shape[1]
    Cout = w3.shape[1]
    tm = _pick_tm(M)
    grid = (pl.cdiv(M, tm),)

    kernel = functools.partial(_gemm_proj_kernel, apply_act=apply_act,
                               slope=slope)
    return pl.pallas_call(
        kernel,
        out_shape=jax.ShapeDtypeStruct((M, Cout), h2d.dtype),
        grid=grid,
        in_specs=[pl.BlockSpec((tm, Kh), lambda i: (i, 0)),
                  pl.BlockSpec((Kh, Cout), lambda i: (0, 0)),
                  pl.BlockSpec((1, Cout), lambda i: (0, 0)),
                  pl.BlockSpec((tm, Kx), lambda i: (i, 0)),
                  pl.BlockSpec((Kx, Cout), lambda i: (0, 0)),
                  pl.BlockSpec((1, Cout), lambda i: (0, 0))],
        out_specs=pl.BlockSpec((tm, Cout), lambda i: (i, 0)),
        compiler_params=pltpu.CompilerParams(
            dimension_semantics=("parallel",)),
    )(h2d, w3, b3, xs2d, ws, bs)


# ----------------------------------------------------------------------------
# 3x3 conv kernel: 9 shifted contiguous-slab matmuls, local f32 accumulator
# ----------------------------------------------------------------------------
def _conv3x3_kernel(*refs, tap_lists, slab, apply_act, slope):
    nph = len(tap_lists)
    phase_refs = refs[:nph]          # each (1, Lph, Cin_pad) bf16
    w_ref = refs[nph]                # (9, Cin_pad, Cout_pad) bf16
    b_ref = refs[nph + 1]            # (1, Cout_pad) f32
    o_ref = refs[nph + 2]            # (1, slab, Cout_pad) bf16

    acc = None
    for ph in range(nph):
        xr = phase_refs[ph]
        for (off, t) in tap_lists[ph]:
            # Contiguous flat slab at static offset `off` -> no reshape, no
            # relayout, no dtype round trip; straight bf16 into the MXU.
            contrib = jnp.dot(xr[0, pl.ds(off, slab), :], w_ref[t],
                              preferred_element_type=jnp.float32)
            acc = contrib if acc is None else acc + contrib
    acc = acc + b_ref[...]           # (1, Cout) broadcasts over the slab rows
    if apply_act:
        acc = jnp.where(acc >= 0, acc, acc * slope)
    o_ref[0] = acc.astype(o_ref.dtype)   # single lane-dense store


def _phase_spec_1d(size, stride):
    """Decompose the conv axis (pad=1, kernel=3) into `stride` phases.

    Returns (rows_per_phase, [(x_start, n_valid, top_zeros, bot_zeros)]) such
    that phase p == concat(zeros(top), x[x_start::stride][:n_valid],
    zeros(bot)) equals padded(x)[p::stride] (padded length rounded up to a
    multiple of stride).
    """
    padded = size + 2
    padded += (-padded) % stride
    per = padded // stride
    specs = []
    for p in range(stride):
        ks = [k for k in range(per) if 0 <= p + k * stride - 1 < size]
        if ks:
            k0, k1 = ks[0], ks[-1]
            specs.append((p + k0 * stride - 1, k1 - k0 + 1, k0, per - 1 - k1))
        else:
            specs.append((0, 0, per, 0))
    return per, specs


def conv3x3(x_nhwc, w_taps, bmat, *, stride, apply_act=True,
            slope=LEAKY_SLOPE):
    """3x3 conv, padding=1.  x_nhwc: (N,H,W,Cin_pad) bf16.

    out_flat[h*Wph + w] += phase_flat[(h+a)*Wph + (w+b)] @ W_tap : every tap
    reads ONE contiguous row range of a flattened phase, so the kernel is 9
    dots into a register accumulator.  Columns w in [Wo, Wph) of the output
    are garbage and sliced off here.  stride>1 uses a phase decomposition
    (total phase bytes == padded input); each phase is produced by a single
    fused strided-slice+pad of x, never materializing the padded intermediate.
    """
    N, H, W, Cin = x_nhwc.shape
    Cout = w_taps.shape[-1]
    Ho = (H - 1) // stride + 1
    Wo = (W - 1) // stride + 1

    Hper, hspecs = _phase_spec_1d(H, stride)
    Wph, wspecs = _phase_spec_1d(W, stride)
    a_max = 2 // stride
    b_max = 2 // stride
    # Extend phase height with zero rows so every tap's flat slab stays
    # in-bounds (the extension rides inside the single fused pad below).
    HphE = max(Hper, Ho + a_max + (1 if b_max > 0 else 0))
    slab = Ho * Wph

    phases, tap_lists = [], []
    for p in range(stride):
        hs0, hn, htop, _ = hspecs[p]
        h_hi = hs0 + (hn - 1) * stride + 1 if hn > 0 else hs0
        for q in range(stride):
            ws0, wn, wtop, _ = wspecs[q]
            w_hi = ws0 + (wn - 1) * stride + 1 if wn > 0 else ws0
            sl = x_nhwc[:, hs0:h_hi:stride, ws0:w_hi:stride, :]
            ph = jnp.pad(sl, ((0, 0),
                              (htop, HphE - htop - hn),
                              (wtop, Wph - wtop - wn),
                              (0, 0)))
            phases.append(ph.reshape(N, HphE * Wph, Cin))   # free reshape
            tap_lists.append(tuple(
                ((dh // stride) * Wph + (dw // stride), 3 * dh + dw)
                for dh in range(3) for dw in range(3)
                if dh % stride == p and dw % stride == q))

    max_off = max(off for tl in tap_lists for (off, _) in tl)
    assert max_off + slab <= HphE * Wph, "tap slab would read out of bounds"

    kernel = functools.partial(_conv3x3_kernel, tap_lists=tuple(tap_lists),
                               slab=slab, apply_act=apply_act, slope=slope)

    in_specs = [pl.BlockSpec((1, HphE * Wph, Cin), lambda n: (n, 0, 0))
                for _ in phases]
    in_specs += [pl.BlockSpec(w_taps.shape, lambda n: (0, 0, 0)),
                 pl.BlockSpec(bmat.shape, lambda n: (0, 0))]

    out = pl.pallas_call(
        kernel,
        out_shape=jax.ShapeDtypeStruct((N, slab, Cout), x_nhwc.dtype),
        grid=(N,),
        in_specs=in_specs,
        out_specs=pl.BlockSpec((1, slab, Cout), lambda n: (n, 0, 0)),
        compiler_params=pltpu.CompilerParams(
            dimension_semantics=("parallel",)),
    )(*phases, w_taps, bmat)

    # Drop the (Wph - Wo) garbage columns; small strided copy in XLA.
    return out.reshape(N, Ho, Wph, Cout)[:, :, :Wo, :]


# ----------------------------------------------------------------------------
# Parameter init (weight layout transforms + lane padding hoisted here)
# ----------------------------------------------------------------------------
def _conv1x1_params(key, cin, cout):
    kw, kb = jax.random.split(key)
    w = jax.random.normal(kw, (cout, cin), jnp.float32) * (2.0 / cin) ** 0.5
    b = 0.01 * jax.random.normal(kb, (cout,), jnp.float32)
    cin_p, cout_p = _pad_to_128(cin), _pad_to_128(cout)
    wmat = jnp.zeros((cin_p, cout_p), jnp.float32).at[:cin, :cout].set(w.T)
    bmat = jnp.zeros((1, cout_p), jnp.float32).at[0, :cout].set(b)
    return wmat.astype(jnp.bfloat16), bmat


def _conv3x3_params(key, cin, cout):
    kw, kb = jax.random.split(key)
    fan_in = 9 * cin
    w = jax.random.normal(kw, (cout, cin, 3, 3), jnp.float32) * (2.0 / fan_in) ** 0.5
    b = 0.01 * jax.random.normal(kb, (cout,), jnp.float32)
    # (Cout, Cin, kh, kw) -> (kh, kw, Cin, Cout) -> taps (kh*3+kw, Cin, Cout)
    wt = jnp.transpose(w, (2, 3, 1, 0)).reshape(9, cin, cout)
    cin_p, cout_p = _pad_to_128(cin), _pad_to_128(cout)
    w_taps = jnp.zeros((9, cin_p, cout_p), jnp.float32).at[:, :cin, :cout].set(wt)
    bmat = jnp.zeros((1, cout_p), jnp.float32).at[0, :cout].set(b)
    return w_taps.astype(jnp.bfloat16), bmat


def init_bottleneck(key, cin, cout, stride):
    mid = max(cout // 4, 1)
    k = jax.random.split(key, 4)
    p = {}
    p["w1"], p["b1"] = _conv1x1_params(k[0], cin, mid)
    p["w2"], p["b2"] = _conv3x3_params(k[1], mid, mid)
    p["w3"], p["b3"] = _conv1x1_params(k[2], mid, cout)
    if cin != cout or stride != 1:
        p["ws"], p["bs"] = _conv1x1_params(k[3], cin, cout)
    return p


def init_strided_residual(key, in_channel, out_channel):
    k1, k2 = jax.random.split(key)
    stride1 = 2 if in_channel != out_channel else 1
    params = {
        "block1": init_bottleneck(k1, in_channel, out_channel, stride1),
        "block2": init_bottleneck(k2, out_channel, out_channel, 1),
    }
    # Static (non-traced) config: keeps strides as Python ints.
    cfg = {"in_channel": in_channel, "out_channel": out_channel,
           "stride1": stride1}
    return params, cfg


# ----------------------------------------------------------------------------
# Forward
# ----------------------------------------------------------------------------
def bottleneck_forward(p, x, stride):
    """x: (N, H, W, Cin_pad) bf16, padded channels are exactly zero."""
    N, H, W, Cin = x.shape
    mid_pad = p["w1"].shape[1]
    cout_pad = p["w3"].shape[1]

    # conv1: 1x1, stride 1, leaky_relu
    h = conv1x1(x.reshape(N * H * W, Cin), p["w1"], p["b1"], apply_act=True)
    h = h.reshape(N, H, W, mid_pad)

    # conv2: 3x3, stride, leaky_relu (taps accumulated in-kernel; no im2col)
    h = conv3x3(h, p["w2"], p["b2"], stride=stride, apply_act=True)
    _, Ho, Wo, _ = h.shape
    h2d = h.reshape(N * Ho * Wo, mid_pad)

    # conv3: 1x1 + bias + shortcut + leaky_relu, all in ONE kernel.
    if "ws" in p:
        xs = x[:, ::stride, ::stride, :] if stride != 1 else x
        out = conv1x1_proj(h2d, p["w3"], p["b3"],
                           xs.reshape(N * Ho * Wo, Cin), p["ws"], p["bs"],
                           apply_act=True)
    else:
        out = conv1x1(h2d, p["w3"], p["b3"],
                      residual=x.reshape(N * Ho * Wo, cout_pad),
                      apply_act=True)
    return out.reshape(N, Ho, Wo, cout_pad)


def strided_residual_forward(params, x_nchw, cfg):
    """Accepts NCHW float32 (PyTorch convention), returns NCHW float32."""
    in_ch, out_ch = cfg["in_channel"], cfg["out_channel"]
    N, C, H, W = x_nchw.shape
    assert C == in_ch
    cin_pad = _pad_to_128(in_ch)

    x = jnp.transpose(x_nchw, (0, 2, 3, 1))                      # -> NHWC
    x = jnp.pad(x, ((0, 0), (0, 0), (0, 0), (0, cin_pad - C)))   # lane-dense
    x = x.astype(jnp.bfloat16)

    x = bottleneck_forward(params["block1"], x, cfg["stride1"])
    x = bottleneck_forward(params["block2"], x, 1)

    x = x[..., :out_ch].astype(jnp.float32)
    return jnp.transpose(x, (0, 3, 1, 2))                        # -> NCHW


# ----------------------------------------------------------------------------
if __name__ == "__main__":
    key = jax.random.PRNGKey(0)
    k_param, k_x = jax.random.split(key)

    in_channel, out_channel = 4, 8
    x = jax.random.normal(k_x, (2, in_channel, 16, 16), jnp.float32)  # NCHW

    params, cfg = init_strided_residual(k_param, in_channel, out_channel)
    fwd = jax.jit(functools.partial(strided_residual_forward, cfg=cfg))
    out = fwd(params, x)
    jax.block_until_ready(out)

    expected = (2, out_channel, 8, 8)  # stride-2 first block halves H, W
    assert out.shape == expected, (out.shape, expected)
    assert out.dtype == jnp.float32
    assert bool(jnp.all(jnp.isfinite(out)))
    print("KERNEL_OK")
</pallas_src>

<mosaic_0001>
module attributes {stable_mosaic.version = 11 : i64} {
  func.func @_gemm_kernel(%arg0: i32, %arg1: memref<256x128xbf16, #tpu.memory_space<vmem>>, %arg2: memref<128x128xbf16, #tpu.memory_space<vmem>>, %arg3: memref<1x128xf32, #tpu.memory_space<vmem>>, %arg4: memref<256x128xbf16, #tpu.memory_space<vmem>>) attributes {dimension_semantics = [#tpu.dimension_semantics<parallel>], iteration_bounds = array<i64: 2>, scalar_prefetch = 0 : i64, scratch_operands = 0 : i64, tpu.core_type = #tpu.core_type<tc>, window_params = [{transform_indices = @transform_0, window_bounds = array<i64: 256, 128>}, {pipeline_mode = #tpu.pipeline_mode<synchronous>, transform_indices = @transform_1, window_bounds = array<i64: 128, 128>}, {pipeline_mode = #tpu.pipeline_mode<synchronous>, transform_indices = @transform_2, window_bounds = array<i64: 1, 128>}, {transform_indices = @transform_3, window_bounds = array<i64: 256, 128>}]} {
    %c0 = arith.constant 0 : index
    %c0_0 = arith.constant 0 : index
    %0 = vector.load %arg1[%c0, %c0_0] : memref<256x128xbf16, #tpu.memory_space<vmem>>, vector<256x128xbf16>
    %c0_1 = arith.constant 0 : index
    %c0_2 = arith.constant 0 : index
    %1 = vector.load %arg2[%c0_1, %c0_2] : memref<128x128xbf16, #tpu.memory_space<vmem>>, vector<128x128xbf16>
    %cst = arith.constant dense<0.000000e+00> : vector<256x128xf32>
    %2 = tpu.matmul %0, %1, %cst {dimension_numbers = #tpu.dot_dimension_numbers<[1], [0], [0], [1], [0, 0, 1, 1], [], []>} : vector<256x128xbf16>, vector<128x128xbf16>, vector<256x128xf32> -> vector<256x128xf32>
    %c0_3 = arith.constant 0 : index
    %c0_4 = arith.constant 0 : index
    %3 = vector.load %arg3[%c0_3, %c0_4] : memref<1x128xf32, #tpu.memory_space<vmem>>, vector<1x128xf32>
    %4 = vector.broadcast %3 : vector<1x128xf32> to vector<256x128xf32>
    %5 = arith.addf %2, %4 : vector<256x128xf32>
    %cst_5 = arith.constant 0.000000e+00 : f32
    %6 = vector.broadcast %cst_5 : f32 to vector<256x128xf32>
    %7 = arith.cmpf oge, %5, %6 : vector<256x128xf32>
    %cst_6 = arith.constant 0.00999999977 : f32
    %8 = vector.broadcast %cst_6 : f32 to vector<256x128xf32>
    %9 = arith.mulf %5, %8 : vector<256x128xf32>
    %10 = arith.select %7, %5, %9 : vector<256x128xi1>, vector<256x128xf32>
    %11 = arith.truncf %10 : vector<256x128xf32> to vector<256x128xbf16>
    %c0_7 = arith.constant 0 : index
    %c0_8 = arith.constant 0 : index
    %12 = vector.load %arg4[%c0_7, %c0_8] : memref<256x128xbf16, #tpu.memory_space<vmem>>, vector<256x128xbf16>
    tpu.vector_store %arg4[%c0_7, %c0_8], %11 {strides = array<i32>} : memref<256x128xbf16, #tpu.memory_space<vmem>>, vector<256x128xbf16>,
    return
  }
  func.func @transform_0(%arg0: i32) -> (i32, i32) {
    %c0_i32 = arith.constant 0 : i32
    %c0_i32_0 = arith.constant 0 : i32
    return %arg0, %c0_i32 : i32, i32
  }
  func.func @transform_1(%arg0: i32) -> (i32, i32) {
    %c0_i32 = arith.constant 0 : i32
    %c0_i32_0 = arith.constant 0 : i32
    %c0_i32_1 = arith.constant 0 : i32
    return %c0_i32, %c0_i32_0 : i32, i32
  }
  func.func @transform_2(%arg0: i32) -> (i32, i32) {
    %c0_i32 = arith.constant 0 : i32
    %c0_i32_0 = arith.constant 0 : i32
    %c0_i32_1 = arith.constant 0 : i32
    return %c0_i32, %c0_i32_0 : i32, i32
  }
  func.func @transform_3(%arg0: i32) -> (i32, i32) {
    %c0_i32 = arith.constant 0 : i32
    %c0_i32_0 = arith.constant 0 : i32
    return %arg0, %c0_i32 : i32, i32
  }
}

module attributes {stable_mosaic.version = 11 : i64} {
  func.func @_conv3x3_kernel(%arg0: i32, %arg1: memref<1x90x128xbf16, #tpu.memory_space<vmem>>, %arg2: memref<1x90x128xbf16, #tpu.memory_space<vmem>>, %arg3: memref<1x90x128xbf16, #tpu.memory_space<vmem>>, %arg4: memref<1x90x128xbf16, #tpu.memory_space<vmem>>, %arg5: memref<9x128x128xbf16, #tpu.memory_space<vmem>>, %arg6: memref<1x128xf32, #tpu.memory_space<vmem>>, %arg7: memref<1x72x128xbf16, #tpu.memory_space<vmem>>) attributes {dimension_semantics = [#tpu.dimension_semantics<parallel>], iteration_bounds = array<i64: 2>, scalar_prefetch = 0 : i64, scratch_operands = 0 : i64, tpu.core_type = #tpu.core_type<tc>, window_params = [{transform_indices = @transform_0, window_bounds = array<i64: 1, 90, 128>}, {transform_indices = @transform_1, window_bounds = array<i64: 1, 90, 128>}, {transform_indices = @transform_2, window_bounds = array<i64: 1, 90, 128>}, {transform_indices = @transform_3, window_bounds = array<i64: 1, 90, 128>}, {pipeline_mode = #tpu.pipeline_mode<synchronous>, transform_indices = @transform_4, window_bounds = array<i64: 9, 128, 128>}, {pipeline_mode = #tpu.pipeline_mode<synchronous>, transform_indices = @transform_5, window_bounds = array<i64: 1, 128>}, {transform_indices = @transform_6, window_bounds = array<i64: 1, 72, 128>}]} {
    %c0 = arith.constant 0 : index
    %c0_0 = arith.constant 0 : index
    %c0_1 = arith.constant 0 : index
    %0 = vector.load %arg1[%c0, %c0_0, %c0_1] : memref<1x90x128xbf16, #tpu.memory_space<vmem>>, vector<1x72x128xbf16>
    %1 = vector.shape_cast %0 : vector<1x72x128xbf16> to vector<72x128xbf16>
    %c0_2 = arith.constant 0 : index
    %c0_3 = arith.constant 0 : index
    %c0_4 = arith.constant 0 : index
    %2 = vector.load %arg5[%c0_2, %c0_3, %c0_4] : memref<9x128x128xbf16, #tpu.memory_space<vmem>>, vector<1x128x128xbf16>
    %3 = vector.shape_cast %2 : vector<1x128x128xbf16> to vector<128x128xbf16>
    %cst = arith.constant dense<0.000000e+00> : vector<72x128xf32>
    %4 = tpu.matmul %1, %3, %cst {dimension_numbers = #tpu.dot_dimension_numbers<[1], [0], [0], [1], [0, 0, 1, 1], [], []>} : vector<72x128xbf16>, vector<128x128xbf16>, vector<72x128xf32> -> vector<72x128xf32>
    %c0_5 = arith.constant 0 : index
    %c1 = arith.constant 1 : index
    %c0_6 = arith.constant 0 : index
    %5 = vector.load %arg1[%c0_5, %c1, %c0_6] : memref<1x90x128xbf16, #tpu.memory_space<vmem>>, vector<1x72x128xbf16>
    %6 = vector.shape_cast %5 : vector<1x72x128xbf16> to vector<72x128xbf16>
    %c2 = arith.constant 2 : index
    %c0_7 = arith.constant 0 : index
    %c0_8 = arith.constant 0 : index
    %7 = vector.load %arg5[%c2, %c0_7, %c0_8] : memref<9x128x128xbf16, #tpu.memory_space<vmem>>, vector<1x128x128xbf16>
    %8 = vector.shape_cast %7 : vector<1x128x128xbf16> to vector<128x128xbf16>
    %cst_9 = arith.constant dense<0.000000e+00> : vector<72x128xf32>
    %9 = tpu.matmul %6, %8, %cst_9 {dimension_numbers = #tpu.dot_dimension_numbers<[1], [0], [0], [1], [0, 0, 1, 1], [], []>} : vector<72x128xbf16>, vector<128x128xbf16>, vector<72x128xf32> -> vector<72x128xf32>
    %10 = arith.addf %4, %9 : vector<72x128xf32>
    %c0_10 = arith.constant 0 : index
    %c9 = arith.constant 9 : index
    %c0_11 = arith.constant 0 : index
    %11 = vector.load %arg1[%c0_10, %c9, %c0_11] : memref<1x90x128xbf16, #tpu.memory_space<vmem>>, vector<1x72x128xbf16>
    %12 = vector.shape_cast %11 : vector<1x72x128xbf16> to vector<72x128xbf16>
    %c6 = arith.constant 6 : index
    %c0_12 = arith.constant 0 : index
    %c0_13 = arith.constant 0 : index
    %13 = vector.load %arg5[%c6, %c0_12, %c0_13] : memref<9x128x128xbf16, #tpu.memory_space<vmem>>, vector<1x128x128xbf16>
    %14 = vector.shape_cast %13 : vector<1x128x128xbf16> to vector<128x128xbf16>
    %cst_14 = arith.constant dense<0.000000e+00> : vector<72x128xf32>
    %15 = tpu.matmul %12, %14, %cst_14 {dimension_numbers = #tpu.dot_dimension_numbers<[1], [0], [0], [1], [0, 0, 1, 1], [], []>} : vector<72x128xbf16>, vector<128x128xbf16>, vector<72x128xf32> -> vector<72x128xf32>
    %16 = arith.addf %10, %15 : vector<72x128xf32>
    %c0_15 = arith.constant 0 : index
    %c10 = arith.constant 10 : index
    %c0_16 = arith.constant 0 : index
    %17 = vector.load %arg1[%c0_15, %c10, %c0_16] : memref<1x90x128xbf16, #tpu.memory_space<vmem>>, vector<1x72x128xbf16>
    %18 = vector.shape_cast %17 : vector<1x72x128xbf16> to vector<72x128xbf16>
    %c8 = arith.constant 8 : index
    %c0_17 = arith.constant 0 : index
    %c0_18 = arith.constant 0 : index
    %19 = vector.load %arg5[%c8, %c0_17, %c0_18] : memref<9x128x128xbf16, #tpu.memory_space<vmem>>, vector<1x128x128xbf16>
    %20 = vector.shape_cast %19 : vector<1x128x128xbf16> to vector<128x128xbf16>
    %cst_19 = arith.constant dense<0.000000e+00> : vector<72x128xf32>
    %21 = tpu.matmul %18, %20, %cst_19 {dimension_numbers = #tpu.dot_dimension_numbers<[1], [0], [0], [1], [0, 0, 1, 1], [], []>} : vector<72x128xbf16>, vector<128x128xbf16>, vector<72x128xf32> -> vector<72x128xf32>
    %22 = arith.addf %16, %21 : vector<72x128xf32>
    %c0_20 = arith.constant 0 : index
    %c0_21 = arith.constant 0 : index
    %c0_22 = arith.constant 0 : index
    %23 = vector.load %arg2[%c0_20, %c0_21, %c0_22] : memref<1x90x128xbf16, #tpu.memory_space<vmem>>, vector<1x72x128xbf16>
    %24 = vector.shape_cast %23 : vector<1x72x128xbf16> to vector<72x128xbf16>
    %c1_23 = arith.constant 1 : index
    %c0_24 = arith.constant 0 : index
    %c0_25 = arith.constant 0 : index
    %25 = vector.load %arg5[%c1_23, %c0_24, %c0_25] : memref<9x128x128xbf16, #tpu.memory_space<vmem>>, vector<1x128x128xbf16>
    %26 = vector.shape_cast %25 : vector<1x128x128xbf16> to vector<128x128xbf16>
    %cst_26 = arith.constant dense<0.000000e+00> : vector<72x128xf32>
    %27 = tpu.matmul %24, %26, %cst_26 {dimension_numbers = #tpu.dot_dimension_numbers<[1], [0], [0], [1], [0, 0, 1, 1], [], []>} : vector<72x128xbf16>, vector<128x128xbf16>, vector<72x128xf32> -> vector<72x128xf32>
    %28 = arith.addf %22, %27 : vector<72x128xf32>
    %c0_27 = arith.constant 0 : index
    %c9_28 = arith.constant 9 : index
    %c0_29 = arith.constant 0 : index
    %29 = vector.load %arg2[%c0_27, %c9_28, %c0_29] : memref<1x90x128xbf16, #tpu.memory_space<vmem>>, vector<1x72x128xbf16>
    %30 = vector.shape_cast %29 : vector<1x72x128xbf16> to vector<72x128xbf16>
    %c7 = arith.constant 7 : index
    %c0_30 = arith.constant 0 : index
    %c0_31 = arith.constant 0 : index
    %31 = vector.load %arg5[%c7, %c0_30, %c0_31] : memref<9x128x128xbf16, #tpu.memory_space<vmem>>, vector<1x128x128xbf16>
    %32 = vector.shape_cast %31 : vector<1x128x128xbf16> to vector<128x128xbf16>
    %cst_32 = arith.constant dense<0.000000e+00> : vector<72x128xf32>
    %33 = tpu.matmul %30, %32, %cst_32 {dimension_numbers = #tpu.dot_dimension_numbers<[1], [0], [0], [1], [0, 0, 1, 1], [], []>} : vector<72x128xbf16>, vector<128x128xbf16>, vector<72x128xf32> -> vector<72x128xf32>
    %34 = arith.addf %28, %33 : vector<72x128xf32>
    %c0_33 = arith.constant 0 : index
    %c0_34 = arith.constant 0 : index
    %c0_35 = arith.constant 0 : index
    %35 = vector.load %arg3[%c0_33, %c0_34, %c0_35] : memref<1x90x128xbf16, #tpu.memory_space<vmem>>, vector<1x72x128xbf16>
    %36 = vector.shape_cast %35 : vector<1x72x128xbf16> to vector<72x128xbf16>
    %c3 = arith.constant 3 : index
    %c0_36 = arith.constant 0 : index
    %c0_37 = arith.constant 0 : index
    %37 = vector.load %arg5[%c3, %c0_36, %c0_37] : memref<9x128x128xbf16, #tpu.memory_space<vmem>>, vector<1x128x128xbf16>
    %38 = vector.shape_cast %37 : vector<1x128x128xbf16> to vector<128x128xbf16>
    %cst_38 = arith.constant dense<0.000000e+00> : vector<72x128xf32>
    %39 = tpu.matmul %36, %38, %cst_38 {dimension_numbers = #tpu.dot_dimension_numbers<[1], [0], [0], [1], [0, 0, 1, 1], [], []>} : vector<72x128xbf16>, vector<128x128xbf16>, vector<72x128xf32> -> vector<72x128xf32>
    %40 = arith.addf %34, %39 : vector<72x128xf32>
    %c0_39 = arith.constant 0 : index
    %c1_40 = arith.constant 1 : index
    %c0_41 = arith.constant 0 : index
    %41 = vector.load %arg3[%c0_39, %c1_40, %c0_41] : memref<1x90x128xbf16, #tpu.memory_space<vmem>>, vector<1x72x128xbf16>
    %42 = vector.shape_cast %41 : vector<1x72x128xbf16> to vector<72x128xbf16>
    %c5 = arith.constant 5 : index
    %c0_42 = arith.constant 0 : index
    %c0_43 = arith.constant 0 : index
    %43 = vector.load %arg5[%c5, %c0_42, %c0_43] : memref<9x128x128xbf16, #tpu.memory_space<vmem>>, vector<1x128x128xbf16>
    %44 = vector.shape_cast %43 : vector<1x128x128xbf16> to vector<128x128xbf16>
    %cst_44 = arith.constant dense<0.000000e+00> : vector<72x128xf32>
    %45 = tpu.matmul %42, %44, %cst_44 {dimension_numbers = #tpu.dot_dimension_numbers<[1], [0], [0], [1], [0, 0, 1, 1], [], []>} : vector<72x128xbf16>, vector<128x128xbf16>, vector<72x128xf32> -> vector<72x128xf32>
    %46 = arith.addf %40, %45 : vector<72x128xf32>
    %c0_45 = arith.constant 0 : index
    %c0_46 = arith.constant 0 : index
    %c0_47 = arith.constant 0 : index
    %47 = vector.load %arg4[%c0_45, %c0_46, %c0_47] : memref<1x90x128xbf16, #tpu.memory_space<vmem>>, vector<1x72x128xbf16>
    %48 = vector.shape_cast %47 : vector<1x72x128xbf16> to vector<72x128xbf16>
    %c4 = arith.constant 4 : index
    %c0_48 = arith.constant 0 : index
    %c0_49 = arith.constant 0 : index
    %49 = vector.load %arg5[%c4, %c0_48, %c0_49] : memref<9x128x128xbf16, #tpu.memory_space<vmem>>, vector<1x128x128xbf16>
    %50 = vector.shape_cast %49 : vector<1x128x128xbf16> to vector<128x128xbf16>
    %cst_50 = arith.constant dense<0.000000e+00> : vector<72x128xf32>
    %51 = tpu.matmul %48, %50, %cst_50 {dimension_numbers = #tpu.dot_dimension_numbers<[1], [0], [0], [1], [0, 0, 1, 1], [], []>} : vector<72x128xbf16>, vector<128x128xbf16>, vector<72x128xf32> -> vector<72x128xf32>
    %52 = arith.addf %46, %51 : vector<72x128xf32>
    %c0_51 = arith.constant 0 : index
    %c0_52 = arith.constant 0 : index
    %53 = vector.load %arg6[%c0_51, %c0_52] : memref<1x128xf32, #tpu.memory_space<vmem>>, vector<1x128xf32>
    %54 = vector.broadcast %53 : vector<1x128xf32> to vector<72x128xf32>
    %55 = arith.addf %52, %54 : vector<72x128xf32>
    %cst_53 = arith.constant 0.000000e+00 : f32
    %56 = vector.broadcast %cst_53 : f32 to vector<72x128xf32>
    %57 = arith.cmpf oge, %55, %56 : vector<72x128xf32>
    %cst_54 = arith.constant 0.00999999977 : f32
    %58 = vector.broadcast %cst_54 : f32 to vector<72x128xf32>
    %59 = arith.mulf %55, %58 : vector<72x128xf32>
    %60 = arith.select %57, %55, %59 : vector<72x128xi1>, vector<72x128xf32>
    %61 = arith.truncf %60 : vector<72x128xf32> to vector<72x128xbf16>
    %c0_55 = arith.constant 0 : index
    %c0_56 = arith.constant 0 : index
    %c0_57 = arith.constant 0 : index
    %62 = vector.load %arg7[%c0_55, %c0_56, %c0_57] : memref<1x72x128xbf16, #tpu.memory_space<vmem>>, vector<1x72x128xbf16>
    %63 = vector.shape_cast %62 : vector<1x72x128xbf16> to vector<72x128xbf16>
    %64 = vector.shape_cast %61 : vector<72x128xbf16> to vector<1x72x128xbf16>
    tpu.vector_store %arg7[%c0_55, %c0_56, %c0_57], %64 {strides = array<i32>} : memref<1x72x128xbf16, #tpu.memory_space<vmem>>, vector<1x72x128xbf16>,
    return
  }
  func.func @transform_0(%arg0: i32) -> (i32, i32, i32) {
    %c0_i32 = arith.constant 0 : i32
    %c0_i32_0 = arith.constant 0 : i32
    %c0_i32_1 = arith.constant 0 : i32
    return %arg0, %c0_i32, %c0_i32_0 : i32, i32, i32
  }
  func.func @transform_1(%arg0: i32) -> (i32, i32, i32) {
    %c0_i32 = arith.constant 0 : i32
    %c0_i32_0 = arith.constant 0 : i32
    %c0_i32_1 = arith.constant 0 : i32
    return %arg0, %c0_i32, %c0_i32_0 : i32, i32, i32
  }
  func.func @transform_2(%arg0: i32) -> (i32, i32, i32) {
    %c0_i32 = arith.constant 0 : i32
    %c0_i32_0 = arith.constant 0 : i32
    %c0_i32_1 = arith.constant 0 : i32
    return %arg0, %c0_i32, %c0_i32_0 : i32, i32, i32
  }
  func.func @transform_3(%arg0: i32) -> (i32, i32, i32) {
    %c0_i32 = arith.constant 0 : i32
    %c0_i32_0 = arith.constant 0 : i32
    %c0_i32_1 = arith.constant 0 : i32
    return %arg0, %c0_i32, %c0_i32_0 : i32, i32, i32
  }
  func.func @transform_4(%arg0: i32) -> (i32, i32, i32) {
    %c0_i32 = arith.constant 0 : i32
    %c0_i32_0 = arith.constant 0 : i32
    %c0_i32_1 = arith.constant 0 : i32
    %c0_i32_2 = arith.constant 0 : i32
    return %c0_i32, %c0_i32_0, %c0_i32_1 : i32, i32, i32
  }
  func.func @transform_5(%arg0: i32) -> (i32, i32) {
    %c0_i32 = arith.constant 0 : i32
    %c0_i32_0 = arith.constant 0 : i32
    %c0_i32_1 = arith.constant 0 : i32
    return %c0_i32, %c0_i32_0 : i32, i32
  }
  func.func @transform_6(%arg0: i32) -> (i32, i32, i32) {
    %c0_i32 = arith.constant 0 : i32
    %c0_i32_0 = arith.constant 0 : i32
    %c0_i32_1 = arith.constant 0 : i32
    return %arg0, %c0_i32, %c0_i32_0 : i32, i32, i32
  }
}

module attributes {stable_mosaic.version = 11 : i64} {
  func.func @_gemm_proj_kernel(%arg0: i32, %arg1: memref<64x128xbf16, #tpu.memory_space<vmem>>, %arg2: memref<128x128xbf16, #tpu.memory_space<vmem>>, %arg3: memref<1x128xf32, #tpu.memory_space<vmem>>, %arg4: memref<64x128xbf16, #tpu.memory_space<vmem>>, %arg5: memref<128x128xbf16, #tpu.memory_space<vmem>>, %arg6: memref<1x128xf32, #tpu.memory_space<vmem>>, %arg7: memref<64x128xbf16, #tpu.memory_space<vmem>>) attributes {dimension_semantics = [#tpu.dimension_semantics<parallel>], iteration_bounds = array<i64: 2>, scalar_prefetch = 0 : i64, scratch_operands = 0 : i64, tpu.core_type = #tpu.core_type<tc>, window_params = [{transform_indices = @transform_0, window_bounds = array<i64: 64, 128>}, {pipeline_mode = #tpu.pipeline_mode<synchronous>, transform_indices = @transform_1, window_bounds = array<i64: 128, 128>}, {pipeline_mode = #tpu.pipeline_mode<synchronous>, transform_indices = @transform_2, window_bounds = array<i64: 1, 128>}, {transform_indices = @transform_3, window_bounds = array<i64: 64, 128>}, {pipeline_mode = #tpu.pipeline_mode<synchronous>, transform_indices = @transform_4, window_bounds = array<i64: 128, 128>}, {pipeline_mode = #tpu.pipeline_mode<synchronous>, transform_indices = @transform_5, window_bounds = array<i64: 1, 128>}, {transform_indices = @transform_6, window_bounds = array<i64: 64, 128>}]} {
    %c0 = arith.constant 0 : index
    %c0_0 = arith.constant 0 : index
    %0 = vector.load %arg1[%c0, %c0_0] : memref<64x128xbf16, #tpu.memory_space<vmem>>, vector<64x128xbf16>
    %c0_1 = arith.constant 0 : index
    %c0_2 = arith.constant 0 : index
    %1 = vector.load %arg2[%c0_1, %c0_2] : memref<128x128xbf16, #tpu.memory_space<vmem>>, vector<128x128xbf16>
    %cst = arith.constant dense<0.000000e+00> : vector<64x128xf32>
    %2 = tpu.matmul %0, %1, %cst {dimension_numbers = #tpu.dot_dimension_numbers<[1], [0], [0], [1], [0, 0, 1, 1], [], []>} : vector<64x128xbf16>, vector<128x128xbf16>, vector<64x128xf32> -> vector<64x128xf32>
    %c0_3 = arith.constant 0 : index
    %c0_4 = arith.constant 0 : index
    %3 = vector.load %arg4[%c0_3, %c0_4] : memref<64x128xbf16, #tpu.memory_space<vmem>>, vector<64x128xbf16>
    %c0_5 = arith.constant 0 : index
    %c0_6 = arith.constant 0 : index
    %4 = vector.load %arg5[%c0_5, %c0_6] : memref<128x128xbf16, #tpu.memory_space<vmem>>, vector<128x128xbf16>
    %cst_7 = arith.constant dense<0.000000e+00> : vector<64x128xf32>
    %5 = tpu.matmul %3, %4, %cst_7 {dimension_numbers = #tpu.dot_dimension_numbers<[1], [0], [0], [1], [0, 0, 1, 1], [], []>} : vector<64x128xbf16>, vector<128x128xbf16>, vector<64x128xf32> -> vector<64x128xf32>
    %6 = arith.addf %2, %5 : vector<64x128xf32>
    %c0_8 = arith.constant 0 : index
    %c0_9 = arith.constant 0 : index
    %7 = vector.load %arg3[%c0_8, %c0_9] : memref<1x128xf32, #tpu.memory_space<vmem>>, vector<1x128xf32>
    %8 = vector.broadcast %7 : vector<1x128xf32> to vector<64x128xf32>
    %9 = arith.addf %6, %8 : vector<64x128xf32>
    %c0_10 = arith.constant 0 : index
    %c0_11 = arith.constant 0 : index
    %10 = vector.load %arg6[%c0_10, %c0_11] : memref<1x128xf32, #tpu.memory_space<vmem>>, vector<1x128xf32>
    %11 = vector.broadcast %10 : vector<1x128xf32> to vector<64x128xf32>
    %12 = arith.addf %9, %11 : vector<64x128xf32>
    %cst_12 = arith.constant 0.000000e+00 : f32
    %13 = vector.broadcast %cst_12 : f32 to vector<64x128xf32>
    %14 = arith.cmpf oge, %12, %13 : vector<64x128xf32>
    %cst_13 = arith.constant 0.00999999977 : f32
    %15 = vector.broadcast %cst_13 : f32 to vector<64x128xf32>
    %16 = arith.mulf %12, %15 : vector<64x128xf32>
    %17 = arith.select %14, %12, %16 : vector<64x128xi1>, vector<64x128xf32>
    %18 = arith.truncf %17 : vector<64x128xf32> to vector<64x128xbf16>
    %c0_14 = arith.constant 0 : index
    %c0_15 = arith.constant 0 : index
    %19 = vector.load %arg7[%c0_14, %c0_15] : memref<64x128xbf16, #tpu.memory_space<vmem>>, vector<64x128xbf16>
    tpu.vector_store %arg7[%c0_14, %c0_15], %18 {strides = array<i32>} : memref<64x128xbf16, #tpu.memory_space<vmem>>, vector<64x128xbf16>,
    return
  }
  func.func @transform_0(%arg0: i32) -> (i32, i32) {
    %c0_i32 = arith.constant 0 : i32
    %c0_i32_0 = arith.constant 0 : i32
    return %arg0, %c0_i32 : i32, i32
  }
  func.func @transform_1(%arg0: i32) -> (i32, i32) {
    %c0_i32 = arith.constant 0 : i32
    %c0_i32_0 = arith.constant 0 : i32
    %c0_i32_1 = arith.constant 0 : i32
    return %c0_i32, %c0_i32_0 : i32, i32
  }
  func.func @transform_2(%arg0: i32) -> (i32, i32) {
    %c0_i32 = arith.constant 0 : i32
    %c0_i32_0 = arith.constant 0 : i32
    %c0_i32_1 = arith.constant 0 : i32
    return %c0_i32, %c0_i32_0 : i32, i32
  }
  func.func @transform_3(%arg0: i32) -> (i32, i32) {
    %c0_i32 = arith.constant 0 : i32
    %c0_i32_0 = arith.constant 0 : i32
    return %arg0, %c0_i32 : i32, i32
  }
  func.func @transform_4(%arg0: i32) -> (i32, i32) {
    %c0_i32 = arith.constant 0 : i32
    %c0_i32_0 = arith.constant 0 : i32
    %c0_i32_1 = arith.constant 0 : i32
    return %c0_i32, %c0_i32_0 : i32, i32
  }
  func.func @transform_5(%arg0: i32) -> (i32, i32) {
    %c0_i32 = arith.constant 0 : i32
    %c0_i32_0 = arith.constant 0 : i32
    %c0_i32_1 = arith.constant 0 : i32
    return %c0_i32, %c0_i32_0 : i32, i32
  }
  func.func @transform_6(%arg0: i32) -> (i32, i32) {
    %c0_i32 = arith.constant 0 : i32
    %c0_i32_0 = arith.constant 0 : i32
    return %arg0, %c0_i32 : i32, i32
  }
}

module attributes {stable_mosaic.version = 11 : i64} {
  func.func @_gemm_kernel(%arg0: i32, %arg1: memref<64x128xbf16, #tpu.memory_space<vmem>>, %arg2: memref<128x128xbf16, #tpu.memory_space<vmem>>, %arg3: memref<1x128xf32, #tpu.memory_space<vmem>>, %arg4: memref<64x128xbf16, #tpu.memory_space<vmem>>) attributes {dimension_semantics = [#tpu.dimension_semantics<parallel>], iteration_bounds = array<i64: 2>, scalar_prefetch = 0 : i64, scratch_operands = 0 : i64, tpu.core_type = #tpu.core_type<tc>, window_params = [{transform_indices = @transform_0, window_bounds = array<i64: 64, 128>}, {pipeline_mode = #tpu.pipeline_mode<synchronous>, transform_indices = @transform_1, window_bounds = array<i64: 128, 128>}, {pipeline_mode = #tpu.pipeline_mode<synchronous>, transform_indices = @transform_2, window_bounds = array<i64: 1, 128>}, {transform_indices = @transform_3, window_bounds = array<i64: 64, 128>}]} {
    %c0 = arith.constant 0 : index
    %c0_0 = arith.constant 0 : index
    %0 = vector.load %arg1[%c0, %c0_0] : memref<64x128xbf16, #tpu.memory_space<vmem>>, vector<64x128xbf16>
    %c0_1 = arith.constant 0 : index
    %c0_2 = arith.constant 0 : index
    %1 = vector.load %arg2[%c0_1, %c0_2] : memref<128x128xbf16, #tpu.memory_space<vmem>>, vector<128x128xbf16>
    %cst = arith.constant dense<0.000000e+00> : vector<64x128xf32>
    %2 = tpu.matmul %0, %1, %cst {dimension_numbers = #tpu.dot_dimension_numbers<[1], [0], [0], [1], [0, 0, 1, 1], [], []>} : vector<64x128xbf16>, vector<128x128xbf16>, vector<64x128xf32> -> vector<64x128xf32>
    %c0_3 = arith.constant 0 : index
    %c0_4 = arith.constant 0 : index
    %3 = vector.load %arg3[%c0_3, %c0_4] : memref<1x128xf32, #tpu.memory_space<vmem>>, vector<1x128xf32>
    %4 = vector.broadcast %3 : vector<1x128xf32> to vector<64x128xf32>
    %5 = arith.addf %2, %4 : vector<64x128xf32>
    %cst_5 = arith.constant 0.000000e+00 : f32
    %6 = vector.broadcast %cst_5 : f32 to vector<64x128xf32>
    %7 = arith.cmpf oge, %5, %6 : vector<64x128xf32>
    %cst_6 = arith.constant 0.00999999977 : f32
    %8 = vector.broadcast %cst_6 : f32 to vector<64x128xf32>
    %9 = arith.mulf %5, %8 : vector<64x128xf32>
    %10 = arith.select %7, %5, %9 : vector<64x128xi1>, vector<64x128xf32>
    %11 = arith.truncf %10 : vector<64x128xf32> to vector<64x128xbf16>
    %c0_7 = arith.constant 0 : index
    %c0_8 = arith.constant 0 : index
    %12 = vector.load %arg4[%c0_7, %c0_8] : memref<64x128xbf16, #tpu.memory_space<vmem>>, vector<64x128xbf16>
    tpu.vector_store %arg4[%c0_7, %c0_8], %11 {strides = array<i32>} : memref<64x128xbf16, #tpu.memory_space<vmem>>, vector<64x128xbf16>,
    return
  }
  func.func @transform_0(%arg0: i32) -> (i32, i32) {
    %c0_i32 = arith.constant 0 : i32
    %c0_i32_0 = arith.constant 0 : i32
    return %arg0, %c0_i32 : i32, i32
  }
  func.func @transform_1(%arg0: i32) -> (i32, i32) {
    %c0_i32 = arith.constant 0 : i32
    %c0_i32_0 = arith.constant 0 : i32
    %c0_i32_1 = arith.constant 0 : i32
    return %c0_i32, %c0_i32_0 : i32, i32
  }
  func.func @transform_2(%arg0: i32) -> (i32, i32) {
    %c0_i32 = arith.constant 0 : i32
    %c0_i32_0 = arith.constant 0 : i32
    %c0_i32_1 = arith.constant 0 : i32
    return %c0_i32, %c0_i32_0 : i32, i32
  }
  func.func @transform_3(%arg0: i32) -> (i32, i32) {
    %c0_i32 = arith.constant 0 : i32
    %c0_i32_0 = arith.constant 0 : i32
    return %arg0, %c0_i32 : i32, i32
  }
}

module attributes {stable_mosaic.version = 11 : i64} {
  func.func @_conv3x3_kernel(%arg0: i32, %arg1: memref<1x110x128xbf16, #tpu.memory_space<vmem>>, %arg2: memref<9x128x128xbf16, #tpu.memory_space<vmem>>, %arg3: memref<1x128xf32, #tpu.memory_space<vmem>>, %arg4: memref<1x80x128xbf16, #tpu.memory_space<vmem>>) attributes {dimension_semantics = [#tpu.dimension_semantics<parallel>], iteration_bounds = array<i64: 2>, scalar_prefetch = 0 : i64, scratch_operands = 0 : i64, tpu.core_type = #tpu.core_type<tc>, window_params = [{transform_indices = @transform_0, window_bounds = array<i64: 1, 110, 128>}, {pipeline_mode = #tpu.pipeline_mode<synchronous>, transform_indices = @transform_1, window_bounds = array<i64: 9, 128, 128>}, {pipeline_mode = #tpu.pipeline_mode<synchronous>, transform_indices = @transform_2, window_bounds = array<i64: 1, 128>}, {transform_indices = @transform_3, window_bounds = array<i64: 1, 80, 128>}]} {
    %c0 = arith.constant 0 : index
    %c0_0 = arith.constant 0 : index
    %c0_1 = arith.constant 0 : index
    %0 = vector.load %arg1[%c0, %c0_0, %c0_1] : memref<1x110x128xbf16, #tpu.memory_space<vmem>>, vector<1x80x128xbf16>
    %1 = vector.shape_cast %0 : vector<1x80x128xbf16> to vector<80x128xbf16>
    %c0_2 = arith.constant 0 : index
    %c0_3 = arith.constant 0 : index
    %c0_4 = arith.constant 0 : index
    %2 = vector.load %arg2[%c0_2, %c0_3, %c0_4] : memref<9x128x128xbf16, #tpu.memory_space<vmem>>, vector<1x128x128xbf16>
    %3 = vector.shape_cast %2 : vector<1x128x128xbf16> to vector<128x128xbf16>
    %cst = arith.constant dense<0.000000e+00> : vector<80x128xf32>
    %4 = tpu.matmul %1, %3, %cst {dimension_numbers = #tpu.dot_dimension_numbers<[1], [0], [0], [1], [0, 0, 1, 1], [], []>} : vector<80x128xbf16>, vector<128x128xbf16>, vector<80x128xf32> -> vector<80x128xf32>
    %c0_5 = arith.constant 0 : index
    %c1 = arith.constant 1 : index
    %c0_6 = arith.constant 0 : index
    %5 = vector.load %arg1[%c0_5, %c1, %c0_6] : memref<1x110x128xbf16, #tpu.memory_space<vmem>>, vector<1x80x128xbf16>
    %6 = vector.shape_cast %5 : vector<1x80x128xbf16> to vector<80x128xbf16>
    %c1_7 = arith.constant 1 : index
    %c0_8 = arith.constant 0 : index
    %c0_9 = arith.constant 0 : index
    %7 = vector.load %arg2[%c1_7, %c0_8, %c0_9] : memref<9x128x128xbf16, #tpu.memory_space<vmem>>, vector<1x128x128xbf16>
    %8 = vector.shape_cast %7 : vector<1x128x128xbf16> to vector<128x128xbf16>
    %cst_10 = arith.constant dense<0.000000e+00> : vector<80x128xf32>
    %9 = tpu.matmul %6, %8, %cst_10 {dimension_numbers = #tpu.dot_dimension_numbers<[1], [0], [0], [1], [0, 0, 1, 1], [], []>} : vector<80x128xbf16>, vector<128x128xbf16>, vector<80x128xf32> -> vector<80x128xf32>
    %10 = arith.addf %4, %9 : vector<80x128xf32>
    %c0_11 = arith.constant 0 : index
    %c2 = arith.constant 2 : index
    %c0_12 = arith.constant 0 : index
    %11 = vector.load %arg1[%c0_11, %c2, %c0_12] : memref<1x110x128xbf16, #tpu.memory_space<vmem>>, vector<1x80x128xbf16>
    %12 = vector.shape_cast %11 : vector<1x80x128xbf16> to vector<80x128xbf16>
    %c2_13 = arith.constant 2 : index
    %c0_14 = arith.constant 0 : index
    %c0_15 = arith.constant 0 : index
    %13 = vector.load %arg2[%c2_13, %c0_14, %c0_15] : memref<9x128x128xbf16, #tpu.memory_space<vmem>>, vector<1x128x128xbf16>
    %14 = vector.shape_cast %13 : vector<1x128x128xbf16> to vector<128x128xbf16>
    %cst_16 = arith.constant dense<0.000000e+00> : vector<80x128xf32>
    %15 = tpu.matmul %12, %14, %cst_16 {dimension_numbers = #tpu.dot_dimension_numbers<[1], [0], [0], [1], [0, 0, 1, 1], [], []>} : vector<80x128xbf16>, vector<128x128xbf16>, vector<80x128xf32> -> vector<80x128xf32>
    %16 = arith.addf %10, %15 : vector<80x128xf32>
    %c0_17 = arith.constant 0 : index
    %c10 = arith.constant 10 : index
    %c0_18 = arith.constant 0 : index
    %17 = vector.load %arg1[%c0_17, %c10, %c0_18] : memref<1x110x128xbf16, #tpu.memory_space<vmem>>, vector<1x80x128xbf16>
    %18 = vector.shape_cast %17 : vector<1x80x128xbf16> to vector<80x128xbf16>
    %c3 = arith.constant 3 : index
    %c0_19 = arith.constant 0 : index
    %c0_20 = arith.constant 0 : index
    %19 = vector.load %arg2[%c3, %c0_19, %c0_20] : memref<9x128x128xbf16, #tpu.memory_space<vmem>>, vector<1x128x128xbf16>
    %20 = vector.shape_cast %19 : vector<1x128x128xbf16> to vector<128x128xbf16>
    %cst_21 = arith.constant dense<0.000000e+00> : vector<80x128xf32>
    %21 = tpu.matmul %18, %20, %cst_21 {dimension_numbers = #tpu.dot_dimension_numbers<[1], [0], [0], [1], [0, 0, 1, 1], [], []>} : vector<80x128xbf16>, vector<128x128xbf16>, vector<80x128xf32> -> vector<80x128xf32>
    %22 = arith.addf %16, %21 : vector<80x128xf32>
    %c0_22 = arith.constant 0 : index
    %c11 = arith.constant 11 : index
    %c0_23 = arith.constant 0 : index
    %23 = vector.load %arg1[%c0_22, %c11, %c0_23] : memref<1x110x128xbf16, #tpu.memory_space<vmem>>, vector<1x80x128xbf16>
    %24 = vector.shape_cast %23 : vector<1x80x128xbf16> to vector<80x128xbf16>
    %c4 = arith.constant 4 : index
    %c0_24 = arith.constant 0 : index
    %c0_25 = arith.constant 0 : index
    %25 = vector.load %arg2[%c4, %c0_24, %c0_25] : memref<9x128x128xbf16, #tpu.memory_space<vmem>>, vector<1x128x128xbf16>
    %26 = vector.shape_cast %25 : vector<1x128x128xbf16> to vector<128x128xbf16>
    %cst_26 = arith.constant dense<0.000000e+00> : vector<80x128xf32>
    %27 = tpu.matmul %24, %26, %cst_26 {dimension_numbers = #tpu.dot_dimension_numbers<[1], [0], [0], [1], [0, 0, 1, 1], [], []>} : vector<80x128xbf16>, vector<128x128xbf16>, vector<80x128xf32> -> vector<80x128xf32>
    %28 = arith.addf %22, %27 : vector<80x128xf32>
    %c0_27 = arith.constant 0 : index
    %c12 = arith.constant 12 : index
    %c0_28 = arith.constant 0 : index
    %29 = vector.load %arg1[%c0_27, %c12, %c0_28] : memref<1x110x128xbf16, #tpu.memory_space<vmem>>, vector<1x80x128xbf16>
    %30 = vector.shape_cast %29 : vector<1x80x128xbf16> to vector<80x128xbf16>
    %c5 = arith.constant 5 : index
    %c0_29 = arith.constant 0 : index
    %c0_30 = arith.constant 0 : index
    %31 = vector.load %arg2[%c5, %c0_29, %c0_30] : memref<9x128x128xbf16, #tpu.memory_space<vmem>>, vector<1x128x128xbf16>
    %32 = vector.shape_cast %31 : vector<1x128x128xbf16> to vector<128x128xbf16>
    %cst_31 = arith.constant dense<0.000000e+00> : vector<80x128xf32>
    %33 = tpu.matmul %30, %32, %cst_31 {dimension_numbers = #tpu.dot_dimension_numbers<[1], [0], [0], [1], [0, 0, 1, 1], [], []>} : vector<80x128xbf16>, vector<128x128xbf16>, vector<80x128xf32> -> vector<80x128xf32>
    %34 = arith.addf %28, %33 : vector<80x128xf32>
    %c0_32 = arith.constant 0 : index
    %c20 = arith.constant 20 : index
    %c0_33 = arith.constant 0 : index
    %35 = vector.load %arg1[%c0_32, %c20, %c0_33] : memref<1x110x128xbf16, #tpu.memory_space<vmem>>, vector<1x80x128xbf16>
    %36 = vector.shape_cast %35 : vector<1x80x128xbf16> to vector<80x128xbf16>
    %c6 = arith.constant 6 : index
    %c0_34 = arith.constant 0 : index
    %c0_35 = arith.constant 0 : index
    %37 = vector.load %arg2[%c6, %c0_34, %c0_35] : memref<9x128x128xbf16, #tpu.memory_space<vmem>>, vector<1x128x128xbf16>
    %38 = vector.shape_cast %37 : vector<1x128x128xbf16> to vector<128x128xbf16>
    %cst_36 = arith.constant dense<0.000000e+00> : vector<80x128xf32>
    %39 = tpu.matmul %36, %38, %cst_36 {dimension_numbers = #tpu.dot_dimension_numbers<[1], [0], [0], [1], [0, 0, 1, 1], [], []>} : vector<80x128xbf16>, vector<128x128xbf16>, vector<80x128xf32> -> vector<80x128xf32>
    %40 = arith.addf %34, %39 : vector<80x128xf32>
    %c0_37 = arith.constant 0 : index
    %c21 = arith.constant 21 : index
    %c0_38 = arith.constant 0 : index
    %41 = vector.load %arg1[%c0_37, %c21, %c0_38] : memref<1x110x128xbf16, #tpu.memory_space<vmem>>, vector<1x80x128xbf16>
    %42 = vector.shape_cast %41 : vector<1x80x128xbf16> to vector<80x128xbf16>
    %c7 = arith.constant 7 : index
    %c0_39 = arith.constant 0 : index
    %c0_40 = arith.constant 0 : index
    %43 = vector.load %arg2[%c7, %c0_39, %c0_40] : memref<9x128x128xbf16, #tpu.memory_space<vmem>>, vector<1x128x128xbf16>
    %44 = vector.shape_cast %43 : vector<1x128x128xbf16> to vector<128x128xbf16>
    %cst_41 = arith.constant dense<0.000000e+00> : vector<80x128xf32>
    %45 = tpu.matmul %42, %44, %cst_41 {dimension_numbers = #tpu.dot_dimension_numbers<[1], [0], [0], [1], [0, 0, 1, 1], [], []>} : vector<80x128xbf16>, vector<128x128xbf16>, vector<80x128xf32> -> vector<80x128xf32>
    %46 = arith.addf %40, %45 : vector<80x128xf32>
    %c0_42 = arith.constant 0 : index
    %c22 = arith.constant 22 : index
    %c0_43 = arith.constant 0 : index
    %47 = vector.load %arg1[%c0_42, %c22, %c0_43] : memref<1x110x128xbf16, #tpu.memory_space<vmem>>, vector<1x80x128xbf16>
    %48 = vector.shape_cast %47 : vector<1x80x128xbf16> to vector<80x128xbf16>
    %c8 = arith.constant 8 : index
    %c0_44 = arith.constant 0 : index
    %c0_45 = arith.constant 0 : index
    %49 = vector.load %arg2[%c8, %c0_44, %c0_45] : memref<9x128x128xbf16, #tpu.memory_space<vmem>>, vector<1x128x128xbf16>
    %50 = vector.shape_cast %49 : vector<1x128x128xbf16> to vector<128x128xbf16>
    %cst_46 = arith.constant dense<0.000000e+00> : vector<80x128xf32>
    %51 = tpu.matmul %48, %50, %cst_46 {dimension_numbers = #tpu.dot_dimension_numbers<[1], [0], [0], [1], [0, 0, 1, 1], [], []>} : vector<80x128xbf16>, vector<128x128xbf16>, vector<80x128xf32> -> vector<80x128xf32>
    %52 = arith.addf %46, %51 : vector<80x128xf32>
    %c0_47 = arith.constant 0 : index
    %c0_48 = arith.constant 0 : index
    %53 = vector.load %arg3[%c0_47, %c0_48] : memref<1x128xf32, #tpu.memory_space<vmem>>, vector<1x128xf32>
    %54 = vector.broadcast %53 : vector<1x128xf32> to vector<80x128xf32>
    %55 = arith.addf %52, %54 : vector<80x128xf32>
    %cst_49 = arith.constant 0.000000e+00 : f32
    %56 = vector.broadcast %cst_49 : f32 to vector<80x128xf32>
    %57 = arith.cmpf oge, %55, %56 : vector<80x128xf32>
    %cst_50 = arith.constant 0.00999999977 : f32
    %58 = vector.broadcast %cst_50 : f32 to vector<80x128xf32>
    %59 = arith.mulf %55, %58 : vector<80x128xf32>
    %60 = arith.select %57, %55, %59 : vector<80x128xi1>, vector<80x128xf32>
    %61 = arith.truncf %60 : vector<80x128xf32> to vector<80x128xbf16>
    %c0_51 = arith.constant 0 : index
    %c0_52 = arith.constant 0 : index
    %c0_53 = arith.constant 0 : index
    %62 = vector.load %arg4[%c0_51, %c0_52, %c0_53] : memref<1x80x128xbf16, #tpu.memory_space<vmem>>, vector<1x80x128xbf16>
    %63 = vector.shape_cast %62 : vector<1x80x128xbf16> to vector<80x128xbf16>
    %64 = vector.shape_cast %61 : vector<80x128xbf16> to vector<1x80x128xbf16>
    tpu.vector_store %arg4[%c0_51, %c0_52, %c0_53], %64 {strides = array<i32>} : memref<1x80x128xbf16, #tpu.memory_space<vmem>>, vector<1x80x128xbf16>,
    return
  }
  func.func @transform_0(%arg0: i32) -> (i32, i32, i32) {
    %c0_i32 = arith.constant 0 : i32
    %c0_i32_0 = arith.constant 0 : i32
    %c0_i32_1 = arith.constant 0 : i32
    return %arg0, %c0_i32, %c0_i32_0 : i32, i32, i32
  }
  func.func @transform_1(%arg0: i32) -> (i32, i32, i32) {
    %c0_i32 = arith.constant 0 : i32
    %c0_i32_0 = arith.constant 0 : i32
    %c0_i32_1 = arith.constant 0 : i32
    %c0_i32_2 = arith.constant 0 : i32
    return %c0_i32, %c0_i32_0, %c0_i32_1 : i32, i32, i32
  }
  func.func @transform_2(%arg0: i32) -> (i32, i32) {
    %c0_i32 = arith.constant 0 : i32
    %c0_i32_0 = arith.constant 0 : i32
    %c0_i32_1 = arith.constant 0 : i32
    return %c0_i32, %c0_i32_0 : i32, i32
  }
  func.func @transform_3(%arg0: i32) -> (i32, i32, i32) {
    %c0_i32 = arith.constant 0 : i32
    %c0_i32_0 = arith.constant 0 : i32
    %c0_i32_1 = arith.constant 0 : i32
    return %arg0, %c0_i32, %c0_i32_0 : i32, i32, i32
  }
}

module attributes {stable_mosaic.version = 11 : i64} {
  func.func @_gemm_res_kernel(%arg0: i32, %arg1: memref<64x128xbf16, #tpu.memory_space<vmem>>, %arg2: memref<128x128xbf16, #tpu.memory_space<vmem>>, %arg3: memref<1x128xf32, #tpu.memory_space<vmem>>, %arg4: memref<64x128xbf16, #tpu.memory_space<vmem>>, %arg5: memref<64x128xbf16, #tpu.memory_space<vmem>>) attributes {dimension_semantics = [#tpu.dimension_semantics<parallel>], iteration_bounds = array<i64: 2>, scalar_prefetch = 0 : i64, scratch_operands = 0 : i64, tpu.core_type = #tpu.core_type<tc>, window_params = [{transform_indices = @transform_0, window_bounds = array<i64: 64, 128>}, {pipeline_mode = #tpu.pipeline_mode<synchronous>, transform_indices = @transform_1, window_bounds = array<i64: 128, 128>}, {pipeline_mode = #tpu.pipeline_mode<synchronous>, transform_indices = @transform_2, window_bounds = array<i64: 1, 128>}, {transform_indices = @transform_3, window_bounds = array<i64: 64, 128>}, {transform_indices = @transform_4, window_bounds = array<i64: 64, 128>}]} {
    %c0 = arith.constant 0 : index
    %c0_0 = arith.constant 0 : index
    %0 = vector.load %arg1[%c0, %c0_0] : memref<64x128xbf16, #tpu.memory_space<vmem>>, vector<64x128xbf16>
    %c0_1 = arith.constant 0 : index
    %c0_2 = arith.constant 0 : index
    %1 = vector.load %arg2[%c0_1, %c0_2] : memref<128x128xbf16, #tpu.memory_space<vmem>>, vector<128x128xbf16>
    %cst = arith.constant dense<0.000000e+00> : vector<64x128xf32>
    %2 = tpu.matmul %0, %1, %cst {dimension_numbers = #tpu.dot_dimension_numbers<[1], [0], [0], [1], [0, 0, 1, 1], [], []>} : vector<64x128xbf16>, vector<128x128xbf16>, vector<64x128xf32> -> vector<64x128xf32>
    %c0_3 = arith.constant 0 : index
    %c0_4 = arith.constant 0 : index
    %3 = vector.load %arg3[%c0_3, %c0_4] : memref<1x128xf32, #tpu.memory_space<vmem>>, vector<1x128xf32>
    %4 = vector.broadcast %3 : vector<1x128xf32> to vector<64x128xf32>
    %5 = arith.addf %2, %4 : vector<64x128xf32>
    %c0_5 = arith.constant 0 : index
    %c0_6 = arith.constant 0 : index
    %6 = vector.load %arg4[%c0_5, %c0_6] : memref<64x128xbf16, #tpu.memory_space<vmem>>, vector<64x128xbf16>
    %7 = arith.extf %6 : vector<64x128xbf16> to vector<64x128xf32>
    %8 = arith.addf %5, %7 : vector<64x128xf32>
    %cst_7 = arith.constant 0.000000e+00 : f32
    %9 = vector.broadcast %cst_7 : f32 to vector<64x128xf32>
    %10 = arith.cmpf oge, %8, %9 : vector<64x128xf32>
    %cst_8 = arith.constant 0.00999999977 : f32
    %11 = vector.broadcast %cst_8 : f32 to vector<64x128xf32>
    %12 = arith.mulf %8, %11 : vector<64x128xf32>
    %13 = arith.select %10, %8, %12 : vector<64x128xi1>, vector<64x128xf32>
    %14 = arith.truncf %13 : vector<64x128xf32> to vector<64x128xbf16>
    %c0_9 = arith.constant 0 : index
    %c0_10 = arith.constant 0 : index
    %15 = vector.load %arg5[%c0_9, %c0_10] : memref<64x128xbf16, #tpu.memory_space<vmem>>, vector<64x128xbf16>
    tpu.vector_store %arg5[%c0_9, %c0_10], %14 {strides = array<i32>} : memref<64x128xbf16, #tpu.memory_space<vmem>>, vector<64x128xbf16>,
    return
  }
  func.func @transform_0(%arg0: i32) -> (i32, i32) {
    %c0_i32 = arith.constant 0 : i32
    %c0_i32_0 = arith.constant 0 : i32
    return %arg0, %c0_i32 : i32, i32
  }
  func.func @transform_1(%arg0: i32) -> (i32, i32) {
    %c0_i32 = arith.constant 0 : i32
    %c0_i32_0 = arith.constant 0 : i32
    %c0_i32_1 = arith.constant 0 : i32
    return %c0_i32, %c0_i32_0 : i32, i32
  }
  func.func @transform_2(%arg0: i32) -> (i32, i32) {
    %c0_i32 = arith.constant 0 : i32
    %c0_i32_0 = arith.constant 0 : i32
    %c0_i32_1 = arith.constant 0 : i32
    return %c0_i32, %c0_i32_0 : i32, i32
  }
  func.func @transform_3(%arg0: i32) -> (i32, i32) {
    %c0_i32 = arith.constant 0 : i32
    %c0_i32_0 = arith.constant 0 : i32
    return %arg0, %c0_i32 : i32, i32
  }
  func.func @transform_4(%arg0: i32) -> (i32, i32) {
    %c0_i32 = arith.constant 0 : i32
    %c0_i32_0 = arith.constant 0 : i32
    return %arg0, %c0_i32 : i32, i32
  }
}

</mosaic_0001>

<bundles_post_ra>
// kernel: strided_residual_forward.6
= control target key start
LH: loop header
LB: loop body
LE: loop exit
PB: predicated region body
PF: predicated region fallthrough
CT: control target
= control target key end

     0   :  { %s962_s12 = smov 0   ;;  %s1083_s0 = inlined_call_operand.vmem [shape: bf16[512,128], index: 0, kind: input, shape index: {}]   ;;  %s1084_s1 = inlined_call_operand.vmem [shape: bf16[128,128], index: 1, kind: input, shape index: {}]   ;;  %s1085_s2 = inlined_call_operand.vmem [shape: f32[1,128], index: 2, kind: input, shape index: {}]   ;;  %s1086_s3 = inlined_call_operand.vmem [shape: bf16[512,128], index: 3, kind: output, shape index: {}]  }
   0x1 LB: > { %s675_s13 = sadd.s32 4294967295, %s940_s12   ;;  %p679_p0 = scmp.ge.s32.totalorder %s940_s12, 1  ;;  %s940_s12 = sphi %s962_s12, %s13_s12  }
   0x2   : > { %p138_p1 = scmp.lt.s32.totalorder %s940_s12, 3 }
   0x4   : > { %p139_p2 = pnand %p679_p0, %p138_p1 }
   0x5   : > { %s680_s22 = sshll.u32 (!%p139_p2), %s675_s13, 5 }
   0x6   : > { %142 = sbr.rel (%p139_p2) target bundleno = 241 (0xf1), region = 32  ;;  %p163_p3 = scmp.lt.s32.totalorder (!%p139_p2), %s680_s22, 63 }
   0xb   : > { %v805_v0 = vld [vmem:[%s1084_s1 + $0x38] sm:$0xff]  ;;  %v804_v1 = vld [vmem:[%s1084_s1 + $0x30] sm:$0xff]  ;;  %v803_v2 = vld [vmem:[%s1084_s1 + $0x28] sm:$0xff]  ;;  %s1088_s22 = smov (!%p163_p3, %s680_s22), 63 }
   0xc   : > { %370 = vmatpush.bf16.msra.mxu0 %v805_v0  ;;  %901 = vmatpush.bf16.msra.mxu1 %v805_v0  ;;  %v802_v3 = vld [vmem:[%s1084_s1 + $0x20] sm:$0xff]  ;;  %v801_v4 = vld [vmem:[%s1084_s1 + $0x18] sm:$0xff]  ;;  %v800_v5 = vld [vmem:[%s1084_s1 + $0x10] sm:$0xff]  ;;  %s681_s29 = sshll.u32 %s1088_s22, 2 }
   0xd   : > { %902 = vmatpush.bf16.msra.mxu2 %v805_v0  ;;  %903 = vmatpush.bf16.msra.mxu3 %v805_v0  ;;  %v799_v6 = vld [vmem:[%s1084_s1 + $0x8] sm:$0xff]  ;;  %v798_v7 = vld [vmem:[%s1084_s1] sm:$0xff]  ;;  %s1002_s7 = scalar_lea.vmem %s1083_s0, %s681_s29  ;;  %s1036_s13 = scalar_lea.vmem %s1086_s3, %s681_s29 }
   0xe   : > { %v782_v8 = vld [vmem:[%s1002_s7] sm:$0xff]  ;;  %v783_v12 = vld [vmem:[%s1002_s7 + $0x8] sm:$0xff]  ;;  %v784_v16 = vld [vmem:[%s1002_s7 + $0x10] sm:$0xff] }
   0xf   : > { %v786_v9 = vld [vmem:[%s1002_s7 + $0x20] sm:$0xff]  ;;  %v787_v13 = vld [vmem:[%s1002_s7 + $0x28] sm:$0xff]  ;;  %v788_v17 = vld [vmem:[%s1002_s7 + $0x30] sm:$0xff] }
  0x10   : > { %371 = vmatpush.bf16.msra.mxu0 %v804_v1  ;;  %904 = vmatpush.bf16.msra.mxu1 %v804_v1  ;;  %v790_v10 = vld [vmem:[%s1002_s7 + $0x40] sm:$0xff]  ;;  %v791_v14 = vld [vmem:[%s1002_s7 + $0x48] sm:$0xff]  ;;  %v792_v18 = vld [vmem:[%s1002_s7 + $0x50] sm:$0xff] }
  0x11   : > { %905 = vmatpush.bf16.msra.mxu2 %v804_v1  ;;  %906 = vmatpush.bf16.msra.mxu3 %v804_v1  ;;  %v794_v11 = vld [vmem:[%s1002_s7 + $0x60] sm:$0xff]  ;;  %v795_v15 = vld [vmem:[%s1002_s7 + $0x68] sm:$0xff]  ;;  %v796_v19 = vld [vmem:[%s1002_s7 + $0x70] sm:$0xff] }
  0x12   : > { %v785_v20 = vld [vmem:[%s1002_s7 + $0x18] sm:$0xff]  ;;  %v1023_v26 = vld [vmem:[%s1085_s2] ss:$0 sm:$0xff] }
  0x13   : > { %v789_v21 = vld [vmem:[%s1002_s7 + $0x38] sm:$0xff] }
  0x14   : > { %372 = vmatpush.bf16.msra.mxu0 %v803_v2  ;;  %907 = vmatpush.bf16.msra.mxu1 %v803_v2  ;;  %v793_v22 = vld [vmem:[%s1002_s7 + $0x58] sm:$0xff] }
  0x15   : > { %908 = vmatpush.bf16.msra.mxu2 %v803_v2  ;;  %909 = vmatpush.bf16.msra.mxu3 %v803_v2  ;;  %v797_v23 = vld [vmem:[%s1002_s7 + $0x78] sm:$0xff] }
  0x18   : > { %373 = vmatpush.bf16.msra.mxu0 %v802_v3  ;;  %910 = vmatpush.bf16.msra.mxu1 %v802_v3 }
  0x19   : > { %911 = vmatpush.bf16.msra.mxu2 %v802_v3  ;;  %912 = vmatpush.bf16.msra.mxu3 %v802_v3 }
  0x1c   : > { %374 = vmatpush.bf16.msra.mxu0 %v801_v4  ;;  %913 = vmatpush.bf16.msra.mxu1 %v801_v4 }
  0x1d   : > { %914 = vmatpush.bf16.msra.mxu2 %v801_v4  ;;  %915 = vmatpush.bf16.msra.mxu3 %v801_v4 }
  0x20   : > { %375 = vmatpush.bf16.msra.mxu0 %v800_v5  ;;  %916 = vmatpush.bf16.msra.mxu1 %v800_v5 }
  0x21   : > { %917 = vmatpush.bf16.msra.mxu2 %v800_v5  ;;  %918 = vmatpush.bf16.msra.mxu3 %v800_v5 }
  0x24   : > { %376 = vmatpush.bf16.msra.mxu0 %v799_v6  ;;  %919 = vmatpush.bf16.msra.mxu1 %v799_v6 }
  0x25   : > { %920 = vmatpush.bf16.msra.mxu2 %v799_v6  ;;  %921 = vmatpush.bf16.msra.mxu3 %v799_v6 }
  0x28   : > { %377 = vmatpush.bf16.msra.mxu0 %v798_v7  ;;  %922 = vmatpush.bf16.msra.mxu1 %v798_v7 }
  0x29   : > { %923 = vmatpush.bf16.msra.mxu2 %v798_v7  ;;  %924 = vmatpush.bf16.msra.mxu3 %v798_v7 }
  0x2b   : > { %378 = vmatmul.bf16.vlgmr.msra.gmra.mxu0 %v782_v8  ;;  %398 = vmatmul.bf16.vlgmr.msra.gmra.mxu1 %v786_v9 }
  0x2c   : > { %418 = vmatmul.bf16.vlgmr.msra.gmra.mxu2 %v790_v10  ;;  %438 = vmatmul.bf16.vlgmr.msra.gmra.mxu3 %v794_v11 }
  0x3b   : > { %383 = vmatmul.bf16.gmra.mxu0 %v783_v12  ;;  %403 = vmatmul.bf16.gmra.mxu1 %v787_v13 }
  0x3c   : > { %423 = vmatmul.bf16.gmra.mxu2 %v791_v14  ;;  %443 = vmatmul.bf16.gmra.mxu3 %v795_v15 }
  0x4b   : > { %388 = vmatmul.bf16.gmra.mxu0 %v784_v16  ;;  %408 = vmatmul.bf16.gmra.mxu1 %v788_v17 }
  0x4c   : > { %428 = vmatmul.bf16.gmra.mxu2 %v792_v18  ;;  %448 = vmatmul.bf16.gmra.mxu3 %v796_v19 }
  0x5b   : > { %393 = vmatmul.bf16.gmra.mxu0 %v785_v20  ;;  %413 = vmatmul.bf16.gmra.mxu1 %v789_v21 }
  0x5c   : > { %433 = vmatmul.bf16.gmra.mxu2 %v793_v22  ;;  %453 = vmatmul.bf16.gmra.mxu3 %v797_v23 }
  0xa8   : > { %v379_v24 = vpop.f32.mrf.mxu0  ;;  %v399_v25 = vpop.f32.mrf.mxu1 }
  0xa9   : > { %v380_v27 = vadd.f32 %v1023_v26, %v379_v24  ;;  %v400_v28 = vadd.f32 %v1023_v26, %v399_v25 }
  0xab   : > { %v491_v33 = vmul.f32 0.01, %v380_v27  ;;  %v499_v34 = vmul.f32 0.01, %v400_v28  ;;  %vm459_vm0 = vcmp.ge.f32.partialorder %v380_v27, 0.0  ;;  %vm467_vm1 = vcmp.ge.f32.partialorder %v400_v28, 0.0 }
  0xad   : > { %v523_v41 = vsel %vm459_vm0, %v380_v27, %v491_v33  ;;  %v531_v42 = vsel %vm467_vm1, %v400_v28, %v499_v34 }
  0xaf   : > { %v419_v29 = vpop.f32.mrf.mxu2  ;;  %v439_v30 = vpop.f32.mrf.mxu3 }
  0xb0   : > { %v381_v31 = vpop.f32.mrf.mxu0  ;;  %v401_v32 = vpop.f32.mrf.mxu1  ;;  %v420_v39 = vadd.f32 %v1023_v26, %v419_v29  ;;  %v440_v40 = vadd.f32 %v1023_v26, %v439_v30 }
  0xb1   : > { %v382_v35 = vadd.f32 %v1023_v26, %v381_v31  ;;  %v402_v36 = vadd.f32 %v1023_v26, %v401_v32 }
  0xb2   : > { %v507_v49 = vmul.f32 0.01, %v420_v39  ;;  %v515_v50 = vmul.f32 0.01, %v440_v40  ;;  %vm475_vm4 = vcmp.ge.f32.partialorder %v420_v39, 0.0  ;;  %vm483_vm5 = vcmp.ge.f32.partialorder %v440_v40, 0.0 }
  0xb3   : > { %vm460_vm2 = vcmp.ge.f32.partialorder %v382_v35, 0.0  ;;  %v492_v37 = vmul.f32 0.01, %v382_v35  ;;  %vm468_vm3 = vcmp.ge.f32.partialorder %v402_v36, 0.0  ;;  %v500_v38 = vmul.f32 0.01, %v402_v36 }
  0xb4   : > { %v539_v57 = vsel %vm475_vm4, %v420_v39, %v507_v49  ;;  %v547_v58 = vsel %vm483_vm5, %v440_v40, %v515_v50 }
  0xb5   : > { %v524_v43 = vsel %vm460_vm2, %v382_v35, %v492_v37  ;;  %v532_v44 = vsel %vm468_vm3, %v402_v36, %v500_v38 }
  0xb6   : > { %v809_v45 = vpack.c.bf16 %v524_v43, %v523_v41  ;;  %v829_v46 = vpack.c.bf16 %v532_v44, %v531_v42 }
  0xb7   : > { %v421_v47 = vpop.f32.mrf.mxu2  ;;  %v441_v48 = vpop.f32.mrf.mxu3 }
  0xb8   : > { %810 = vst [vmem:[%s1036_s13] sm:$0xff] %v809_v45   ;;  %v422_v51 = vadd.f32 %v1023_v26, %v421_v47  ;;  %v442_v52 = vadd.f32 %v1023_v26, %v441_v48  ;;  %v384_v53 = vpop.f32.mrf.mxu0  ;;  %v404_v54 = vpop.f32.mrf.mxu1 }
  0xb9   : > { %889 = vst [vmem:[%s1036_s13 + $0x20] sm:$0xff] %v829_v46   ;;  %v385_v63 = vadd.f32 %v1023_v26, %v384_v53  ;;  %v405_v0 = vadd.f32 %v1023_v26, %v404_v54 }
  0xba   : > { %vm476_vm6 = vcmp.ge.f32.partialorder %v422_v51, 0.0  ;;  %v508_v55 = vmul.f32 0.01, %v422_v51  ;;  %vm484_vm7 = vcmp.ge.f32.partialorder %v442_v52, 0.0  ;;  %v516_v56 = vmul.f32 0.01, %v442_v52 }
  0xbb   : > { %v493_v5 = vmul.f32 0.01, %v385_v63  ;;  %v501_v6 = vmul.f32 0.01, %v405_v0  ;;  %vm461_vm8 = vcmp.ge.f32.partialorder %v385_v63, 0.0  ;;  %vm469_vm9 = vcmp.ge.f32.partialorder %v405_v0, 0.0 }
  0xbc   : > { %v540_v59 = vsel %vm476_vm6, %v422_v51, %v508_v55  ;;  %v548_v60 = vsel %vm484_vm7, %v442_v52, %v516_v56 }
  0xbd   : > { %v849_v61 = vpack.c.bf16 %v540_v59, %v539_v57  ;;  %v869_v62 = vpack.c.bf16 %v548_v60, %v547_v58  ;;  %v525_v13 = vsel %vm461_vm8, %v385_v63, %v493_v5  ;;  %v533_v14 = vsel %vm469_vm9, %v405_v0, %v501_v6 }
  0xbf   : > { %893 = vst [vmem:[%s1036_s13 + $0x40] sm:$0xff] %v849_v61   ;;  %v424_v1 = vpop.f32.mrf.mxu2  ;;  %v444_v2 = vpop.f32.mrf.mxu3 }
  0xc0   : > { %897 = vst [vmem:[%s1036_s13 + $0x60] sm:$0xff] %v869_v62   ;;  %v386_v3 = vpop.f32.mrf.mxu0  ;;  %v406_v4 = vpop.f32.mrf.mxu1  ;;  %v425_v11 = vadd.f32 %v1023_v26, %v424_v1  ;;  %v445_v12 = vadd.f32 %v1023_v26, %v444_v2 }
  0xc1   : > { %v387_v7 = vadd.f32 %v1023_v26, %v386_v3  ;;  %v407_v8 = vadd.f32 %v1023_v26, %v406_v4 }
  0xc2   : > { %v509_v21 = vmul.f32 0.01, %v425_v11  ;;  %v517_v22 = vmul.f32 0.01, %v445_v12  ;;  %vm477_vm12 = vcmp.ge.f32.partialorder %v425_v11, 0.0  ;;  %vm485_vm13 = vcmp.ge.f32.partialorder %v445_v12, 0.0 }
  0xc3   : > { %vm462_vm10 = vcmp.ge.f32.partialorder %v387_v7, 0.0  ;;  %v494_v9 = vmul.f32 0.01, %v387_v7  ;;  %vm470_vm11 = vcmp.ge.f32.partialorder %v407_v8, 0.0  ;;  %v502_v10 = vmul.f32 0.01, %v407_v8 }
  0xc4   : > { %v541_v30 = vsel %vm477_vm12, %v425_v11, %v509_v21  ;;  %v549_v31 = vsel %vm485_vm13, %v445_v12, %v517_v22 }
  0xc5   : > { %v526_v15 = vsel %vm462_vm10, %v387_v7, %v494_v9  ;;  %v534_v16 = vsel %vm470_vm11, %v407_v8, %v502_v10 }
  0xc6   : > { %v814_v17 = vpack.c.bf16 %v526_v15, %v525_v13  ;;  %v834_v18 = vpack.c.bf16 %v534_v16, %v533_v14 }
  0xc7   : > { %v426_v19 = vpop.f32.mrf.mxu2  ;;  %v446_v20 = vpop.f32.mrf.mxu3 }
  0xc8   : > { %886 = vst [vmem:[%s1036_s13 + $0x8] sm:$0xff] %v814_v17   ;;  %v427_v23 = vadd.f32 %v1023_v26, %v426_v19  ;;  %v447_v24 = vadd.f32 %v1023_v26, %v446_v20  ;;  %v389_v25 = vpop.f32.mrf.mxu0  ;;  %v409_v27 = vpop.f32.mrf.mxu1 }
  0xc9   : > { %890 = vst [vmem:[%s1036_s13 + $0x28] sm:$0xff] %v834_v18   ;;  %v390_v36 = vadd.f32 %v1023_v26, %v389_v25  ;;  %v410_v37 = vadd.f32 %v1023_v26, %v409_v27 }
  0xca   : > { %vm478_vm14 = vcmp.ge.f32.partialorder %v427_v23, 0.0  ;;  %v510_v28 = vmul.f32 0.01, %v427_v23  ;;  %vm486_vm15 = vcmp.ge.f32.partialorder %v447_v24, 0.0  ;;  %v518_v29 = vmul.f32 0.01, %v447_v24 }
  0xcb   : > { %v495_v42 = vmul.f32 0.01, %v390_v36  ;;  %v503_v43 = vmul.f32 0.01, %v410_v37  ;;  %vm463_vm0 = vcmp.ge.f32.partialorder %v390_v36, 0.0  ;;  %vm471_vm1 = vcmp.ge.f32.partialorder %v410_v37, 0.0 }
  0xcc   : > { %v542_v32 = vsel %vm478_vm14, %v427_v23, %v510_v28  ;;  %v550_v33 = vsel %vm486_vm15, %v447_v24, %v518_v29 }
  0xcd   : > { %v854_v34 = vpack.c.bf16 %v542_v32, %v541_v30  ;;  %v874_v35 = vpack.c.bf16 %v550_v33, %v549_v31  ;;  %v527_v50 = vsel %vm463_vm0, %v390_v36, %v495_v42  ;;  %v535_v51 = vsel %vm471_vm1, %v410_v37, %v503_v43 }
  0xcf   : > { %894 = vst [vmem:[%s1036_s13 + $0x48] sm:$0xff] %v854_v34   ;;  %v429_v38 = vpop.f32.mrf.mxu2  ;;  %v449_v39 = vpop.f32.mrf.mxu3 }
  0xd0   : > { %898 = vst [vmem:[%s1036_s13 + $0x68] sm:$0xff] %v874_v35   ;;  %v391_v40 = vpop.f32.mrf.mxu0  ;;  %v411_v41 = vpop.f32.mrf.mxu1  ;;  %v430_v48 = vadd.f32 %v1023_v26, %v429_v38  ;;  %v450_v49 = vadd.f32 %v1023_v26, %v449_v39 }
  0xd1   : > { %v392_v44 = vadd.f32 %v1023_v26, %v391_v40  ;;  %v412_v45 = vadd.f32 %v1023_v26, %v411_v41 }
  0xd2   : > { %v511_v58 = vmul.f32 0.01, %v430_v48  ;;  %v519_v59 = vmul.f32 0.01, %v450_v49  ;;  %vm479_vm4 = vcmp.ge.f32.partialorder %v430_v48, 0.0  ;;  %vm487_vm5 = vcmp.ge.f32.partialorder %v450_v49, 0.0 }
  0xd3   : > { %vm464_vm2 = vcmp.ge.f32.partialorder %v392_v44, 0.0  ;;  %v496_v46 = vmul.f32 0.01, %v392_v44  ;;  %vm472_vm3 = vcmp.ge.f32.partialorder %v412_v45, 0.0  ;;  %v504_v47 = vmul.f32 0.01, %v412_v45 }
  0xd4   : > { %v543_v2 = vsel %vm479_vm4, %v430_v48, %v511_v58  ;;  %v551_v3 = vsel %vm487_vm5, %v450_v49, %v519_v59 }
  0xd5   : > { %v528_v52 = vsel %vm464_vm2, %v392_v44, %v496_v46  ;;  %v536_v53 = vsel %vm472_vm3, %v412_v45, %v504_v47 }
  0xd6   : > { %v819_v54 = vpack.c.bf16 %v528_v52, %v527_v50  ;;  %v839_v55 = vpack.c.bf16 %v536_v53, %v535_v51 }
  0xd7   : > { %v431_v56 = vpop.f32.mrf.mxu2  ;;  %v451_v57 = vpop.f32.mrf.mxu3 }
  0xd8   : > { %887 = vst [vmem:[%s1036_s13 + $0x10] sm:$0xff] %v819_v54   ;;  %v432_v60 = vadd.f32 %v1023_v26, %v431_v56  ;;  %v452_v61 = vadd.f32 %v1023_v26, %v451_v57  ;;  %v394_v62 = vpop.f32.mrf.mxu0  ;;  %v414_v63 = vpop.f32.mrf.mxu1 }
  0xd9   : > { %891 = vst [vmem:[%s1036_s13 + $0x30] sm:$0xff] %v839_v55   ;;  %v395_v8 = vadd.f32 %v1023_v26, %v394_v62  ;;  %v415_v9 = vadd.f32 %v1023_v26, %v414_v63 }
  0xda   : > { %vm480_vm6 = vcmp.ge.f32.partialorder %v432_v60, 0.0  ;;  %v512_v0 = vmul.f32 0.01, %v432_v60  ;;  %vm488_vm7 = vcmp.ge.f32.partialorder %v452_v61, 0.0  ;;  %v520_v1 = vmul.f32 0.01, %v452_v61 }
  0xdb   : > { %v497_v14 = vmul.f32 0.01, %v395_v8  ;;  %v505_v15 = vmul.f32 0.01, %v415_v9  ;;  %vm465_vm8 = vcmp.ge.f32.partialorder %v395_v8, 0.0  ;;  %vm473_vm9 = vcmp.ge.f32.partialorder %v415_v9, 0.0 }
  0xdc   : > { %v544_v4 = vsel %vm480_vm6, %v432_v60, %v512_v0  ;;  %v552_v5 = vsel %vm488_vm7, %v452_v61, %v520_v1 }
  0xdd   : > { %v859_v6 = vpack.c.bf16 %v544_v4, %v543_v2  ;;  %v879_v7 = vpack.c.bf16 %v552_v5, %v551_v3  ;;  %v529_v22 = vsel %vm465_vm8, %v395_v8, %v497_v14  ;;  %v537_v23 = vsel %vm473_vm9, %v415_v9, %v505_v15 }
  0xdf   : > { %895 = vst [vmem:[%s1036_s13 + $0x50] sm:$0xff] %v859_v6   ;;  %v434_v10 = vpop.f32.mrf.mxu2  ;;  %v454_v11 = vpop.f32.mrf.mxu3 }
  0xe0   : > { %899 = vst [vmem:[%s1036_s13 + $0x70] sm:$0xff] %v879_v7   ;;  %v396_v12 = vpop.f32.mrf.mxu0  ;;  %v416_v13 = vpop.f32.mrf.mxu1  ;;  %v435_v20 = vadd.f32 %v1023_v26, %v434_v10  ;;  %v455_v21 = vadd.f32 %v1023_v26, %v454_v11 }
  0xe1   : > { %v397_v16 = vadd.f32 %v1023_v26, %v396_v12  ;;  %v417_v17 = vadd.f32 %v1023_v26, %v416_v13 }
  0xe2   : > { %v513_v31 = vmul.f32 0.01, %v435_v20  ;;  %v521_v32 = vmul.f32 0.01, %v455_v21  ;;  %vm481_vm12 = vcmp.ge.f32.partialorder %v435_v20, 0.0  ;;  %vm489_vm13 = vcmp.ge.f32.partialorder %v455_v21, 0.0 }
  0xe3   : > { %vm466_vm10 = vcmp.ge.f32.partialorder %v397_v16, 0.0  ;;  %v498_v18 = vmul.f32 0.01, %v397_v16  ;;  %vm474_vm11 = vcmp.ge.f32.partialorder %v417_v17, 0.0  ;;  %v506_v19 = vmul.f32 0.01, %v417_v17 }
  0xe4   : > { %v545_v37 = vsel %vm481_vm12, %v435_v20, %v513_v31  ;;  %v553_v38 = vsel %vm489_vm13, %v455_v21, %v521_v32 }
  0xe5   : > { %v530_v24 = vsel %vm466_vm10, %v397_v16, %v498_v18  ;;  %v538_v25 = vsel %vm474_vm11, %v417_v17, %v506_v19 }
  0xe6   : > { %v824_v27 = vpack.c.bf16 %v530_v24, %v529_v22  ;;  %v844_v28 = vpack.c.bf16 %v538_v25, %v537_v23 }
  0xe7   : > { %v436_v29 = vpop.f32.mrf.mxu2  ;;  %v456_v30 = vpop.f32.mrf.mxu3 }
  0xe8   : > { %888 = vst [vmem:[%s1036_s13 + $0x18] sm:$0xff] %v824_v27   ;;  %v437_v33 = vadd.f32 %v1023_v26, %v436_v29  ;;  %v457_v34 = vadd.f32 %v1023_v26, %v456_v30 }
  0xe9   : > { %892 = vst [vmem:[%s1036_s13 + $0x38] sm:$0xff] %v844_v28  }
  0xea   : > { %vm482_vm14 = vcmp.ge.f32.partialorder %v437_v33, 0.0  ;;  %v514_v35 = vmul.f32 0.01, %v437_v33  ;;  %vm490_vm15 = vcmp.ge.f32.partialorder %v457_v34, 0.0  ;;  %v522_v36 = vmul.f32 0.01, %v457_v34 }
  0xec   : > { %v546_v39 = vsel %vm482_vm14, %v437_v33, %v514_v35  ;;  %v554_v40 = vsel %vm490_vm15, %v457_v34, %v522_v36 }
  0xed   : > { %v864_v41 = vpack.c.bf16 %v546_v39, %v545_v37  ;;  %v884_v42 = vpack.c.bf16 %v554_v40, %v553_v38 }
  0xef   : > { %896 = vst [vmem:[%s1036_s13 + $0x58] sm:$0xff] %v864_v41  }
  0xf0   : > { %900 = vst [vmem:[%s1036_s13 + $0x78] sm:$0xff] %v884_v42  }
  0xf1 PF: > { %s13_s12 = sadd.s32 1, %s940_s12  }
  0xf2   : > { %p10_p4 = scmp.ge.s32.totalorder %s13_s12, 4  }
  0xf4   :  { %12 = sbr.rel (!%p10_p4) target bundleno = 1 (0x1), region = 62 }

// kernel: strided_residual_forward.7
= control target key start
LH: loop header
LB: loop body
LE: loop exit
PB: predicated region body
PF: predicated region fallthrough
CT: control target
= control target key end

     0   :  { %s2604_s21 = smov 0   ;;  %s3041_s0 = inlined_call_operand.vmem [shape: bf16[2,90,128], index: 0, kind: input, shape index: {}]   ;;  %s3042_s1 = inlined_call_operand.vmem [shape: bf16[2,90,128], index: 1, kind: input, shape index: {}]   ;;  %s3043_s2 = inlined_call_operand.vmem [shape: bf16[2,90,128], index: 2, kind: input, shape index: {}]   ;;  %s3044_s3 = inlined_call_operand.vmem [shape: bf16[2,90,128], index: 3, kind: input, shape index: {}]   ;;  %s3045_s4 = inlined_call_operand.vmem [shape: bf16[9,128,128], index: 4, kind: input, shape index: {}]   ;;  %s3046_s5 = inlined_call_operand.vmem [shape: f32[1,128], index: 5, kind: input, shape index: {}]   ;;  %s3047_s6 = inlined_call_operand.vmem [shape: bf16[2,72,128], index: 6, kind: output, shape index: {}]  }
   0x1 LB: > { %s1858_s22 = sadd.s32 4294967295, %s2567_s21   ;;  %p1862_p0 = scmp.ge.s32.totalorder %s2567_s21, 1  ;;  %s2567_s21 = sphi %s2604_s21, %s16_s21  }
   0x2   : > { %p242_p1 = scmp.lt.s32.totalorder %s2567_s21, 3 }
   0x4   : > { %p243_p2 = pnand %p1862_p0, %p242_p1 }
   0x5   : > { %p287_p3 = scmp.lt.s32.totalorder (!%p243_p2), %s1858_s22, 1 }
   0x6   : > { %246 = sbr.rel (%p243_p2) target bundleno = 368 (0x170), region = 44 }
   0xb   : > { %v2425_v0 = vld [vmem:[%s3045_s4 + $0xb8] sm:$0xff]  ;;  %v2424_v1 = vld [vmem:[%s3045_s4 + $0xb0] sm:$0xff]  ;;  %s3049_s22 = smov (!%p287_p3, %s1858_s22), 1  ;;  %v2423_v4 = vld [vmem:[%s3045_s4 + $0xa8] sm:$0xff]  ;;  %vm380_vm0 = vsmask.f32 7424 }
   0xc   : > { %473 = vmatpush.bf16.msra.mxu0 %v2425_v0  ;;  %2531 = vmatpush.bf16.msra.mxu1 %v2425_v0  ;;  %v2445_v2 = vld [vmem:[%s3045_s4 + $0x238] sm:$0xff]  ;;  %v2444_v3 = vld [vmem:[%s3045_s4 + $0x230] sm:$0xff]  ;;  %s2630_s9 = smul.u32 48, %s3049_s22  ;;  %v2443_v5 = vld [vmem:[%s3045_s4 + $0x228] sm:$0xff]  ;;  %vm800_vm1 = vcmask 1046528  }
   0xd   : > { %2532 = vmatpush.bf16.msra.mxu2 %v2425_v0  ;;  %863 = vmatpush.bf16.msra.mxu3 %v2445_v2  ;;  %v2422_v6 = vld [vmem:[%s3045_s4 + $0xa0] sm:$0xff]  ;;  %v2421_v11 = vld [vmem:[%s3045_s4 + $0x98] sm:$0xff]  ;;  %v2420_v19 = vld [vmem:[%s3045_s4 + $0x90] sm:$0xff]  ;;  %s2548_s17 = smul.u32 36, %s3049_s22 }
   0xe   : > { %s2642_s16 = scalar_lea.vmem %s3041_s0, %s2630_s9  ;;  %v2442_v9 = vld [vmem:[%s3045_s4 + $0x220] sm:$0xff]  ;;  %v2441_v15 = vld [vmem:[%s3045_s4 + $0x218] sm:$0xff]  ;;  %v2440_v26 = vld [vmem:[%s3045_s4 + $0x210] sm:$0xff]  ;;  %s2813_s14 = scalar_lea.vmem %s3042_s1, %s2630_s9 }
   0xf   : > { %v320_v7 = vld [vmem:[%s2642_s16 + $0x20] sm:$0xf]  ;;  %v337_v8 = vld [vmem:[%s2642_s16 + $0x24] sm:$0x1]  ;;  %v2656_v12 = vld [vmem:[%s2642_s16 + $0x10] sm:$0xff]  ;;  %s2908_s25 = scalar_lea.vmem %s3043_s2, %s2630_s9  ;;  %s2947_s15 = scalar_lea.vmem %s3044_s3, %s2630_s9 }
  0x10   : > { %474 = vmatpush.bf16.msra.mxu0 %v2424_v1  ;;  %2533 = vmatpush.bf16.msra.mxu1 %v2424_v1  ;;  %v2650_v10 = vld [vmem:[%s2642_s16] sm:$0xff]  ;;  %v2658_v13 = vunpack.c.l.b16 %v320_v7  ;;  %v374_v14 = vunpack.c.l.b16 %v337_v8  ;;  %v2664_v16 = vld [vmem:[%s2642_s16 + $0x8] sm:$0xff]  ;;  %v2668_v18 = vld [vmem:[%s2642_s16 + $0x18] sm:$0xff]  ;;  %v397_v20 = vshll.u32 %v2656_v12, 16  ;;  %v401_v29 = vshrl.u32 %v2656_v12, 16  ;;  %s3018_s20 = scalar_lea.vmem %s3047_s6, %s2548_s17 }
  0x11   : > { %2534 = vmatpush.bf16.msra.mxu2 %v2424_v1  ;;  %864 = vmatpush.bf16.msra.mxu3 %v2444_v3  ;;  %v384_v17 = vshll.u32 %v2650_v10, 16  ;;  %v2676_v22 = vld [vmem:[%s2642_s16 + $0x4] sm:$0xff]   ;;  %v382_v25 = vshrl.u32 %v2650_v10, 16  ;;  %v389_v28 = vshll.u32 %v2664_v16, 16  ;;  %v405_v30 = vshll.u32 %v2668_v18, 16  ;;  %v2700_v42 = vld [vmem:[%s2642_s16 + $0xc] sm:$0xff] }
  0x12   : > { %v379_v21 = vpack.c.b16 %v374_v14, %v2658_v13  ;;  %v2562_v23 = vld [vmem:[%s2642_s16 + $0x4] sm:$0xf0]  ;;  %v2563_v24 = vld [vmem:[%s2642_s16 + $0x4] sm:$0xe]  ;;  %v2690_v32 = vrot.slane %v397_v20, 1  ;;  %v2417_v44 = vld [vmem:[%s3045_s4 + $0x38] sm:$0xff] }
  0x13   : > { %v386_v27 = vrot.slane %v384_v17, 1  ;;  %v2419_v31 = vld [vmem:[%s3045_s4 + $0x88] sm:$0xff]  ;;  %v391_v36 = vrot.slane %v389_v28, 1  ;;  %v407_v37 = vrot.slane %v405_v30, 1  ;;  %v2418_v38 = vld [vmem:[%s3045_s4 + $0x80] sm:$0xff]  ;;  %v2564_v43 = vor.u32 %v2563_v24, %v2562_v23  ;;  %v2437_v45 = vld [vmem:[%s3045_s4 + $0x1b8] sm:$0xff] }
  0x14   : > { %475 = vmatpush.bf16.msra.mxu0 %v2423_v4  ;;  %2535 = vmatpush.bf16.msra.mxu1 %v2423_v4  ;;  %v413_v33 = vshll.u32 %v379_v21, 16  ;;  %v2439_v34 = vld [vmem:[%s3045_s4 + $0x208] sm:$0xff]  ;;  %v403_v39 = vor.u32 %v401_v29, %v2690_v32  ;;  %v417_v41 = vshrl.u32 %v379_v21, 16  ;;  %v2457_v46 = vld [vmem:[%s3045_s4 + $0x78] sm:$0xff]  ;;  %v2438_v50 = vld [vmem:[%s3045_s4 + $0x200] sm:$0xff]  ;;  %v802_v52 = vrot.slane %v2700_v42, 1 }
  0x15   : > { %2536 = vmatpush.bf16.msra.mxu2 %v2423_v4  ;;  %865 = vmatpush.bf16.msra.mxu3 %v2443_v5  ;;  %v387_v35 = vor.u32 %v386_v27, %v382_v25  ;;  %v801_v51 = vrot.slane %v2564_v43, 1  ;;  %v2416_v53 = vld [vmem:[%s3045_s4 + $0x30] sm:$0xff]  ;;  %v2495_v54 = vld [vmem:[%s3045_s4 + $0x178] sm:$0xff]  ;;  %v2415_v58 = vld [vmem:[%s3045_s4 + $0x28] sm:$0xff]  ;;  %v393_v62 = vshrl.u32 %v2664_v16, 16  ;;  %v409_v63 = vshrl.u32 %v2668_v18, 16 }
  0x16   : > { %v415_v40 = vrot.slane %v413_v33, 1  ;;  %v408_v48 = vsel %vm380_vm0, %v403_v39, %v407_v37  ;;  %v2436_v55 = vld [vmem:[%s3045_s4 + $0x1b0] sm:$0xff]  ;;  %v2435_v60 = vld [vmem:[%s3045_s4 + $0x1a8] sm:$0xff]  ;;  %v2414_v0 = vld [vmem:[%s3045_s4 + $0x20] sm:$0xff]  ;;  %v648_v20 = vshll.u32 %v2676_v22, 16  ;;  %v646_v27 = vshrl.u32 %v2676_v22, 16 }
  0x17   : > { %v392_v47 = vsel %vm380_vm0, %v387_v35, %v391_v36  ;;  %v2456_v56 = vld [vmem:[%s3045_s4 + $0x70] sm:$0xff]  ;;  %v803_v57 = vsel %vm800_vm1, %v801_v51, %v802_v52  ;;  %v2455_v61 = vld [vmem:[%s3045_s4 + $0x68] sm:$0xff]  ;;  %v2434_v1 = vld [vmem:[%s3045_s4 + $0x1a0] sm:$0xff]  ;;  %v395_v3 = vor.u32 %v393_v62, %v391_v36  ;;  %v411_v4 = vor.u32 %v409_v63, %v407_v37 }
  0x18   : > { %476 = vmatpush.bf16.msra.mxu0 %v2422_v6  ;;  %2537 = vmatpush.bf16.msra.mxu1 %v2422_v6  ;;  %v419_v49 = vor.u32 %v417_v41, %v415_v40  ;;  %v2494_v59 = vld [vmem:[%s3045_s4 + $0x170] sm:$0xff]  ;;  %v2454_v2 = vld [vmem:[%s3045_s4 + $0x60] sm:$0xff]  ;;  %v2433_v7 = vld [vmem:[%s3045_s4 + $0x198] sm:$0xff]  ;;  %v650_v28 = vrot.slane %v648_v20, 1  ;;  %v653_v29 = vshll.u32 %v2700_v42, 16 }
  0x19   : > { %2538 = vmatpush.bf16.msra.mxu2 %v2422_v6  ;;  %866 = vmatpush.bf16.msra.mxu3 %v2442_v9  ;;  %v2754_v5 = vld [vmem:[%s2642_s16 + $0x14] sm:$0xff]  ;;  %v400_v9 = vsel %vm380_vm0, %v395_v3, %v2690_v32  ;;  %v2493_v21 = vld [vmem:[%s3045_s4 + $0x168] sm:$0xff]  ;;  %v2410_v30 = vld [vmem:[%s3045_s4] sm:$0xff] }
  0x1a   : > { %v2413_v6 = vld [vmem:[%s3045_s4 + $0x18] sm:$0xff]  ;;  %v804_v14 = vrot.slane %v2754_v5, 1  ;;  %v2432_v17 = vld [vmem:[%s3045_s4 + $0x190] sm:$0xff]  ;;  %v2411_v24 = vld [vmem:[%s3045_s4 + $0x8] sm:$0xff]  ;;  %v651_v32 = vor.u32 %v650_v28, %v646_v27  ;;  %v655_v33 = vrot.slane %v653_v29, 1  ;;  %v661_v51 = vshll.u32 %v2754_v5, 16 }
  0x1b   : > { %v2453_v8 = vld [vmem:[%s3045_s4 + $0x58] sm:$0xff]  ;;  %v2431_v25 = vld [vmem:[%s3045_s4 + $0x188] sm:$0xff]  ;;  %v2450_v22 = vld [vmem:[%s3045_s4 + $0x40] sm:$0xff] }
  0x1c   : > { %477 = vmatpush.bf16.msra.mxu0 %v2421_v11  ;;  %2539 = vmatpush.bf16.msra.mxu1 %v2421_v11  ;;  %v805_v23 = vsel %vm800_vm1, %v802_v52, %v804_v14  ;;  %v2470_v35 = vld [vmem:[%s3045_s4 + $0x1f8] sm:$0xff]  ;;  %v2446_v39 = vld [vmem:[%s2813_s14] sm:$0xff]  ;;  %v2469_v41 = vld [vmem:[%s3045_s4 + $0x1f0] sm:$0xff] }
  0x1d   : > { %2540 = vmatpush.bf16.msra.mxu2 %v2421_v11  ;;  %867 = vmatpush.bf16.msra.mxu3 %v2441_v15  ;;  %v416_v11 = vsel %vm380_vm0, %v411_v4, %v415_v40  ;;  %v2412_v15 = vld [vmem:[%s3045_s4 + $0x10] sm:$0xff]  ;;  %v2507_v36 = vld [vmem:[%s3045_s4 + $0x138] sm:$0xff]  ;;  %v2479_v52 = vld [vmem:[%s3045_s4 + $0xe0] sm:$0xff] }
  0x1e   : > { %v2819_v37 = vld [vmem:[%s2642_s16 + $0x1c] sm:$0xff]  ;;  %v2481_v40 = vld [vmem:[%s3045_s4 + $0xf0] sm:$0xff]  ;;  %v2447_v62 = vld [vmem:[%s2813_s14 + $0x8] sm:$0xff] }
  0x1f   : > { %v806_v43 = vrot.slane %v2819_v37, 1  ;;  %v2465_v3 = vld [vmem:[%s3045_s4 + $0x1d0] sm:$0xff]  ;;  %v2501_v20 = vld [vmem:[%s3045_s4 + $0x108] sm:$0xff] }
  0x20   : > { %478 = vmatpush.bf16.msra.mxu0 %v2420_v19  ;;  %2541 = vmatpush.bf16.msra.mxu1 %v2420_v19 }
  0x21   : > { %2542 = vmatpush.bf16.msra.mxu2 %v2420_v19  ;;  %868 = vmatpush.bf16.msra.mxu3 %v2440_v26  ;;  %v2452_v19 = vld [vmem:[%s3045_s4 + $0x50] sm:$0xff]  ;;  %v2451_v26 = vld [vmem:[%s3045_s4 + $0x48] sm:$0xff] }
  0x24   : > { %479 = vmatpush.bf16.msra.mxu0 %v2419_v31  ;;  %2543 = vmatpush.bf16.msra.mxu1 %v2419_v31 }
  0x25   : > { %2544 = vmatpush.bf16.msra.mxu2 %v2419_v31  ;;  %869 = vmatpush.bf16.msra.mxu3 %v2439_v34  ;;  %v2430_v31 = vld [vmem:[%s3045_s4 + $0x180] sm:$0xff]  ;;  %v2482_v34 = vld [vmem:[%s3045_s4 + $0xf8] sm:$0xff] }
  0x28   : > { %480 = vmatpush.bf16.msra.mxu0 %v2418_v38  ;;  %2545 = vmatpush.bf16.msra.mxu1 %v2418_v38 }
  0x29   : > { %2546 = vmatpush.bf16.msra.mxu2 %v2418_v38  ;;  %870 = vmatpush.bf16.msra.mxu3 %v2438_v50  ;;  %v656_v38 = vsel %vm380_vm0, %v651_v32, %v655_v33  ;;  %v657_v50 = vshrl.u32 %v2700_v42, 16  ;;  %v1994_v42 = vld [vmem:[%s2642_s16 + $0x24] sm:$0xf] }
  0x2b   : > { %481 = vmatmul.bf16.vlgmr.msra.gmra.mxu0 %v392_v47  ;;  %491 = vmatmul.bf16.vlgmr.msra.gmra.mxu1 %v408_v48  ;;  %v2468_v47 = vld [vmem:[%s3045_s4 + $0x1e8] sm:$0xff]  ;;  %v807_v48 = vsel %vm800_vm1, %v804_v14, %v806_v43 }
  0x2c   : > { %560 = vmatpush.bf16.msrb.mxu1 %v2417_v44  ;;  %1007 = vmatpush.bf16.msrb.mxu0 %v2457_v46  ;;  %v2506_v44 = vld [vmem:[%s3045_s4 + $0x130] sm:$0xff]  ;;  %v2480_v46 = vld [vmem:[%s3045_s4 + $0xe8] sm:$0xff] }
  0x2d   : > { %737 = vmatpush.bf16.msrb.mxu2 %v2437_v45  ;;  %1523 = vmatpush.bf16.msrb.mxu3 %v2495_v54  ;;  %v2492_v45 = vld [vmem:[%s3045_s4 + $0x160] sm:$0xff] }
  0x2e   : > { %501 = vmatmul.bf16.vlgmr.msra.gmra.mxu2 %v419_v49  ;;  %871 = vmatmul.bf16.vlgmr.msra.gmra.mxu3 %v803_v57  ;;  %v2491_v49 = vld [vmem:[%s3045_s4 + $0x158] sm:$0xff]  ;;  %v2504_v54 = vld [vmem:[%s3045_s4 + $0x120] sm:$0xff]  ;;  %v663_v57 = vrot.slane %v661_v51, 1 }
  0x30   : > { %561 = vmatpush.bf16.msrb.mxu1 %v2416_v53  ;;  %1008 = vmatpush.bf16.msrb.mxu0 %v2456_v56  ;;  %v2467_v53 = vld [vmem:[%s3045_s4 + $0x1e0] sm:$0xff]  ;;  %v659_v56 = vor.u32 %v657_v50, %v655_v33 }
  0x31   : > { %738 = vmatpush.bf16.msrb.mxu2 %v2436_v55  ;;  %1524 = vmatpush.bf16.msrb.mxu3 %v2494_v59  ;;  %v2429_v55 = vld [vmem:[%s2642_s16 + $0x24] sm:$0x10] }
  0x32   : > { %v2866_v59 = vor.u32 %v2429_v55, %v1994_v42  ;;  %v2486_v42 = vld [vmem:[%s2908_s25 + $0x18] sm:$0xff] }
  0x34   : > { %562 = vmatpush.bf16.msrb.mxu1 %v2415_v58  ;;  %1009 = vmatpush.bf16.msrb.mxu0 %v2455_v61  ;;  %v2478_v58 = vld [vmem:[%s3045_s4 + $0xd8] sm:$0xff]  ;;  %v664_v61 = vsel %vm380_vm0, %v659_v56, %v663_v57  ;;  %v808_v63 = vrot.slane %v2866_v59, 1 }
  0x35   : > { %739 = vmatpush.bf16.msrb.mxu2 %v2435_v60  ;;  %1525 = vmatpush.bf16.msrb.mxu3 %v2493_v21  ;;  %v2466_v60 = vld [vmem:[%s3045_s4 + $0x1d8] sm:$0xff]  ;;  %v2488_v21 = vld [vmem:[%s3045_s4 + $0x140] sm:$0xff] }
  0x36   : > { %v809_v4 = vsel %vm800_vm1, %v806_v43, %v808_v63 }
  0x38   : > { %563 = vmatpush.bf16.msrb.mxu1 %v2414_v0  ;;  %1010 = vmatpush.bf16.msrb.mxu0 %v2454_v2  ;;  %v2477_v0 = vld [vmem:[%s3045_s4 + $0xd0] sm:$0xff] }
  0x39   : > { %740 = vmatpush.bf16.msrb.mxu2 %v2434_v1  ;;  %1526 = vmatpush.bf16.msrb.mxu3 %v2492_v45  ;;  %v2503_v1 = vld [vmem:[%s3045_s4 + $0x118] sm:$0xff]  ;;  %v2490_v2 = vld [vmem:[%s3045_s4 + $0x150] sm:$0xff] }
  0x3b   : > { %486 = vmatmul.bf16.gmra.mxu0 %v400_v9  ;;  %496 = vmatmul.bf16.gmra.mxu1 %v416_v11  ;;  %v669_v9 = vshll.u32 %v2819_v37, 16 }
  0x3c   : > { %564 = vmatpush.bf16.msrb.mxu1 %v2413_v6  ;;  %1011 = vmatpush.bf16.msrb.mxu0 %v2453_v8  ;;  %v2476_v6 = vld [vmem:[%s3045_s4 + $0xc8] sm:$0xff]  ;;  %v665_v8 = vshrl.u32 %v2754_v5, 16  ;;  %v2475_v5 = vld [vmem:[%s3045_s4 + $0xc0] sm:$0xff] }
  0x3d   : > { %741 = vmatpush.bf16.msrb.mxu2 %v2433_v7  ;;  %1527 = vmatpush.bf16.msrb.mxu3 %v2491_v49  ;;  %v2489_v7 = vld [vmem:[%s3045_s4 + $0x148] sm:$0xff]  ;;  %v671_v14 = vrot.slane %v669_v9, 1 }
  0x3e   : > { %876 = vmatmul.bf16.gmra.mxu3 %v805_v23  ;;  %v667_v11 = vor.u32 %v665_v8, %v663_v57  ;;  %v2463_v23 = vld [vmem:[%s3045_s4 + $0x1c0] sm:$0xff]  ;;  %v2459_v49 = vld [vmem:[%s2813_s14 + $0xc] sm:$0xff]  ;;  %v1455_v57 = vshll.u32 %v2486_v42, 16  ;;  %v1459_v8 = vshrl.u32 %v2486_v42, 16 }
  0x40   : > { %565 = vmatpush.bf16.msrb.mxu1 %v2412_v15  ;;  %1012 = vmatpush.bf16.msrb.mxu0 %v2452_v19  ;;  %v672_v15 = vsel %vm380_vm0, %v667_v11, %v671_v14  ;;  %v2464_v19 = vld [vmem:[%s3045_s4 + $0x1c8] sm:$0xff] }
  0x41   : > { %742 = vmatpush.bf16.msrb.mxu2 %v2432_v17  ;;  %1528 = vmatpush.bf16.msrb.mxu3 %v2490_v2  ;;  %v2448_v17 = vld [vmem:[%s2813_s14 + $0x10] sm:$0xff]  ;;  %v2487_v2 = vld [vmem:[%s2908_s25 + $0x20] sm:$0x10]  ;;  %v2472_v11 = vld [vmem:[%s2908_s25 + $0x8] sm:$0xff] }
  0x44   : > { %566 = vmatpush.bf16.msrb.mxu1 %v2411_v24  ;;  %1013 = vmatpush.bf16.msrb.mxu0 %v2451_v26  ;;  %v2483_v24 = vld [vmem:[%s2908_s25] sm:$0xff]  ;;  %v2484_v26 = vld [vmem:[%s2908_s25 + $0x8] sm:$0xff] }
  0x45   : > { %743 = vmatpush.bf16.msrb.mxu2 %v2431_v25  ;;  %1529 = vmatpush.bf16.msrb.mxu3 %v2489_v7  ;;  %v677_v25 = vshll.u32 %v2866_v59, 16  ;;  %v1434_v27 = vshll.u32 %v2483_v24, 16  ;;  %v1439_v32 = vshll.u32 %v2484_v26, 16  ;;  %v1443_v43 = vshrl.u32 %v2484_v26, 16 }
  0x47   : > { %v679_v29 = vrot.slane %v677_v25, 1 }
  0x48   : > { %567 = vmatpush.bf16.msrb.mxu1 %v2410_v30  ;;  %1014 = vmatpush.bf16.msrb.mxu0 %v2450_v22  ;;  %v1432_v30 = vshrl.u32 %v2483_v24, 16  ;;  %v2449_v22 = vld [vmem:[%s2813_s14 + $0x18] sm:$0xff] }
  0x49   : > { %744 = vmatpush.bf16.msrb.mxu2 %v2430_v31  ;;  %1530 = vmatpush.bf16.msrb.mxu3 %v2488_v21  ;;  %v1436_v31 = vrot.slane %v1434_v27, 1  ;;  %v2461_v21 = vld [vmem:[%s2813_s14 + $0x1c] sm:$0xff] }
  0x4a   : > { %v1125_v27 = vshll.u32 %v2461_v21, 16 }
  0x4b   : > { %568 = vmatmul.bf16.vlgmr.msrb.gmra.mxu1 %v2650_v10  ;;  %1015 = vmatmul.bf16.vlgmr.msrb.gmra.mxu0 %v2446_v39  ;;  %v2505_v10 = vld [vmem:[%s3045_s4 + $0x128] sm:$0xff]  ;;  %v2485_v39 = vld [vmem:[%s2908_s25 + $0x10] sm:$0xff] }
  0x4c   : > { %1193 = vmatpush.bf16.msra.mxu1 %v2470_v35  ;;  %1667 = vmatpush.bf16.msra.mxu0 %v2507_v36  ;;  %v1437_v35 = vor.u32 %v1436_v31, %v1432_v30  ;;  %v1441_v36 = vrot.slane %v1439_v32, 1  ;;  %v1451_v56 = vshrl.u32 %v2485_v39, 16  ;;  %v1127_v30 = vrot.slane %v1125_v27, 1  ;;  %v2473_v31 = vld [vmem:[%s2908_s25 + $0x10] sm:$0xff] }
  0x4d   : > { %1337 = vmatpush.bf16.msra.mxu2 %v2482_v34  ;;  %v2500_v34 = vld [vmem:[%s3045_s4 + $0x100] sm:$0xff] }
  0x4e   : > { %745 = vmatmul.bf16.vlgmr.msrb.gmra.mxu2 %v656_v38  ;;  %881 = vmatmul.bf16.gmra.mxu3 %v807_v48  ;;  %v913_v38 = vld [vmem:[%s2813_s14 + $0x20] sm:$0xf]  ;;  %v2458_v48 = vld [vmem:[%s2813_s14 + $0x4] sm:$0xff] }
  0x4f   : > { %v1104_v50 = vshll.u32 %v2458_v48, 16 }
  0x50   : > { %1194 = vmatpush.bf16.msra.mxu1 %v2469_v41  ;;  %1668 = vmatpush.bf16.msra.mxu0 %v2506_v44  ;;  %v948_v41 = vunpack.c.l.b16 %v913_v38  ;;  %v1447_v44 = vshll.u32 %v2485_v39, 16  ;;  %v2462_v38 = vld [vmem:[%s2813_s14 + $0x24] sm:$0x10] }
  0x51   : > { %1338 = vmatpush.bf16.msra.mxu2 %v2481_v40  ;;  %v681_v40 = vshrl.u32 %v2866_v59, 16  ;;  %v2496_v59 = vld [vmem:[%s2947_s15] sm:$0xff] }
  0x53   : > { %v683_v45 = vor.u32 %v681_v40, %v679_v29 }
  0x54   : > { %1195 = vmatpush.bf16.msra.mxu1 %v2468_v47  ;;  %1669 = vmatpush.bf16.msra.mxu0 %v2505_v10  ;;  %v953_v47 = vpack.c.b16 %v948_v41, %v948_v41  ;;  %v1449_v10 = vrot.slane %v1447_v44, 1 }
  0x55   : > { %1339 = vmatpush.bf16.msra.mxu2 %v2480_v46  ;;  %v506_v46 = vpack.c.b16 %v2658_v13, %v2658_v13 }
  0x58   : > { %1196 = vmatpush.bf16.msra.mxu1 %v2467_v53  ;;  %1670 = vmatpush.bf16.msra.mxu0 %v2504_v54  ;;  %v1106_v53 = vrot.slane %v1104_v50, 1  ;;  %v1109_v54 = vshll.u32 %v2459_v49, 16 }
  0x59   : > { %1340 = vmatpush.bf16.msra.mxu2 %v2479_v52  ;;  %v1102_v52 = vshrl.u32 %v2458_v48, 16 }
  0x5a   : > { %v1111_v55 = vrot.slane %v1109_v54, 1 }
  0x5b   : > { %573 = vmatmul.bf16.gmra.mxu1 %v2664_v16  ;;  %1020 = vmatmul.bf16.gmra.mxu0 %v2447_v62  ;;  %v2502_v16 = vld [vmem:[%s3045_s4 + $0x110] sm:$0xff]  ;;  %v1107_v13 = vor.u32 %v1106_v53, %v1102_v52  ;;  %v1457_v62 = vrot.slane %v1455_v57, 1 }
  0x5c   : > { %1197 = vmatpush.bf16.msra.mxu1 %v2466_v60  ;;  %1671 = vmatpush.bf16.msra.mxu0 %v2503_v1  ;;  %v2306_v1 = vld [vmem:[%s2908_s25 + $0x20] sm:$0xf] }
  0x5d   : > { %1341 = vmatpush.bf16.msra.mxu2 %v2478_v58  ;;  %v2471_v58 = vld [vmem:[%s2908_s25] sm:$0xff]  ;;  %v1112_v60 = vsel %vm380_vm0, %v1107_v13, %v1111_v55 }
  0x5e   : > { %750 = vmatmul.bf16.gmra.mxu2 %v664_v61  ;;  %886 = vmatmul.bf16.gmra.mxu3 %v809_v4  ;;  %v1453_v61 = vor.u32 %v1451_v56, %v1449_v10 }
  0x60   : > { %1198 = vmatpush.bf16.msra.mxu1 %v2465_v3  ;;  %1672 = vmatpush.bf16.msra.mxu0 %v2502_v16  ;;  %v1113_v3 = vshrl.u32 %v2459_v49, 16  ;;  %v2499_v49 = vld [vmem:[%s2947_s15 + $0x18] sm:$0xff] }
  0x61   : > { %1342 = vmatpush.bf16.msra.mxu2 %v2477_v0  ;;  %v1458_v0 = vsel %vm380_vm0, %v1453_v61, %v1457_v62 }
  0x62   : > { %v1115_v16 = vor.u32 %v1113_v3, %v1111_v55  ;;  %v1243_v55 = vld [vmem:[%s2908_s25 + $0x20] sm:$0xf] }
  0x63   : > { %v1278_v61 = vunpack.c.l.b16 %v1243_v55 }
  0x64   : > { %1199 = vmatpush.bf16.msra.mxu1 %v2464_v19  ;;  %1673 = vmatpush.bf16.msra.mxu0 %v2501_v20 }
  0x65   : > { %1343 = vmatpush.bf16.msra.mxu2 %v2476_v6  ;;  %v2307_v6 = vor.u32 %v2487_v2, %v2306_v1 }
  0x67   : > { %v1463_v9 = vshll.u32 %v2307_v6, 16 }
  0x68   : > { %1200 = vmatpush.bf16.msra.mxu1 %v2463_v23  ;;  %1674 = vmatpush.bf16.msra.mxu0 %v2500_v34 }
  0x69   : > { %1344 = vmatpush.bf16.msra.mxu2 %v2475_v5  ;;  %v1461_v5 = vor.u32 %v1459_v8, %v1457_v62  ;;  %v1465_v20 = vrot.slane %v1463_v9, 1 }
  0x6b   : > { %578 = vmatmul.bf16.gmra.mxu1 %v2656_v12  ;;  %1025 = vmatmul.bf16.gmra.mxu0 %v2448_v17  ;;  %v673_v12 = vshrl.u32 %v2819_v37, 16  ;;  %v1442_v37 = vsel %vm380_vm0, %v1437_v35, %v1441_v36  ;;  %v1466_v23 = vsel %vm380_vm0, %v1461_v5, %v1465_v20 }
  0x6d   : > { %v675_v28 = vor.u32 %v673_v12, %v671_v14  ;;  %v2497_v14 = vld [vmem:[%s2947_s15 + $0x8] sm:$0xff] }
  0x6e   : > { %755 = vmatmul.bf16.gmra.mxu2 %v672_v15  ;;  %891 = vmatmul.bf16.gmra.mxu3 %v808_v63  ;;  %v2460_v63 = vld [vmem:[%s2813_s14 + $0x14] sm:$0xff] }
  0x6f   : > { %v680_v33 = vsel %vm380_vm0, %v675_v28, %v679_v29  ;;  %v1117_v4 = vshll.u32 %v2460_v63, 16  ;;  %v1121_v26 = vshrl.u32 %v2460_v63, 16 }
  0x71   : > { %v1119_v7 = vrot.slane %v1117_v4, 1  ;;  %v1283_v4 = vpack.c.b16 %v1278_v61, %v1278_v61 }
  0x73   : > { %v1120_v19 = vsel %vm380_vm0, %v1115_v16, %v1119_v7  ;;  %v1123_v29 = vor.u32 %v1121_v26, %v1119_v7 }
  0x7b   : > { %583 = vmatmul.bf16.gmra.mxu1 %v2668_v18  ;;  %1030 = vmatmul.bf16.gmra.mxu0 %v2449_v22  ;;  %v1445_v18 = vor.u32 %v1443_v43, %v1441_v36  ;;  %v1467_v22 = vshrl.u32 %v2307_v6, 16  ;;  %v1128_v36 = vsel %vm380_vm0, %v1123_v29, %v1127_v30 }
  0x7d   : > { %v1450_v51 = vsel %vm380_vm0, %v1445_v18, %v1449_v10  ;;  %v1469_v40 = vor.u32 %v1467_v22, %v1465_v20  ;;  %v2474_v10 = vld [vmem:[%s2908_s25 + $0x18] sm:$0xff] }
  0x7e   : > { %760 = vmatmul.bf16.gmra.mxu2 %v680_v33  ;;  %1531 = vmatmul.bf16.vlgmr.msrb.gmra.mxu3 %v1442_v37  ;;  %v2498_v33 = vld [vmem:[%s2947_s15 + $0x10] sm:$0xff]  ;;  %v2174_v37 = vld [vmem:[%s2813_s14 + $0x24] sm:$0xf] }
  0x7f   : > { %v2175_v41 = vor.u32 %v2462_v38, %v2174_v37 }
  0x8b   : > { %588 = vmatmul.bf16.gmra.mxu1 %v506_v46  ;;  %1035 = vmatmul.bf16.gmra.mxu0 %v953_v47  ;;  %v1133_v46 = vshll.u32 %v2175_v41, 16 }
  0x8d   : > { %v1135_v18 = vrot.slane %v1133_v46, 1 }
  0x8e   : > { %765 = vmatmul.bf16.gmra.mxu2 %v683_v45  ;;  %1536 = vmatmul.bf16.gmra.mxu3 %v1450_v51  ;;  %v1129_v45 = vshrl.u32 %v2461_v21, 16 }
  0x90   : > { %v1131_v48 = vor.u32 %v1129_v45, %v1127_v30 }
  0x92   : > { %v1136_v52 = vsel %vm380_vm0, %v1131_v48, %v1135_v18 }
  0x9b   : > { %1201 = vmatmul.bf16.vlgmr.msra.gmra.mxu1 %v1112_v60  ;;  %1675 = vmatmul.bf16.vlgmr.msra.gmra.mxu0 %v2496_v59  ;;  %v1573_v59 = vld [vmem:[%s2947_s15 + $0x20] sm:$0xf] }
  0x9c   : > { %v1608_v1 = vunpack.c.l.b16 %v1573_v59 }
  0x9e   : > { %1345 = vmatmul.bf16.vlgmr.msra.gmra.mxu2 %v2471_v58  ;;  %1541 = vmatmul.bf16.gmra.mxu3 %v1458_v0  ;;  %v1137_v0 = vshrl.u32 %v2175_v41, 16  ;;  %v1613_v7 = vpack.c.b16 %v1608_v1, %v1608_v1 }
  0xa0   : > { %v1139_v16 = vor.u32 %v1137_v0, %v1135_v18 }
  0xa8   : > { %v482_v15 = vpop.f32.mrf.mxu0  ;;  %v2958_v17 = vpop.f32.mrf.mxu1 }
  0xab   : > { %1206 = vmatmul.bf16.gmra.mxu1 %v1120_v19  ;;  %1680 = vmatmul.bf16.gmra.mxu0 %v2497_v14 }
  0xae   : > { %1350 = vmatmul.bf16.gmra.mxu2 %v2472_v11  ;;  %1546 = vmatmul.bf16.gmra.mxu3 %v1466_v23 }
  0xb0   : > { %v484_v12 = vpop.f32.mrf.mxu0  ;;  %v2965_v25 = vpop.f32.mrf.mxu1 }
  0xb1   : > { %v2963_v24 = vpop.f32.mrf.mxu2  ;;  %v872_v28 = vpop.f32.mrf.mxu3 }
  0xb8   : > { %v487_v34 = vpop.f32.mrf.mxu0  ;;  %v2969_v35 = vpop.f32.mrf.mxu1 }
  0xb9   : > { %v504_v32 = vpop.f32.mrf.mxu2  ;;  %v874_v39 = vpop.f32.mrf.mxu3 }
  0xbb   : > { %1211 = vmatmul.bf16.gmra.mxu1 %v1128_v36  ;;  %1685 = vmatmul.bf16.gmra.mxu0 %v2498_v33 }
  0xbe   : > { %1355 = vmatmul.bf16.gmra.mxu2 %v2473_v31  ;;  %1551 = vmatmul.bf16.gmra.mxu3 %v1469_v40 }
  0xc0   : > { %v489_v43 = vpop.f32.mrf.mxu0  ;;  %v2974_v44 = vpop.f32.mrf.mxu1 }
  0xc1   : > { %v877_v47 = vpop.f32.mrf.mxu3 }
  0xc8   : > { %v569_v50 = vpop.f32.mrf.mxu1  ;;  %v1016_v51 = vpop.f32.mrf.mxu0 }
  0xc9   : > { %v570_v53 = vadd.f32 %v569_v50, %v482_v15  ;;  %v879_v54 = vpop.f32.mrf.mxu3 }
  0xcb   : > { %1216 = vmatmul.bf16.gmra.mxu1 %v1136_v52  ;;  %1690 = vmatmul.bf16.gmra.mxu0 %v2499_v49 }
  0xce   : > { %1360 = vmatmul.bf16.gmra.mxu2 %v2474_v10 }
  0xd0   : > { %v571_v57 = vpop.f32.mrf.mxu1  ;;  %v1018_v58 = vpop.f32.mrf.mxu0 }
  0xd1   : > { %v746_v42 = vpop.f32.mrf.mxu2  ;;  %v572_v60 = vadd.f32 %v571_v57, %v484_v12  ;;  %v882_v63 = vpop.f32.mrf.mxu3 }
  0xd2   : > { %v770_v13 = vadd.f32 %v746_v42, %v570_v53 }
  0xd4   : > { %v896_v56 = vadd.f32 %v872_v28, %v770_v13 }
  0xd6   : > { %v2981_v62 = vadd.f32 %v1016_v51, %v896_v56 }
  0xd8   : > { %v574_v8 = vpop.f32.mrf.mxu1  ;;  %v1021_v9 = vpop.f32.mrf.mxu0 }
  0xd9   : > { %v748_v2 = vpop.f32.mrf.mxu2  ;;  %v575_v11 = vadd.f32 %v574_v8, %v487_v34  ;;  %v884_v15 = vpop.f32.mrf.mxu3 }
  0xda   : > { %v771_v3 = vadd.f32 %v748_v2, %v572_v60 }
  0xdb   : > { %1221 = vmatmul.bf16.gmra.mxu1 %v1139_v16  ;;  %1695 = vmatmul.bf16.gmra.mxu0 %v1613_v7 }
  0xdc   : > { %v897_v6 = vadd.f32 %v874_v39, %v771_v3 }
  0xde   : > { %1365 = vmatmul.bf16.gmra.mxu2 %v1283_v4  ;;  %v2983_v14 = vadd.f32 %v1018_v58, %v897_v6 }
  0xe0   : > { %v576_v21 = vpop.f32.mrf.mxu1  ;;  %v1023_v23 = vpop.f32.mrf.mxu0 }
  0xe1   : > { %v751_v19 = vpop.f32.mrf.mxu2  ;;  %v577_v12 = vadd.f32 %v576_v21, %v489_v43  ;;  %v887_v27 = vpop.f32.mrf.mxu3 }
  0xe2   : > { %v772_v5 = vadd.f32 %v751_v19, %v575_v11 }
  0xe4   : > { %v898_v20 = vadd.f32 %v877_v47, %v772_v5 }
  0xe6   : > { %v2985_v26 = vadd.f32 %v1021_v9, %v898_v20 }
  0xe8   : > { %v579_v31 = vpop.f32.mrf.mxu1  ;;  %v1026_v32 = vpop.f32.mrf.mxu0 }
  0xe9   : > { %v753_v28 = vpop.f32.mrf.mxu2  ;;  %v580_v33 = vadd.f32 %v579_v31, %v2958_v17  ;;  %v889_v34 = vpop.f32.mrf.mxu3 }
  0xea   : > { %v773_v29 = vadd.f32 %v753_v28, %v577_v12 }
  0xec   : > { %v899_v30 = vadd.f32 %v879_v54, %v773_v29 }
  0xee   : > { %v2988_v22 = vadd.f32 %v1023_v23, %v899_v30 }
  0xf0   : > { %v581_v39 = vpop.f32.mrf.mxu1  ;;  %v1028_v40 = vpop.f32.mrf.mxu0 }
  0xf1   : > { %v756_v36 = vpop.f32.mrf.mxu2  ;;  %v582_v41 = vadd.f32 %v581_v39, %v2965_v25  ;;  %v892_v45 = vpop.f32.mrf.mxu3 }
  0xf2   : > { %v774_v37 = vadd.f32 %v756_v36, %v580_v33 }
  0xf4   : > { %v900_v38 = vadd.f32 %v882_v63, %v774_v37 }
  0xf6   : > { %v2991_v43 = vadd.f32 %v1026_v32, %v900_v38 }
  0xf8   : > { %v584_v18 = vpop.f32.mrf.mxu1  ;;  %v1031_v10 = vpop.f32.mrf.mxu0 }
  0xf9   : > { %v758_v46 = vpop.f32.mrf.mxu2  ;;  %v585_v17 = vadd.f32 %v584_v18, %v2969_v35  ;;  %v894_v50 = vpop.f32.mrf.mxu3 }
  0xfa   : > { %v775_v47 = vadd.f32 %v758_v46, %v582_v41 }
  0xfc   : > { %v901_v48 = vadd.f32 %v884_v15, %v775_v47 }
  0xfe   : > { %v2994_v49 = vadd.f32 %v1028_v40, %v901_v48 }
 0x100   : > { %v586_v54 = vpop.f32.mrf.mxu1  ;;  %v1033_v42 = vpop.f32.mrf.mxu0 }
 0x101   : > { %v761_v51 = vpop.f32.mrf.mxu2  ;;  %v587_v25 = vadd.f32 %v586_v54, %v2974_v44  ;;  %v1532_v55 = vpop.f32.mrf.mxu3 }
 0x102   : > { %v776_v52 = vadd.f32 %v761_v51, %v585_v17 }
 0x104   : > { %v902_v53 = vadd.f32 %v887_v27, %v776_v52  ;;  %v3009_v27 = vld [vmem:[%s3046_s5] ss:$0 sm:$0xff] }
 0x106   : > { %v2997_v13 = vadd.f32 %v1031_v10, %v902_v53 }
 0x108   : > { %v589_v59 = vpop.f32.mrf.mxu1  ;;  %v1036_v60 = vpop.f32.mrf.mxu0 }
 0x109   : > { %v763_v56 = vpop.f32.mrf.mxu2  ;;  %v590_v35 = vadd.f32 %v589_v59, %v2963_v24  ;;  %v1534_v63 = vpop.f32.mrf.mxu3 }
 0x10a   : > { %v777_v57 = vadd.f32 %v763_v56, %v587_v25 }
 0x10c   : > { %v903_v58 = vadd.f32 %v889_v34, %v777_v57 }
 0x10e   : > { %v3000_v61 = vadd.f32 %v1033_v42, %v903_v58 }
 0x110   : > { %v591_v3 = vpop.f32.mrf.mxu1  ;;  %v1038_v4 = vpop.f32.mrf.mxu0 }
 0x111   : > { %v766_v0 = vpop.f32.mrf.mxu2  ;;  %v1537_v44 = vpop.f32.mrf.mxu3 }
 0x112   : > { %v778_v1 = vadd.f32 %v766_v0, %v590_v35 }
 0x114   : > { %v904_v2 = vadd.f32 %v892_v45, %v778_v1 }
 0x116   : > { %v3002_v6 = vadd.f32 %v1036_v60, %v904_v2 }
 0x118   : > { %v1202_v7 = vpop.f32.mrf.mxu1  ;;  %v1676_v8 = vpop.f32.mrf.mxu0 }
 0x119   : > { %v768_v16 = vpop.f32.mrf.mxu2  ;;  %v1226_v9 = vadd.f32 %v1202_v7, %v2981_v62  ;;  %v1539_v11 = vpop.f32.mrf.mxu3 }
 0x120   : > { %v1204_v5 = vpop.f32.mrf.mxu1  ;;  %v1678_v20 = vpop.f32.mrf.mxu0 }
 0x121   : > { %v1346_v15 = vpop.f32.mrf.mxu2  ;;  %v1227_v21 = vadd.f32 %v1204_v5, %v2983_v14  ;;  %v1542_v23 = vpop.f32.mrf.mxu3 }
 0x122   : > { %v1370_v19 = vadd.f32 %v1346_v15, %v1226_v9 }
 0x124   : > { %v1556_v24 = vadd.f32 %v1532_v55, %v1370_v19 }
 0x126   : > { %v1700_v12 = vadd.f32 %v1676_v8, %v1556_v24 }
 0x128   : > { %v1713_v62 = vadd.f32 %v3009_v27, %v1700_v12  ;;  %v1207_v31 = vpop.f32.mrf.mxu1  ;;  %v1681_v32 = vpop.f32.mrf.mxu0 }
 0x129   : > { %v1348_v28 = vpop.f32.mrf.mxu2  ;;  %v1228_v34 = vadd.f32 %v1207_v31, %v2985_v26  ;;  %v1544_v36 = vpop.f32.mrf.mxu3 }
 0x12a   : > { %v1371_v29 = vadd.f32 %v1348_v28, %v1227_v21  ;;  %v1731_v37 = vmul.f32 0.01, %v1713_v62  ;;  %vm1722_vm2 = vcmp.ge.f32.partialorder %v1713_v62, 0.0 }
 0x12c   : > { %v1557_v30 = vadd.f32 %v1534_v63, %v1371_v29  ;;  %v1740_v41 = vsel %vm1722_vm2, %v1713_v62, %v1731_v37 }
 0x12e   : > { %v1701_v33 = vadd.f32 %v1678_v20, %v1557_v30 }
 0x130   : > { %v1714_v14 = vadd.f32 %v3009_v27, %v1701_v33  ;;  %v1209_v47 = vpop.f32.mrf.mxu1  ;;  %v1683_v48 = vpop.f32.mrf.mxu0 }
 0x131   : > { %v1351_v38 = vpop.f32.mrf.mxu2  ;;  %v1229_v18 = vadd.f32 %v1209_v47, %v2988_v22  ;;  %v1547_v10 = vpop.f32.mrf.mxu3 }
 0x132   : > { %vm1723_vm3 = vcmp.ge.f32.partialorder %v1714_v14, 0.0  ;;  %v1732_v39 = vmul.f32 0.01, %v1714_v14  ;;  %v1372_v40 = vadd.f32 %v1351_v38, %v1228_v34 }
 0x134   : > { %v1741_v45 = vsel %vm1723_vm3, %v1714_v14, %v1732_v39  ;;  %v1558_v46 = vadd.f32 %v1537_v44, %v1372_v40 }
 0x135   : > { %v2511_v26 = vpack.c.bf16 %v1741_v45, %v1740_v41 }
 0x136   : > { %v1702_v17 = vadd.f32 %v1681_v32, %v1558_v46 }
 0x137   : > { %2512 = vst [vmem:[%s3018_s20] sm:$0xff] %v2511_v26  }
 0x138   : > { %v1715_v52 = vadd.f32 %v3009_v27, %v1702_v17  ;;  %v1212_v54 = vpop.f32.mrf.mxu1  ;;  %v1686_v42 = vpop.f32.mrf.mxu0 }
 0x139   : > { %v1353_v50 = vpop.f32.mrf.mxu2  ;;  %v1230_v55 = vadd.f32 %v1212_v54, %v2991_v43  ;;  %v1549_v56 = vpop.f32.mrf.mxu3 }
 0x13a   : > { %v1373_v51 = vadd.f32 %v1353_v50, %v1229_v18  ;;  %v1733_v57 = vmul.f32 0.01, %v1715_v52  ;;  %vm1724_vm4 = vcmp.ge.f32.partialorder %v1715_v52, 0.0 }
 0x13c   : > { %v1559_v53 = vadd.f32 %v1539_v11, %v1373_v51  ;;  %v1742_v35 = vsel %vm1724_vm4, %v1715_v52, %v1733_v57 }
 0x13e   : > { %v1703_v25 = vadd.f32 %v1683_v48, %v1559_v53 }
 0x140   : > { %v1716_v58 = vadd.f32 %v3009_v27, %v1703_v25  ;;  %v1214_v2 = vpop.f32.mrf.mxu1  ;;  %v1688_v3 = vpop.f32.mrf.mxu0 }
 0x141   : > { %v1356_v22 = vpop.f32.mrf.mxu2  ;;  %v1231_v4 = vadd.f32 %v1214_v2, %v2994_v49  ;;  %v1552_v43 = vpop.f32.mrf.mxu3 }
 0x142   : > { %vm1725_vm5 = vcmp.ge.f32.partialorder %v1716_v58, 0.0  ;;  %v1734_v59 = vmul.f32 0.01, %v1716_v58  ;;  %v1374_v60 = vadd.f32 %v1356_v22, %v1230_v55 }
 0x144   : > { %v1743_v63 = vsel %vm1725_vm5, %v1716_v58, %v1734_v59  ;;  %v1560_v0 = vadd.f32 %v1542_v23, %v1374_v60 }
 0x145   : > { %v2516_v1 = vpack.c.bf16 %v1743_v63, %v1742_v35 }
 0x146   : > { %v1704_v44 = vadd.f32 %v1686_v42, %v1560_v0 }
 0x147   : > { %2528 = vst [vmem:[%s3018_s20 + $0x8] sm:$0xff] %v2516_v1  }
 0x148   : > { %v1717_v8 = vadd.f32 %v3009_v27, %v1704_v44  ;;  %v1217_v11 = vpop.f32.mrf.mxu1  ;;  %v1691_v15 = vpop.f32.mrf.mxu0 }
 0x149   : > { %v1358_v16 = vpop.f32.mrf.mxu2  ;;  %v1232_v24 = vadd.f32 %v1217_v11, %v2997_v13  ;;  %v1554_v5 = vpop.f32.mrf.mxu3 }
 0x14a   : > { %v1375_v7 = vadd.f32 %v1358_v16, %v1231_v4  ;;  %v1735_v20 = vmul.f32 0.01, %v1717_v8  ;;  %vm1726_vm6 = vcmp.ge.f32.partialorder %v1717_v8, 0.0 }
 0x14c   : > { %v1561_v9 = vadd.f32 %v1544_v36, %v1375_v7  ;;  %v1744_v28 = vsel %vm1726_vm6, %v1717_v8, %v1735_v20 }
 0x14e   : > { %v1705_v19 = vadd.f32 %v1688_v3, %v1561_v9 }
 0x150   : > { %v1718_v21 = vadd.f32 %v3009_v27, %v1705_v19  ;;  %v1219_v31 = vpop.f32.mrf.mxu1  ;;  %v1693_v32 = vpop.f32.mrf.mxu0 }
 0x151   : > { %v1361_v49 = vpop.f32.mrf.mxu2  ;;  %v1233_v33 = vadd.f32 %v1219_v31, %v3000_v61 }
 0x152   : > { %vm1727_vm7 = vcmp.ge.f32.partialorder %v1718_v21, 0.0  ;;  %v1736_v23 = vmul.f32 0.01, %v1718_v21  ;;  %v1376_v12 = vadd.f32 %v1361_v49, %v1232_v24 }
 0x154   : > { %v1745_v29 = vsel %vm1727_vm7, %v1718_v21, %v1736_v23  ;;  %v1562_v62 = vadd.f32 %v1547_v10, %v1376_v12 }
 0x155   : > { %v2521_v30 = vpack.c.bf16 %v1745_v29, %v1744_v28 }
 0x156   : > { %v1706_v13 = vadd.f32 %v1691_v15, %v1562_v62 }
 0x157   : > { %2529 = vst [vmem:[%s3018_s20 + $0x10] sm:$0xff] %v2521_v30  }
 0x158   : > { %v1719_v37 = vadd.f32 %v3009_v27, %v1706_v13  ;;  %v1222_v38 = vpop.f32.mrf.mxu1  ;;  %v1696_v39 = vpop.f32.mrf.mxu0 }
 0x159   : > { %v1363_v34 = vpop.f32.mrf.mxu2  ;;  %v1234_v41 = vadd.f32 %v1222_v38, %v3002_v6 }
 0x15a   : > { %v1377_v36 = vadd.f32 %v1363_v34, %v1233_v33  ;;  %v1737_v45 = vmul.f32 0.01, %v1719_v37  ;;  %vm1728_vm8 = vcmp.ge.f32.partialorder %v1719_v37, 0.0 }
 0x15c   : > { %v1563_v14 = vadd.f32 %v1549_v56, %v1377_v36  ;;  %v1746_v48 = vsel %vm1728_vm8, %v1719_v37, %v1737_v45 }
 0x15e   : > { %v1707_v40 = vadd.f32 %v1693_v32, %v1563_v14 }
 0x160   : > { %v1720_v46 = vadd.f32 %v3009_v27, %v1707_v40  ;;  %v1224_v50 = vpop.f32.mrf.mxu1  ;;  %v1698_v51 = vpop.f32.mrf.mxu0 }
 0x161   : > { %v1366_v26 = vpop.f32.mrf.mxu2 }
 0x162   : > { %vm1729_vm9 = vcmp.ge.f32.partialorder %v1720_v46, 0.0  ;;  %v1738_v61 = vmul.f32 0.01, %v1720_v46  ;;  %v1378_v47 = vadd.f32 %v1366_v26, %v1234_v41 }
 0x164   : > { %v1747_v18 = vsel %vm1729_vm9, %v1720_v46, %v1738_v61  ;;  %v1564_v10 = vadd.f32 %v1552_v43, %v1378_v47 }
 0x165   : > { %v2526_v17 = vpack.c.bf16 %v1747_v18, %v1746_v48 }
 0x166   : > { %v1708_v52 = vadd.f32 %v1696_v39, %v1564_v10 }
 0x167   : > { %2530 = vst [vmem:[%s3018_s20 + $0x18] sm:$0xff] %v2526_v17  }
 0x168   : > { %v1721_v53 = vadd.f32 %v3009_v27, %v1708_v52 }
 0x169   : > { %v1368_v6 = vpop.f32.mrf.mxu2 }
 0x16a   : > { %vm1730_vm10 = vcmp.ge.f32.partialorder %v1721_v53, 0.0  ;;  %v1739_v54 = vmul.f32 0.01, %v1721_v53 }
 0x16c   : > { %v1748_v42 = vsel %vm1730_vm10, %v1721_v53, %v1739_v54 }
 0x16d   : > { %v1757_v25 = vpack.c.bf16 %v1748_v42, %v1748_v42 }
 0x16f   : > { %1766 = vst [vmem:[%s3018_s20 + $0x20] sm:$0xf] %v1757_v25 }
 0x170 PF: > { %s16_s21 = sadd.s32 1, %s2567_s21  }
 0x171   : > { %p13_p4 = scmp.ge.s32.totalorder %s16_s21, 4  }
 0x173   :  { %15 = sbr.rel (!%p13_p4) target bundleno = 1 (0x1), region = 91 }

// kernel: strided_residual_forward.8
= control target key start
LH: loop header
LB: loop body
LE: loop exit
PB: predicated region body
PF: predicated region fallthrough
CT: control target
= control target key end

     0   :  { %s884_s21 = smov 0   ;;  %s969_s0 = inlined_call_operand.vmem [shape: bf16[128,128], index: 0, kind: input, shape index: {}]   ;;  %s970_s1 = inlined_call_operand.vmem [shape: bf16[128,128], index: 1, kind: input, shape index: {}]   ;;  %s971_s2 = inlined_call_operand.vmem [shape: f32[1,128], index: 2, kind: input, shape index: {}]   ;;  %s972_s3 = inlined_call_operand.vmem [shape: bf16[128,128], index: 3, kind: input, shape index: {}]   ;;  %s973_s4 = inlined_call_operand.vmem [shape: bf16[128,128], index: 4, kind: input, shape index: {}]   ;;  %s974_s5 = inlined_call_operand.vmem [shape: f32[1,128], index: 5, kind: input, shape index: {}]   ;;  %s975_s6 = inlined_call_operand.vmem [shape: bf16[128,128], index: 6, kind: output, shape index: {}]  }
   0x1 LB: > { %s659_s22 = sadd.s32 4294967295, %s847_s21   ;;  %p663_p0 = scmp.ge.s32.totalorder %s847_s21, 1  ;;  %s847_s21 = sphi %s884_s21, %s16_s21  }
   0x2   : > { %p224_p1 = scmp.lt.s32.totalorder %s847_s21, 3 }
   0x4   : > { %p225_p2 = pnand %p663_p0, %p224_p1 }
   0x5   : > { %s664_s15 = sshll.u32 (!%p225_p2), %s659_s22, 3 }
   0x6   : > { %228 = sbr.rel (%p225_p2) target bundleno = 212 (0xd4), region = 44  ;;  %p260_p3 = scmp.lt.s32.totalorder (!%p225_p2), %s664_s15, 15 }
   0xb   : > { %v791_v0 = vld [vmem:[%s973_s4 + $0x38] sm:$0xff]  ;;  %v790_v2 = vld [vmem:[%s973_s4 + $0x30] sm:$0xff]  ;;  %v789_v4 = vld [vmem:[%s973_s4 + $0x28] sm:$0xff]  ;;  %s977_s15 = smov (!%p260_p3, %s664_s15), 15 }
   0xc   : > { %v779_v1 = vld [vmem:[%s970_s1 + $0x38] sm:$0xff]  ;;  %397 = vmatpush.bf16.msra.mxu0 %v791_v0  ;;  %815 = vmatpush.bf16.msra.mxu2 %v791_v0  ;;  %v778_v3 = vld [vmem:[%s970_s1 + $0x30] sm:$0xff]  ;;  %v777_v5 = vld [vmem:[%s970_s1 + $0x28] sm:$0xff]  ;;  %s934_s29 = sshll.u32 %s977_s15, 2 }
   0xd   : > { %498 = vmatpush.bf16.msra.mxu1 %v779_v1  ;;  %823 = vmatpush.bf16.msra.mxu3 %v779_v1  ;;  %v788_v6 = vld [vmem:[%s973_s4 + $0x20] sm:$0xff]  ;;  %v787_v8 = vld [vmem:[%s973_s4 + $0x18] sm:$0xff]  ;;  %v786_v10 = vld [vmem:[%s973_s4 + $0x10] sm:$0xff]  ;;  %s269_s10 = scalar_lea.vmem %s972_s3, %s934_s29  ;;  %s263_s15 = scalar_lea.vmem %s969_s0, %s934_s29 }
   0xe   : > { %v776_v7 = vld [vmem:[%s970_s1 + $0x20] sm:$0xff]  ;;  %v775_v9 = vld [vmem:[%s970_s1 + $0x18] sm:$0xff]  ;;  %v774_v11 = vld [vmem:[%s970_s1 + $0x10] sm:$0xff]  ;;  %s960_s22 = scalar_lea.vmem %s975_s6, %s934_s29 }
   0xf   : > { %v785_v12 = vld [vmem:[%s973_s4 + $0x8] sm:$0xff]  ;;  %v784_v14 = vld [vmem:[%s973_s4] sm:$0xff]  ;;  %v782_v17 = vld [vmem:[%s269_s10 + $0x10] sm:$0xff] }
  0x10   : > { %398 = vmatpush.bf16.msra.mxu0 %v790_v2  ;;  %816 = vmatpush.bf16.msra.mxu2 %v790_v2  ;;  %v773_v13 = vld [vmem:[%s970_s1 + $0x8] sm:$0xff]  ;;  %v772_v15 = vld [vmem:[%s970_s1] sm:$0xff]  ;;  %v770_v19 = vld [vmem:[%s263_s15 + $0x10] sm:$0xff] }
  0x11   : > { %499 = vmatpush.bf16.msra.mxu1 %v778_v3  ;;  %824 = vmatpush.bf16.msra.mxu3 %v778_v3  ;;  %v780_v16 = vld [vmem:[%s269_s10] sm:$0xff]  ;;  %v781_v20 = vld [vmem:[%s269_s10 + $0x8] sm:$0xff]  ;;  %v783_v21 = vld [vmem:[%s269_s10 + $0x18] sm:$0xff] }
  0x12   : > { %v768_v18 = vld [vmem:[%s263_s15] sm:$0xff]  ;;  %v769_v22 = vld [vmem:[%s263_s15 + $0x8] sm:$0xff]  ;;  %v771_v23 = vld [vmem:[%s263_s15 + $0x18] sm:$0xff] }
  0x13   : > { %v839_v27 = vld [vmem:[%s971_s2] ss:$0 sm:$0xff] }
  0x14   : > { %399 = vmatpush.bf16.msra.mxu0 %v789_v4  ;;  %817 = vmatpush.bf16.msra.mxu2 %v789_v4  ;;  %v840_v29 = vld [vmem:[%s974_s5] ss:$0 sm:$0xff] }
  0x15   : > { %500 = vmatpush.bf16.msra.mxu1 %v777_v5  ;;  %825 = vmatpush.bf16.msra.mxu3 %v777_v5 }
  0x18   : > { %400 = vmatpush.bf16.msra.mxu0 %v788_v6  ;;  %818 = vmatpush.bf16.msra.mxu2 %v788_v6 }
  0x19   : > { %501 = vmatpush.bf16.msra.mxu1 %v776_v7  ;;  %826 = vmatpush.bf16.msra.mxu3 %v776_v7 }
  0x1c   : > { %401 = vmatpush.bf16.msra.mxu0 %v787_v8  ;;  %819 = vmatpush.bf16.msra.mxu2 %v787_v8 }
  0x1d   : > { %502 = vmatpush.bf16.msra.mxu1 %v775_v9  ;;  %827 = vmatpush.bf16.msra.mxu3 %v775_v9 }
  0x20   : > { %402 = vmatpush.bf16.msra.mxu0 %v786_v10  ;;  %820 = vmatpush.bf16.msra.mxu2 %v786_v10 }
  0x21   : > { %503 = vmatpush.bf16.msra.mxu1 %v774_v11  ;;  %828 = vmatpush.bf16.msra.mxu3 %v774_v11 }
  0x24   : > { %403 = vmatpush.bf16.msra.mxu0 %v785_v12  ;;  %821 = vmatpush.bf16.msra.mxu2 %v785_v12 }
  0x25   : > { %504 = vmatpush.bf16.msra.mxu1 %v773_v13  ;;  %829 = vmatpush.bf16.msra.mxu3 %v773_v13 }
  0x28   : > { %404 = vmatpush.bf16.msra.mxu0 %v784_v14  ;;  %822 = vmatpush.bf16.msra.mxu2 %v784_v14 }
  0x29   : > { %505 = vmatpush.bf16.msra.mxu1 %v772_v15  ;;  %830 = vmatpush.bf16.msra.mxu3 %v772_v15 }
  0x2b   : > { %405 = vmatmul.bf16.vlgmr.msra.gmra.mxu0 %v780_v16  ;;  %415 = vmatmul.bf16.vlgmr.msra.gmra.mxu2 %v782_v17 }
  0x2c   : > { %506 = vmatmul.bf16.vlgmr.msra.gmra.mxu1 %v768_v18  ;;  %516 = vmatmul.bf16.vlgmr.msra.gmra.mxu3 %v770_v19 }
  0x3b   : > { %410 = vmatmul.bf16.gmra.mxu0 %v781_v20  ;;  %420 = vmatmul.bf16.gmra.mxu2 %v783_v21 }
  0x3c   : > { %511 = vmatmul.bf16.gmra.mxu1 %v769_v22  ;;  %521 = vmatmul.bf16.gmra.mxu3 %v771_v23 }
  0xa8   : > { %v406_v24 = vpop.f32.mrf.mxu0 }
  0xa9   : > { %v507_v25 = vpop.f32.mrf.mxu1 }
  0xaa   : > { %v508_v26 = vadd.f32 %v507_v25, %v406_v24 }
  0xac   : > { %v531_v28 = vadd.f32 %v839_v27, %v508_v26 }
  0xae   : > { %v416_v30 = vpop.f32.mrf.mxu2  ;;  %v543_v35 = vadd.f32 %v840_v29, %v531_v28 }
  0xaf   : > { %v517_v31 = vpop.f32.mrf.mxu3 }
  0xb0   : > { %v518_v32 = vadd.f32 %v517_v31, %v416_v30  ;;  %v408_v33 = vpop.f32.mrf.mxu0  ;;  %v559_v39 = vmul.f32 0.01, %v543_v35  ;;  %vm551_vm0 = vcmp.ge.f32.partialorder %v543_v35, 0.0 }
  0xb1   : > { %v509_v34 = vpop.f32.mrf.mxu1 }
  0xb2   : > { %v510_v36 = vadd.f32 %v509_v34, %v408_v33  ;;  %v535_v37 = vadd.f32 %v839_v27, %v518_v32  ;;  %v567_v48 = vsel %vm551_vm0, %v543_v35, %v559_v39 }
  0xb4   : > { %v532_v38 = vadd.f32 %v839_v27, %v510_v36  ;;  %v547_v43 = vadd.f32 %v840_v29, %v535_v37 }
  0xb6   : > { %v544_v40 = vadd.f32 %v840_v29, %v532_v38  ;;  %v418_v41 = vpop.f32.mrf.mxu2  ;;  %v563_v53 = vmul.f32 0.01, %v547_v43  ;;  %vm555_vm2 = vcmp.ge.f32.partialorder %v547_v43, 0.0 }
  0xb7   : > { %v519_v42 = vpop.f32.mrf.mxu3 }
  0xb8   : > { %vm552_vm1 = vcmp.ge.f32.partialorder %v544_v40, 0.0  ;;  %v560_v44 = vmul.f32 0.01, %v544_v40  ;;  %v520_v45 = vadd.f32 %v519_v42, %v418_v41  ;;  %v411_v46 = vpop.f32.mrf.mxu0  ;;  %v571_v59 = vsel %vm555_vm2, %v547_v43, %v563_v53 }
  0xb9   : > { %v512_v47 = vpop.f32.mrf.mxu1 }
  0xba   : > { %v568_v49 = vsel %vm552_vm1, %v544_v40, %v560_v44  ;;  %v536_v50 = vadd.f32 %v839_v27, %v520_v45  ;;  %v513_v51 = vadd.f32 %v512_v47, %v411_v46 }
  0xbb   : > { %v795_v52 = vpack.c.bf16 %v568_v49, %v567_v48 }
  0xbc   : > { %v548_v54 = vadd.f32 %v840_v29, %v536_v50  ;;  %v533_v56 = vadd.f32 %v839_v27, %v513_v51 }
  0xbd   : > { %796 = vst [vmem:[%s960_s22] sm:$0xff] %v795_v52  }
  0xbe   : > { %vm556_vm3 = vcmp.ge.f32.partialorder %v548_v54, 0.0  ;;  %v564_v55 = vmul.f32 0.01, %v548_v54  ;;  %v421_v57 = vpop.f32.mrf.mxu2  ;;  %v545_v1 = vadd.f32 %v840_v29, %v533_v56 }
  0xbf   : > { %v522_v58 = vpop.f32.mrf.mxu3 }
  0xc0   : > { %v572_v60 = vsel %vm556_vm3, %v548_v54, %v564_v55  ;;  %v523_v61 = vadd.f32 %v522_v58, %v421_v57  ;;  %v413_v62 = vpop.f32.mrf.mxu0  ;;  %v561_v5 = vmul.f32 0.01, %v545_v1  ;;  %vm553_vm4 = vcmp.ge.f32.partialorder %v545_v1, 0.0 }
  0xc1   : > { %v805_v63 = vpack.c.bf16 %v572_v60, %v571_v59  ;;  %v514_v0 = vpop.f32.mrf.mxu1 }
  0xc2   : > { %v515_v2 = vadd.f32 %v514_v0, %v413_v62  ;;  %v537_v3 = vadd.f32 %v839_v27, %v523_v61  ;;  %v569_v12 = vsel %vm553_vm4, %v545_v1, %v561_v5 }
  0xc3   : > { %813 = vst [vmem:[%s960_s22 + $0x10] sm:$0xff] %v805_v63  }
  0xc4   : > { %v534_v4 = vadd.f32 %v839_v27, %v515_v2  ;;  %v549_v9 = vadd.f32 %v840_v29, %v537_v3 }
  0xc6   : > { %v546_v6 = vadd.f32 %v840_v29, %v534_v4  ;;  %v423_v7 = vpop.f32.mrf.mxu2  ;;  %v565_v16 = vmul.f32 0.01, %v549_v9  ;;  %vm557_vm6 = vcmp.ge.f32.partialorder %v549_v9, 0.0 }
  0xc7   : > { %v524_v8 = vpop.f32.mrf.mxu3 }
  0xc8   : > { %vm554_vm5 = vcmp.ge.f32.partialorder %v546_v6, 0.0  ;;  %v562_v10 = vmul.f32 0.01, %v546_v6  ;;  %v525_v11 = vadd.f32 %v524_v8, %v423_v7  ;;  %v573_v19 = vsel %vm557_vm6, %v549_v9, %v565_v16 }
  0xca   : > { %v570_v13 = vsel %vm554_vm5, %v546_v6, %v562_v10  ;;  %v538_v14 = vadd.f32 %v839_v27, %v525_v11 }
  0xcb   : > { %v800_v15 = vpack.c.bf16 %v570_v13, %v569_v12 }
  0xcc   : > { %v550_v17 = vadd.f32 %v840_v29, %v538_v14 }
  0xcd   : > { %812 = vst [vmem:[%s960_s22 + $0x8] sm:$0xff] %v800_v15  }
  0xce   : > { %vm558_vm7 = vcmp.ge.f32.partialorder %v550_v17, 0.0  ;;  %v566_v18 = vmul.f32 0.01, %v550_v17 }
  0xd0   : > { %v574_v20 = vsel %vm558_vm7, %v550_v17, %v566_v18 }
  0xd1   : > { %v810_v21 = vpack.c.bf16 %v574_v20, %v573_v19 }
  0xd3   : > { %814 = vst [vmem:[%s960_s22 + $0x18] sm:$0xff] %v810_v21  }
  0xd4 PF: > { %s16_s21 = sadd.s32 1, %s847_s21  }
  0xd5   : > { %p13_p4 = scmp.ge.s32.totalorder %s16_s21, 4  }
  0xd7   :  { %15 = sbr.rel (!%p13_p4) target bundleno = 1 (0x1), region = 77 }

// kernel: strided_residual_forward.9
= control target key start
LH: loop header
LB: loop body
LE: loop exit
PB: predicated region body
PF: predicated region fallthrough
CT: control target
= control target key end

     0   :  { %s554_s12 = smov 0   ;;  %s605_s0 = inlined_call_operand.vmem [shape: bf16[128,128], index: 0, kind: input, shape index: {}]   ;;  %s606_s1 = inlined_call_operand.vmem [shape: bf16[128,128], index: 1, kind: input, shape index: {}]   ;;  %s607_s2 = inlined_call_operand.vmem [shape: f32[1,128], index: 2, kind: input, shape index: {}]   ;;  %s608_s3 = inlined_call_operand.vmem [shape: bf16[128,128], index: 3, kind: output, shape index: {}]  }
   0x1 LB: > { %s399_s13 = sadd.s32 4294967295, %s532_s12   ;;  %p403_p0 = scmp.ge.s32.totalorder %s532_s12, 1  ;;  %s532_s12 = sphi %s554_s12, %s13_s12  }
   0x2   : > { %p138_p1 = scmp.lt.s32.totalorder %s532_s12, 3 }
   0x4   : > { %p139_p2 = pnand %p403_p0, %p138_p1 }
   0x5   : > { %s404_s22 = sshll.u32 (!%p139_p2), %s399_s13, 3 }
   0x6   : > { %142 = sbr.rel (%p139_p2) target bundleno = 193 (0xc1), region = 32  ;;  %p163_p3 = scmp.lt.s32.totalorder (!%p139_p2), %s404_s22, 15 }
   0xb   : > { %v469_v0 = vld [vmem:[%s606_s1 + $0x38] sm:$0xff]  ;;  %v468_v1 = vld [vmem:[%s606_s1 + $0x30] sm:$0xff]  ;;  %v467_v2 = vld [vmem:[%s606_s1 + $0x28] sm:$0xff]  ;;  %s610_s22 = smov (!%p163_p3, %s404_s22), 15 }
   0xc   : > { %274 = vmatpush.bf16.msra.mxu0 %v469_v0  ;;  %493 = vmatpush.bf16.msra.mxu1 %v469_v0  ;;  %v466_v3 = vld [vmem:[%s606_s1 + $0x20] sm:$0xff]  ;;  %v465_v4 = vld [vmem:[%s606_s1 + $0x18] sm:$0xff]  ;;  %v464_v5 = vld [vmem:[%s606_s1 + $0x10] sm:$0xff]  ;;  %s405_s29 = sshll.u32 %s610_s22, 2 }
   0xd   : > { %494 = vmatpush.bf16.msra.mxu2 %v469_v0  ;;  %495 = vmatpush.bf16.msra.mxu3 %v469_v0  ;;  %v463_v6 = vld [vmem:[%s606_s1 + $0x8] sm:$0xff]  ;;  %v462_v7 = vld [vmem:[%s606_s1] sm:$0xff]  ;;  %s166_s7 = scalar_lea.vmem %s605_s0, %s405_s29  ;;  %s172_s13 = scalar_lea.vmem %s608_s3, %s405_s29 }
   0xe   : > { %v458_v8 = vld [vmem:[%s166_s7] sm:$0xff]  ;;  %v459_v9 = vld [vmem:[%s166_s7 + $0x8] sm:$0xff]  ;;  %v460_v10 = vld [vmem:[%s166_s7 + $0x10] sm:$0xff] }
   0xf   : > { %v461_v11 = vld [vmem:[%s166_s7 + $0x18] sm:$0xff]  ;;  %v525_v14 = vld [vmem:[%s607_s2] ss:$0 sm:$0xff] }
  0x10   : > { %275 = vmatpush.bf16.msra.mxu0 %v468_v1  ;;  %496 = vmatpush.bf16.msra.mxu1 %v468_v1 }
  0x11   : > { %497 = vmatpush.bf16.msra.mxu2 %v468_v1  ;;  %498 = vmatpush.bf16.msra.mxu3 %v468_v1 }
  0x14   : > { %276 = vmatpush.bf16.msra.mxu0 %v467_v2  ;;  %499 = vmatpush.bf16.msra.mxu1 %v467_v2 }
  0x15   : > { %500 = vmatpush.bf16.msra.mxu2 %v467_v2  ;;  %501 = vmatpush.bf16.msra.mxu3 %v467_v2 }
  0x18   : > { %277 = vmatpush.bf16.msra.mxu0 %v466_v3  ;;  %502 = vmatpush.bf16.msra.mxu1 %v466_v3 }
  0x19   : > { %503 = vmatpush.bf16.msra.mxu2 %v466_v3  ;;  %504 = vmatpush.bf16.msra.mxu3 %v466_v3 }
  0x1c   : > { %278 = vmatpush.bf16.msra.mxu0 %v465_v4  ;;  %505 = vmatpush.bf16.msra.mxu1 %v465_v4 }
  0x1d   : > { %506 = vmatpush.bf16.msra.mxu2 %v465_v4  ;;  %507 = vmatpush.bf16.msra.mxu3 %v465_v4 }
  0x20   : > { %279 = vmatpush.bf16.msra.mxu0 %v464_v5  ;;  %508 = vmatpush.bf16.msra.mxu1 %v464_v5 }
  0x21   : > { %509 = vmatpush.bf16.msra.mxu2 %v464_v5  ;;  %510 = vmatpush.bf16.msra.mxu3 %v464_v5 }
  0x24   : > { %280 = vmatpush.bf16.msra.mxu0 %v463_v6  ;;  %511 = vmatpush.bf16.msra.mxu1 %v463_v6 }
  0x25   : > { %512 = vmatpush.bf16.msra.mxu2 %v463_v6  ;;  %513 = vmatpush.bf16.msra.mxu3 %v463_v6 }
  0x28   : > { %281 = vmatpush.bf16.msra.mxu0 %v462_v7  ;;  %514 = vmatpush.bf16.msra.mxu1 %v462_v7 }
  0x29   : > { %515 = vmatpush.bf16.msra.mxu2 %v462_v7  ;;  %516 = vmatpush.bf16.msra.mxu3 %v462_v7 }
  0x2b   : > { %282 = vmatmul.bf16.vlgmr.msra.gmra.mxu0 %v458_v8  ;;  %287 = vmatmul.bf16.vlgmr.msra.gmra.mxu1 %v459_v9 }
  0x2c   : > { %292 = vmatmul.bf16.vlgmr.msra.gmra.mxu2 %v460_v10  ;;  %297 = vmatmul.bf16.vlgmr.msra.gmra.mxu3 %v461_v11 }
  0xa8   : > { %v283_v12 = vpop.f32.mrf.mxu0  ;;  %v288_v13 = vpop.f32.mrf.mxu1 }
  0xa9   : > { %v284_v15 = vadd.f32 %v525_v14, %v283_v12  ;;  %v289_v16 = vadd.f32 %v525_v14, %v288_v13 }
  0xab   : > { %v311_v21 = vmul.f32 0.01, %v284_v15  ;;  %v313_v22 = vmul.f32 0.01, %v289_v16  ;;  %vm303_vm0 = vcmp.ge.f32.partialorder %v284_v15, 0.0  ;;  %vm305_vm1 = vcmp.ge.f32.partialorder %v289_v16, 0.0 }
  0xad   : > { %v319_v29 = vsel %vm303_vm0, %v284_v15, %v311_v21  ;;  %v321_v30 = vsel %vm305_vm1, %v289_v16, %v313_v22 }
  0xaf   : > { %v293_v17 = vpop.f32.mrf.mxu2  ;;  %v298_v18 = vpop.f32.mrf.mxu3 }
  0xb0   : > { %v285_v19 = vpop.f32.mrf.mxu0  ;;  %v290_v20 = vpop.f32.mrf.mxu1  ;;  %v294_v27 = vadd.f32 %v525_v14, %v293_v17  ;;  %v299_v28 = vadd.f32 %v525_v14, %v298_v18 }
  0xb1   : > { %v286_v23 = vadd.f32 %v525_v14, %v285_v19  ;;  %v291_v24 = vadd.f32 %v525_v14, %v290_v20 }
  0xb2   : > { %v315_v37 = vmul.f32 0.01, %v294_v27  ;;  %v317_v38 = vmul.f32 0.01, %v299_v28  ;;  %vm307_vm4 = vcmp.ge.f32.partialorder %v294_v27, 0.0  ;;  %vm309_vm5 = vcmp.ge.f32.partialorder %v299_v28, 0.0 }
  0xb3   : > { %vm304_vm2 = vcmp.ge.f32.partialorder %v286_v23, 0.0  ;;  %v312_v25 = vmul.f32 0.01, %v286_v23  ;;  %vm306_vm3 = vcmp.ge.f32.partialorder %v291_v24, 0.0  ;;  %v314_v26 = vmul.f32 0.01, %v291_v24 }
  0xb4   : > { %v323_v43 = vsel %vm307_vm4, %v294_v27, %v315_v37  ;;  %v325_v44 = vsel %vm309_vm5, %v299_v28, %v317_v38 }
  0xb5   : > { %v320_v31 = vsel %vm304_vm2, %v286_v23, %v312_v25  ;;  %v322_v32 = vsel %vm306_vm3, %v291_v24, %v314_v26 }
  0xb6   : > { %v473_v33 = vpack.c.bf16 %v320_v31, %v319_v29  ;;  %v478_v34 = vpack.c.bf16 %v322_v32, %v321_v30 }
  0xb7   : > { %v295_v35 = vpop.f32.mrf.mxu2  ;;  %v300_v36 = vpop.f32.mrf.mxu3 }
  0xb8   : > { %474 = vst [vmem:[%s172_s13] sm:$0xff] %v473_v33   ;;  %v296_v39 = vadd.f32 %v525_v14, %v295_v35  ;;  %v301_v40 = vadd.f32 %v525_v14, %v300_v36 }
  0xb9   : > { %490 = vst [vmem:[%s172_s13 + $0x8] sm:$0xff] %v478_v34  }
  0xba   : > { %vm308_vm6 = vcmp.ge.f32.partialorder %v296_v39, 0.0  ;;  %v316_v41 = vmul.f32 0.01, %v296_v39  ;;  %vm310_vm7 = vcmp.ge.f32.partialorder %v301_v40, 0.0  ;;  %v318_v42 = vmul.f32 0.01, %v301_v40 }
  0xbc   : > { %v324_v45 = vsel %vm308_vm6, %v296_v39, %v316_v41  ;;  %v326_v46 = vsel %vm310_vm7, %v301_v40, %v318_v42 }
  0xbd   : > { %v483_v47 = vpack.c.bf16 %v324_v45, %v323_v43  ;;  %v488_v48 = vpack.c.bf16 %v326_v46, %v325_v44 }
  0xbf   : > { %491 = vst [vmem:[%s172_s13 + $0x10] sm:$0xff] %v483_v47  }
  0xc0   : > { %492 = vst [vmem:[%s172_s13 + $0x18] sm:$0xff] %v488_v48  }
  0xc1 PF: > { %s13_s12 = sadd.s32 1, %s532_s12  }
  0xc2   : > { %p10_p4 = scmp.ge.s32.totalorder %s13_s12, 4  }
  0xc4   :  { %12 = sbr.rel (!%p10_p4) target bundleno = 1 (0x1), region = 62 }

// kernel: strided_residual_forward.11
= control target key start
LH: loop header
LB: loop body
LE: loop exit
PB: predicated region body
PF: predicated region fallthrough
CT: control target
= control target key end

     0   :  { %s665_s15 = smov 0   ;;  %s717_s0 = inlined_call_operand.vmem [shape: bf16[128,128], index: 0, kind: input, shape index: {}]   ;;  %s718_s1 = inlined_call_operand.vmem [shape: bf16[128,128], index: 1, kind: input, shape index: {}]   ;;  %s719_s2 = inlined_call_operand.vmem [shape: f32[1,128], index: 2, kind: input, shape index: {}]   ;;  %s720_s3 = inlined_call_operand.vmem [shape: bf16[128,128], index: 3, kind: input, shape index: {}]   ;;  %s721_s4 = inlined_call_operand.vmem [shape: bf16[128,128], index: 4, kind: output, shape index: {}]  }
   0x1 LB: > { %s484_s16 = sadd.s32 4294967295, %s638_s15   ;;  %p488_p0 = scmp.ge.s32.totalorder %s638_s15, 1  ;;  %s638_s15 = sphi %s665_s15, %s14_s15  }
   0x2   : > { %p174_p1 = scmp.lt.s32.totalorder %s638_s15, 3 }
   0x4   : > { %p175_p2 = pnand %p488_p0, %p174_p1 }
   0x5   : > { %s489_s25 = sshll.u32 (!%p175_p2), %s484_s16, 3 }
   0x6   : > { %178 = sbr.rel (%p175_p2) target bundleno = 195 (0xc3), region = 36  ;;  %p206_p3 = scmp.lt.s32.totalorder (!%p175_p2), %s489_s25, 15 }
   0xb   : > { %v556_v0 = vld [vmem:[%s718_s1 + $0x38] sm:$0xff]  ;;  %v555_v1 = vld [vmem:[%s718_s1 + $0x30] sm:$0xff]  ;;  %v554_v2 = vld [vmem:[%s718_s1 + $0x28] sm:$0xff]  ;;  %s723_s25 = smov (!%p206_p3, %s489_s25), 15 }
   0xc   : > { %323 = vmatpush.bf16.msra.mxu0 %v556_v0  ;;  %599 = vmatpush.bf16.msra.mxu1 %v556_v0  ;;  %v553_v3 = vld [vmem:[%s718_s1 + $0x20] sm:$0xff]  ;;  %v552_v4 = vld [vmem:[%s718_s1 + $0x18] sm:$0xff]  ;;  %v551_v5 = vld [vmem:[%s718_s1 + $0x10] sm:$0xff]  ;;  %s694_s6 = sshll.u32 %s723_s25, 2 }
   0xd   : > { %600 = vmatpush.bf16.msra.mxu2 %v556_v0  ;;  %601 = vmatpush.bf16.msra.mxu3 %v556_v0  ;;  %v550_v6 = vld [vmem:[%s718_s1 + $0x8] sm:$0xff]  ;;  %v549_v7 = vld [vmem:[%s718_s1] sm:$0xff]  ;;  %s209_s11 = scalar_lea.vmem %s717_s0, %s694_s6  ;;  %s215_s14 = scalar_lea.vmem %s720_s3, %s694_s6 }
   0xe   : > { %v545_v8 = vld [vmem:[%s209_s11] sm:$0xff]  ;;  %v546_v9 = vld [vmem:[%s209_s11 + $0x8] sm:$0xff]  ;;  %v547_v10 = vld [vmem:[%s209_s11 + $0x10] sm:$0xff]  ;;  %s221_s20 = scalar_lea.vmem %s721_s4, %s694_s6 }
   0xf   : > { %v548_v11 = vld [vmem:[%s209_s11 + $0x18] sm:$0xff]  ;;  %v631_v12 = vld [vmem:[%s719_s2] ss:$0 sm:$0xff]  ;;  %v593_v16 = vld [vmem:[%s215_s14 + $0x8] sm:$0xff]  }
  0x10   : > { %324 = vmatpush.bf16.msra.mxu0 %v555_v1  ;;  %602 = vmatpush.bf16.msra.mxu1 %v555_v1  ;;  %v558_v14 = vld [vmem:[%s215_s14] sm:$0xff]   ;;  %v563_v20 = vunpack.c.l.bf16 %v593_v16  ;;  %v594_v24 = vld [vmem:[%s215_s14 + $0x10] sm:$0xff]   ;;  %v595_v26 = vld [vmem:[%s215_s14 + $0x18] sm:$0xff]   ;;  %v564_v28 = vunpack.c.h.bf16 %v593_v16 }
  0x11   : > { %603 = vmatpush.bf16.msra.mxu2 %v555_v1  ;;  %604 = vmatpush.bf16.msra.mxu3 %v555_v1  ;;  %v559_v18 = vunpack.c.l.bf16 %v558_v14  ;;  %v560_v27 = vunpack.c.h.bf16 %v558_v14  ;;  %v567_v34 = vunpack.c.l.bf16 %v594_v24  ;;  %v571_v36 = vunpack.c.l.bf16 %v595_v26 }
  0x12   : > { %v568_v45 = vunpack.c.h.bf16 %v594_v24  ;;  %v572_v46 = vunpack.c.h.bf16 %v595_v26 }
  0x14   : > { %325 = vmatpush.bf16.msra.mxu0 %v554_v2  ;;  %605 = vmatpush.bf16.msra.mxu1 %v554_v2 }
  0x15   : > { %606 = vmatpush.bf16.msra.mxu2 %v554_v2  ;;  %607 = vmatpush.bf16.msra.mxu3 %v554_v2 }
  0x18   : > { %326 = vmatpush.bf16.msra.mxu0 %v553_v3  ;;  %608 = vmatpush.bf16.msra.mxu1 %v553_v3 }
  0x19   : > { %609 = vmatpush.bf16.msra.mxu2 %v553_v3  ;;  %610 = vmatpush.bf16.msra.mxu3 %v553_v3 }
  0x1c   : > { %327 = vmatpush.bf16.msra.mxu0 %v552_v4  ;;  %611 = vmatpush.bf16.msra.mxu1 %v552_v4 }
  0x1d   : > { %612 = vmatpush.bf16.msra.mxu2 %v552_v4  ;;  %613 = vmatpush.bf16.msra.mxu3 %v552_v4 }
  0x20   : > { %328 = vmatpush.bf16.msra.mxu0 %v551_v5  ;;  %614 = vmatpush.bf16.msra.mxu1 %v551_v5 }
  0x21   : > { %615 = vmatpush.bf16.msra.mxu2 %v551_v5  ;;  %616 = vmatpush.bf16.msra.mxu3 %v551_v5 }
  0x24   : > { %329 = vmatpush.bf16.msra.mxu0 %v550_v6  ;;  %617 = vmatpush.bf16.msra.mxu1 %v550_v6 }
  0x25   : > { %618 = vmatpush.bf16.msra.mxu2 %v550_v6  ;;  %619 = vmatpush.bf16.msra.mxu3 %v550_v6 }
  0x28   : > { %330 = vmatpush.bf16.msra.mxu0 %v549_v7  ;;  %620 = vmatpush.bf16.msra.mxu1 %v549_v7 }
  0x29   : > { %621 = vmatpush.bf16.msra.mxu2 %v549_v7  ;;  %622 = vmatpush.bf16.msra.mxu3 %v549_v7 }
  0x2b   : > { %331 = vmatmul.bf16.vlgmr.msra.gmra.mxu0 %v545_v8  ;;  %336 = vmatmul.bf16.vlgmr.msra.gmra.mxu1 %v546_v9 }
  0x2c   : > { %341 = vmatmul.bf16.vlgmr.msra.gmra.mxu2 %v547_v10  ;;  %346 = vmatmul.bf16.vlgmr.msra.gmra.mxu3 %v548_v11 }
  0xa8   : > { %v332_v13 = vpop.f32.mrf.mxu0  ;;  %v337_v15 = vpop.f32.mrf.mxu1 }
  0xa9   : > { %v333_v17 = vadd.f32 %v631_v12, %v332_v13  ;;  %v338_v19 = vadd.f32 %v631_v12, %v337_v15 }
  0xab   : > { %v368_v21 = vadd.f32 %v559_v18, %v333_v17  ;;  %v370_v22 = vadd.f32 %v563_v20, %v338_v19 }
  0xad   : > { %v384_v37 = vmul.f32 0.01, %v368_v21  ;;  %v386_v38 = vmul.f32 0.01, %v370_v22  ;;  %vm376_vm0 = vcmp.ge.f32.partialorder %v368_v21, 0.0  ;;  %vm378_vm1 = vcmp.ge.f32.partialorder %v370_v22, 0.0 }
  0xaf   : > { %v342_v23 = vpop.f32.mrf.mxu2  ;;  %v347_v25 = vpop.f32.mrf.mxu3  ;;  %v392_v47 = vsel %vm376_vm0, %v368_v21, %v384_v37  ;;  %v394_v48 = vsel %vm378_vm1, %v370_v22, %v386_v38 }
  0xb0   : > { %v334_v29 = vpop.f32.mrf.mxu0  ;;  %v339_v30 = vpop.f32.mrf.mxu1  ;;  %v343_v33 = vadd.f32 %v631_v12, %v342_v23  ;;  %v348_v35 = vadd.f32 %v631_v12, %v347_v25 }
  0xb1   : > { %v335_v31 = vadd.f32 %v631_v12, %v334_v29  ;;  %v340_v32 = vadd.f32 %v631_v12, %v339_v30 }
  0xb2   : > { %v372_v43 = vadd.f32 %v567_v34, %v343_v33  ;;  %v374_v44 = vadd.f32 %v571_v36, %v348_v35 }
  0xb3   : > { %v369_v39 = vadd.f32 %v560_v27, %v335_v31  ;;  %v371_v40 = vadd.f32 %v564_v28, %v340_v32 }
  0xb4   : > { %v388_v57 = vmul.f32 0.01, %v372_v43  ;;  %v390_v58 = vmul.f32 0.01, %v374_v44  ;;  %vm380_vm4 = vcmp.ge.f32.partialorder %v372_v43, 0.0  ;;  %vm382_vm5 = vcmp.ge.f32.partialorder %v374_v44, 0.0 }
  0xb5   : > { %vm377_vm2 = vcmp.ge.f32.partialorder %v369_v39, 0.0  ;;  %v385_v41 = vmul.f32 0.01, %v369_v39  ;;  %vm379_vm3 = vcmp.ge.f32.partialorder %v371_v40, 0.0  ;;  %v387_v42 = vmul.f32 0.01, %v371_v40 }
  0xb6   : > { %v396_v63 = vsel %vm380_vm4, %v372_v43, %v388_v57  ;;  %v398_v0 = vsel %vm382_vm5, %v374_v44, %v390_v58 }
  0xb7   : > { %v393_v49 = vsel %vm377_vm2, %v369_v39, %v385_v41  ;;  %v395_v50 = vsel %vm379_vm3, %v371_v40, %v387_v42  ;;  %v344_v51 = vpop.f32.mrf.mxu2  ;;  %v349_v52 = vpop.f32.mrf.mxu3 }
  0xb8   : > { %v576_v53 = vpack.c.bf16 %v393_v49, %v392_v47  ;;  %v581_v54 = vpack.c.bf16 %v395_v50, %v394_v48  ;;  %v345_v55 = vadd.f32 %v631_v12, %v344_v51  ;;  %v350_v56 = vadd.f32 %v631_v12, %v349_v52 }
  0xba   : > { %577 = vst [vmem:[%s221_s20] sm:$0xff] %v576_v53   ;;  %v373_v59 = vadd.f32 %v568_v45, %v345_v55  ;;  %v375_v60 = vadd.f32 %v572_v46, %v350_v56 }
  0xbb   : > { %596 = vst [vmem:[%s221_s20 + $0x8] sm:$0xff] %v581_v54  }
  0xbc   : > { %vm381_vm6 = vcmp.ge.f32.partialorder %v373_v59, 0.0  ;;  %v389_v61 = vmul.f32 0.01, %v373_v59  ;;  %vm383_vm7 = vcmp.ge.f32.partialorder %v375_v60, 0.0  ;;  %v391_v62 = vmul.f32 0.01, %v375_v60 }
  0xbe   : > { %v397_v1 = vsel %vm381_vm6, %v373_v59, %v389_v61  ;;  %v399_v2 = vsel %vm383_vm7, %v375_v60, %v391_v62 }
  0xbf   : > { %v586_v3 = vpack.c.bf16 %v397_v1, %v396_v63  ;;  %v591_v4 = vpack.c.bf16 %v399_v2, %v398_v0 }
  0xc1   : > { %597 = vst [vmem:[%s221_s20 + $0x10] sm:$0xff] %v586_v3  }
  0xc2   : > { %598 = vst [vmem:[%s221_s20 + $0x18] sm:$0xff] %v591_v4  }
  0xc3 PF: > { %s14_s15 = sadd.s32 1, %s638_s15  }
  0xc4   : > { %p11_p4 = scmp.ge.s32.totalorder %s14_s15, 4  }
  0xc6   :  { %13 = sbr.rel (!%p11_p4) target bundleno = 1 (0x1), region = 69 }

// kernel: strided_residual_forward.10
= control target key start
LH: loop header
LB: loop body
LE: loop exit
PB: predicated region body
PF: predicated region fallthrough
CT: control target
= control target key end

     0   :  { %s2291_s12 = smov 0   ;;  %s2790_s0 = inlined_call_operand.vmem [shape: bf16[2,110,128], index: 0, kind: input, shape index: {}]   ;;  %s2791_s1 = inlined_call_operand.vmem [shape: bf16[9,128,128], index: 1, kind: input, shape index: {}]   ;;  %s2792_s2 = inlined_call_operand.vmem [shape: f32[1,128], index: 2, kind: input, shape index: {}]   ;;  %s2793_s3 = inlined_call_operand.vmem [shape: bf16[2,80,128], index: 3, kind: output, shape index: {}]  }
   0x1 LB: > { %s1643_s13 = sadd.s32 4294967295, %s2269_s12   ;;  %p1647_p0 = scmp.ge.s32.totalorder %s2269_s12, 1  ;;  %s2269_s12 = sphi %s2291_s12, %s13_s12  }
   0x2   : > { %p137_p1 = scmp.lt.s32.totalorder %s2269_s12, 3 }
   0x4   : > { %p138_p2 = pnand %p1647_p0, %p137_p1 }
   0x5   : > { %p161_p3 = scmp.lt.s32.totalorder (!%p138_p2), %s1643_s13, 1 }
   0x6   : > { %141 = sbr.rel (%p138_p2) target bundleno = 376 (0x178), region = 32 }
   0xb   : > { %v2135_v0 = vld [vmem:[%s2791_s1 + $0x78] sm:$0xff]  ;;  %v2134_v1 = vld [vmem:[%s2791_s1 + $0x70] sm:$0xff]  ;;  %s2795_s13 = smov (!%p161_p3, %s1643_s13), 1  ;;  %v2133_v4 = vld [vmem:[%s2791_s1 + $0x68] sm:$0xff]  ;;  %vm243_vm0 = vsmask.f32 7424 }
   0xc   : > { %341 = vmatpush.bf16.msra.mxu0 %v2135_v0  ;;  %2236 = vmatpush.bf16.msra.mxu1 %v2135_v0  ;;  %v2155_v2 = vld [vmem:[%s2791_s1 + $0xf8] sm:$0xff]  ;;  %v2154_v3 = vld [vmem:[%s2791_s1 + $0xf0] sm:$0xff]  ;;  %s2252_s24 = smul.u32 56, %s2795_s13  ;;  %v2153_v5 = vld [vmem:[%s2791_s1 + $0xe8] sm:$0xff]  ;;  %vm483_vm1 = vcmask 1046528   ;;  %vm949_vm4 = vcmask 1045504  }
   0xd   : > { %2237 = vmatpush.bf16.msra.mxu2 %v2135_v0  ;;  %712 = vmatpush.bf16.msra.mxu3 %v2155_v2  ;;  %v2132_v6 = vld [vmem:[%s2791_s1 + $0x60] sm:$0xff]  ;;  %v2131_v9 = vld [vmem:[%s2791_s1 + $0x58] sm:$0xff]  ;;  %v2130_v17 = vld [vmem:[%s2791_s1 + $0x50] sm:$0xff]  ;;  %vm777_vm2 = vsmask.f32 6400  ;;  %vm1415_vm5 = vcmask 1044480  }
   0xe   : > { %s2326_s4 = scalar_lea.vmem %s2790_s0, %s2252_s24  ;;  %v2152_v7 = vld [vmem:[%s2791_s1 + $0xe0] sm:$0xff]  ;;  %v2151_v14 = vld [vmem:[%s2791_s1 + $0xd8] sm:$0xff]  ;;  %v2150_v24 = vld [vmem:[%s2791_s1 + $0xd0] sm:$0xff]  ;;  %vm1243_vm3 = vsmask.f32 5376  ;;  %s2253_s18 = smul.u32 40, %s2795_s13 }
   0xf   : > { %v197_v8 = vld [vmem:[%s2326_s4 + $0x28] sm:$0x1]  ;;  %v2336_v10 = vld [vmem:[%s2326_s4] sm:$0xff]   ;;  %v2339_v11 = vld [vmem:[%s2326_s4 + $0x10] sm:$0xff] }
  0x10   : > { %342 = vmatpush.bf16.msra.mxu0 %v2134_v1  ;;  %2238 = vmatpush.bf16.msra.mxu1 %v2134_v1  ;;  %v2342_v12 = vld [vmem:[%s2326_s4 + $0x20] sm:$0xff]  ;;  %v236_v13 = vunpack.c.l.b16 %v197_v8  ;;  %v2348_v15 = vld [vmem:[%s2326_s4 + $0x8] sm:$0xff]  ;;  %v247_v16 = vshll.u32 %v2336_v10, 16  ;;  %v2355_v18 = vld [vmem:[%s2326_s4 + $0x18] sm:$0xff]  ;;  %v260_v19 = vshll.u32 %v2339_v11, 16  ;;  %v245_v25 = vshrl.u32 %v2336_v10, 16  ;;  %s2765_s21 = scalar_lea.vmem %s2793_s3, %s2253_s18 }
  0x11   : > { %2239 = vmatpush.bf16.msra.mxu2 %v2134_v1  ;;  %713 = vmatpush.bf16.msra.mxu3 %v2154_v3  ;;  %v276_v21 = vshll.u32 %v2342_v12, 16  ;;  %v592_v22 = vld [vmem:[%s2326_s4 + $0x4] sm:$0xe]  ;;  %v2363_v23 = vld [vmem:[%s2326_s4 + $0x8] sm:$0xff]   ;;  %v252_v27 = vshll.u32 %v2348_v15, 16  ;;  %v264_v28 = vshrl.u32 %v2339_v11, 16 }
  0x12   : > { %v2358_v20 = vpack.c.b16 %v236_v13, %v236_v13  ;;  %v249_v26 = vrot.slane %v247_v16, 1  ;;  %v2129_v29 = vld [vmem:[%s2791_s1 + $0x48] sm:$0xff]  ;;  %v2374_v30 = vrot.slane %v260_v19, 1  ;;  %v268_v31 = vshll.u32 %v2355_v18, 16  ;;  %v2128_v39 = vld [vmem:[%s2791_s1 + $0x40] sm:$0xff]  ;;  %v2127_v45 = vld [vmem:[%s2791_s1 + $0x38] sm:$0xff] }
  0x13   : > { %v631_v32 = vunpack.c.l.b16 %v592_v22  ;;  %v632_v33 = vunpack.c.l.b16 %v2363_v23  ;;  %v2378_v34 = vrot.slane %v276_v21, 1  ;;  %v280_v35 = vshrl.u32 %v2342_v12, 16  ;;  %v2149_v37 = vld [vmem:[%s2791_s1 + $0xc8] sm:$0xff]  ;;  %v2143_v48 = vld [vmem:[%s2791_s1 + $0xb8] sm:$0xff]  ;;  %v2148_v52 = vld [vmem:[%s2791_s1 + $0xc0] sm:$0xff] }
  0x14   : > { %343 = vmatpush.bf16.msra.mxu0 %v2133_v4  ;;  %2240 = vmatpush.bf16.msra.mxu1 %v2133_v4  ;;  %v284_v36 = vshll.u32 %v2358_v20, 16  ;;  %v254_v38 = vrot.slane %v252_v27, 1  ;;  %v250_v40 = vor.u32 %v249_v26, %v245_v25  ;;  %v266_v41 = vor.u32 %v264_v28, %v2374_v30  ;;  %v2390_v43 = vld [vmem:[%s2326_s4 + $0xc] sm:$0xff]  ;;  %v2163_v49 = vld [vmem:[%s2791_s1 + $0x138] sm:$0xff]  ;;  %v2124_v3 = vld [vmem:[%s2791_s1 + $0x20] sm:$0xff] }
  0x15   : > { %2241 = vmatpush.bf16.msra.mxu2 %v2133_v4  ;;  %714 = vmatpush.bf16.msra.mxu3 %v2153_v5  ;;  %v270_v42 = vrot.slane %v268_v31, 1  ;;  %v2394_v44 = vpack.c.b16 %v632_v33, %v631_v32  ;;  %v282_v46 = vor.u32 %v280_v35, %v2378_v34  ;;  %v649_v54 = vrot.slane %v2390_v43, 1  ;;  %v2126_v56 = vld [vmem:[%s2791_s1 + $0x30] sm:$0xff]  ;;  %v2191_v57 = vld [vmem:[%s2791_s1 + $0x1f8] sm:$0xff]  ;;  %v2125_v61 = vld [vmem:[%s2791_s1 + $0x28] sm:$0xff] }
  0x16   : > { %v286_v47 = vrot.slane %v284_v36, 1  ;;  %v255_v50 = vsel %vm243_vm0, %v250_v40, %v254_v38  ;;  %v2142_v58 = vld [vmem:[%s2791_s1 + $0xb0] sm:$0xff]  ;;  %v2141_v63 = vld [vmem:[%s2791_s1 + $0xa8] sm:$0xff]  ;;  %v256_v1 = vshrl.u32 %v2348_v15, 16  ;;  %v272_v2 = vshrl.u32 %v2355_v18, 16  ;;  %v2140_v4 = vld [vmem:[%s2791_s1 + $0xa0] sm:$0xff] }
  0x17   : > { %v271_v51 = vsel %vm243_vm0, %v266_v41, %v270_v42  ;;  %v648_v53 = vrot.slane %v2394_v44, 1  ;;  %v2162_v59 = vld [vmem:[%s2791_s1 + $0x130] sm:$0xff]  ;;  %v2161_v0 = vld [vmem:[%s2791_s1 + $0x128] sm:$0xff]  ;;  %v2160_v5 = vld [vmem:[%s2791_s1 + $0x120] sm:$0xff]  ;;  %v779_v27 = vshrl.u32 %v2394_v44, 16  ;;  %v790_v31 = vshll.u32 %v2390_v43, 16 }
  0x18   : > { %344 = vmatpush.bf16.msra.mxu0 %v2132_v6  ;;  %2242 = vmatpush.bf16.msra.mxu1 %v2132_v6  ;;  %v287_v55 = vsel %vm243_vm0, %v282_v46, %v286_v47  ;;  %v2190_v62 = vld [vmem:[%s2791_s1 + $0x1f0] sm:$0xff]  ;;  %v2139_v13 = vld [vmem:[%s2791_s1 + $0x98] sm:$0xff]  ;;  %v2229_v25 = vld [vmem:[%s2326_s4] sm:$0xf0]  ;;  %v485_v46 = vrot.slane %v2348_v15, 1 }
  0x19   : > { %2243 = vmatpush.bf16.msra.mxu2 %v2132_v6  ;;  %715 = vmatpush.bf16.msra.mxu3 %v2152_v7  ;;  %v650_v60 = vsel %vm483_vm1, %v648_v53, %v649_v54  ;;  %v258_v6 = vor.u32 %v256_v1, %v254_v38  ;;  %v274_v7 = vor.u32 %v272_v2, %v270_v42  ;;  %v2451_v8 = vld [vmem:[%s2326_s4 + $0x14] sm:$0xff]  ;;  %v2230_v26 = vld [vmem:[%s2326_s4] sm:$0xe]  ;;  %v2189_v28 = vld [vmem:[%s2791_s1 + $0x1e8] sm:$0xff]  ;;  %v781_v38 = vrot.slane %v779_v27, 1 }
  0x1a   : > { %v651_v19 = vrot.slane %v2451_v8, 1  ;;  %v2122_v21 = vld [vmem:[%s2791_s1 + $0x10] sm:$0xff]  ;;  %v2137_v35 = vld [vmem:[%s2791_s1 + $0x88] sm:$0xff]  ;;  %v792_v41 = vrot.slane %v790_v31, 2  ;;  %v2120_v42 = vld [vmem:[%s2791_s1] sm:$0xff] }
  0x1b   : > { %v263_v16 = vsel %vm243_vm0, %v258_v6, %v2374_v30  ;;  %v2138_v22 = vld [vmem:[%s2791_s1 + $0x90] sm:$0xff]  ;;  %v787_v30 = vshrl.u32 %v2390_v43, 16  ;;  %v2157_v36 = vld [vmem:[%s2791_s1 + $0x108] sm:$0xff]  ;;  %v2156_v47 = vld [vmem:[%s2791_s1 + $0x100] sm:$0xff] }
  0x1c   : > { %345 = vmatpush.bf16.msra.mxu0 %v2131_v9  ;;  %2244 = vmatpush.bf16.msra.mxu1 %v2131_v9  ;;  %v652_v32 = vsel %vm483_vm1, %v649_v54, %v651_v19  ;;  %v2517_v53 = vld [vmem:[%s2326_s4 + $0x1c] sm:$0xff]  ;;  %v2166_v27 = vld [vmem:[%s2791_s1 + $0x150] sm:$0xff] }
  0x1d   : > { %2245 = vmatpush.bf16.msra.mxu2 %v2131_v9  ;;  %716 = vmatpush.bf16.msra.mxu3 %v2151_v14  ;;  %v2123_v9 = vld [vmem:[%s2791_s1 + $0x18] sm:$0xff]  ;;  %v789_v40 = vrot.slane %v787_v30, 1  ;;  %v2168_v6 = vld [vmem:[%s2791_s1 + $0x160] sm:$0xff]  ;;  %v2194_v31 = vld [vmem:[%s2791_s1 + $0x210] sm:$0xff] }
  0x1e   : > { %v2159_v14 = vld [vmem:[%s2791_s1 + $0x118] sm:$0xff] }
  0x1f   : > { %v2187_v2 = vld [vmem:[%s2791_s1 + $0x1d8] sm:$0xff] }
  0x20   : > { %346 = vmatpush.bf16.msra.mxu0 %v2130_v17  ;;  %2246 = vmatpush.bf16.msra.mxu1 %v2130_v17 }
  0x21   : > { %2247 = vmatpush.bf16.msra.mxu2 %v2130_v17  ;;  %717 = vmatpush.bf16.msra.mxu3 %v2150_v24  ;;  %v279_v17 = vsel %vm243_vm0, %v274_v7, %v2378_v34  ;;  %v2158_v24 = vld [vmem:[%s2791_s1 + $0x110] sm:$0xff]  ;;  %v2121_v34 = vld [vmem:[%s2791_s1 + $0x8] sm:$0xff]  ;;  %v2196_v7 = vld [vmem:[%s2791_s1 + $0x220] sm:$0xff] }
  0x24   : > { %347 = vmatpush.bf16.msra.mxu0 %v2129_v29  ;;  %2248 = vmatpush.bf16.msra.mxu1 %v2129_v29 }
  0x25   : > { %2249 = vmatpush.bf16.msra.mxu2 %v2129_v29  ;;  %718 = vmatpush.bf16.msra.mxu3 %v2149_v37  ;;  %v782_v29 = vshll.u32 %v2394_v44, 16  ;;  %v2231_v37 = vor.u32 %v2230_v26, %v2229_v25  ;;  %v2136_v44 = vld [vmem:[%s2791_s1 + $0x80] sm:$0xff]  ;;  %v2195_v25 = vld [vmem:[%s2791_s1 + $0x218] sm:$0xff]  ;;  %v2186_v26 = vld [vmem:[%s2791_s1 + $0x1d0] sm:$0xff] }
  0x28   : > { %348 = vmatpush.bf16.msra.mxu0 %v2128_v39  ;;  %2250 = vmatpush.bf16.msra.mxu1 %v2128_v39 }
  0x29   : > { %2251 = vmatpush.bf16.msra.mxu2 %v2128_v39  ;;  %719 = vmatpush.bf16.msra.mxu3 %v2148_v52  ;;  %v784_v39 = vrot.slane %v782_v29, 2  ;;  %v2199_v52 = vld [vmem:[%s2791_s1 + $0x238] sm:$0xff]  ;;  %v808_v29 = vshll.u32 %v2517_v53, 16 }
  0x2b   : > { %349 = vmatmul.bf16.vlgmr.msra.gmra.mxu0 %v255_v50  ;;  %359 = vmatmul.bf16.vlgmr.msra.gmra.mxu1 %v271_v51  ;;  %v785_v50 = vor.u32 %v784_v39, %v781_v38  ;;  %v793_v51 = vor.u32 %v792_v41, %v789_v40  ;;  %v489_v38 = vrot.slane %v2355_v18, 1 }
  0x2c   : > { %428 = vmatpush.bf16.msrb.mxu1 %v2127_v45  ;;  %884 = vmatpush.bf16.msrb.mxu0 %v2163_v49  ;;  %v484_v45 = vrot.slane %v2231_v37, 1  ;;  %v2171_v49 = vld [vmem:[%s2791_s1 + $0x178] sm:$0xff] }
  0x2d   : > { %548 = vmatpush.bf16.msrb.mxu2 %v2143_v48  ;;  %1350 = vmatpush.bf16.msrb.mxu3 %v2191_v57  ;;  %v2183_v48 = vld [vmem:[%s2791_s1 + $0x1b8] sm:$0xff]  ;;  %v2170_v57 = vld [vmem:[%s2791_s1 + $0x170] sm:$0xff] }
  0x2e   : > { %369 = vmatmul.bf16.vlgmr.msra.gmra.mxu2 %v287_v55  ;;  %720 = vmatmul.bf16.vlgmr.msra.gmra.mxu3 %v650_v60  ;;  %v486_v54 = vsel %vm483_vm1, %v484_v45, %v485_v46  ;;  %v794_v55 = vsel %vm777_vm2, %v785_v50, %v793_v51  ;;  %v2188_v60 = vld [vmem:[%s2791_s1 + $0x1e0] sm:$0xff] }
  0x30   : > { %429 = vmatpush.bf16.msrb.mxu1 %v2126_v56  ;;  %885 = vmatpush.bf16.msrb.mxu0 %v2162_v59  ;;  %v2182_v56 = vld [vmem:[%s2791_s1 + $0x1b0] sm:$0xff] }
  0x31   : > { %549 = vmatpush.bf16.msrb.mxu2 %v2142_v58  ;;  %1351 = vmatpush.bf16.msrb.mxu3 %v2190_v62  ;;  %v653_v58 = vrot.slane %v2517_v53, 1  ;;  %v2198_v59 = vld [vmem:[%s2791_s1 + $0x230] sm:$0xff]  ;;  %v799_v62 = vshll.u32 %v2451_v8, 16 }
  0x33   : > { %v654_v1 = vsel %vm483_vm1, %v651_v19, %v653_v58 }
  0x34   : > { %430 = vmatpush.bf16.msrb.mxu1 %v2125_v61  ;;  %886 = vmatpush.bf16.msrb.mxu0 %v2161_v0  ;;  %v796_v61 = vshrl.u32 %v2451_v8, 16  ;;  %v2169_v0 = vld [vmem:[%s2791_s1 + $0x168] sm:$0xff] }
  0x35   : > { %550 = vmatpush.bf16.msrb.mxu2 %v2141_v63  ;;  %1352 = vmatpush.bf16.msrb.mxu3 %v2189_v28  ;;  %v2181_v63 = vld [vmem:[%s2791_s1 + $0x1a8] sm:$0xff]  ;;  %v805_v28 = vshrl.u32 %v2517_v53, 16 }
  0x38   : > { %431 = vmatpush.bf16.msrb.mxu1 %v2124_v3  ;;  %887 = vmatpush.bf16.msrb.mxu0 %v2160_v5  ;;  %v798_v3 = vrot.slane %v796_v61, 1  ;;  %v2180_v5 = vld [vmem:[%s2791_s1 + $0x1a0] sm:$0xff] }
  0x39   : > { %551 = vmatpush.bf16.msrb.mxu2 %v2140_v4  ;;  %1353 = vmatpush.bf16.msrb.mxu3 %v2188_v60  ;;  %v801_v4 = vrot.slane %v799_v62, 2  ;;  %v756_v60 = vld [vmem:[%s2326_s4 + $0x2c] sm:$0x3] }
  0x3b   : > { %354 = vmatmul.bf16.gmra.mxu0 %v263_v16  ;;  %364 = vmatmul.bf16.gmra.mxu1 %v279_v17  ;;  %v2566_v16 = vld [vmem:[%s2326_s4 + $0x24] sm:$0xff]  ;;  %v2167_v17 = vld [vmem:[%s2791_s1 + $0x158] sm:$0xff] }
  0x3c   : > { %432 = vmatpush.bf16.msrb.mxu1 %v2123_v9  ;;  %888 = vmatpush.bf16.msrb.mxu0 %v2159_v14  ;;  %v487_v9 = vrot.slane %v2339_v11, 1  ;;  %v2179_v14 = vld [vmem:[%s2791_s1 + $0x198] sm:$0xff]  ;;  %v817_v50 = vshll.u32 %v2566_v16, 16 }
  0x3d   : > { %552 = vmatpush.bf16.msrb.mxu2 %v2139_v13  ;;  %1354 = vmatpush.bf16.msrb.mxu3 %v2187_v2  ;;  %v802_v13 = vor.u32 %v801_v4, %v798_v3  ;;  %v775_v2 = vunpack.c.l.b16 %v756_v60 }
  0x3e   : > { %725 = vmatmul.bf16.gmra.mxu3 %v652_v32  ;;  %v488_v19 = vsel %vm483_vm1, %v485_v46, %v487_v9  ;;  %v602_v32 = vld [vmem:[%s2326_s4 + $0x2c] sm:$0x1]  ;;  %v490_v41 = vsel %vm483_vm1, %v487_v9, %v489_v38  ;;  %v2192_v9 = vld [vmem:[%s2791_s1 + $0x200] sm:$0xff] }
  0x3f   : > { %v641_v37 = vunpack.c.l.b16 %v602_v32 }
  0x40   : > { %433 = vmatpush.bf16.msrb.mxu1 %v2122_v21  ;;  %889 = vmatpush.bf16.msrb.mxu0 %v2158_v24  ;;  %v803_v21 = vsel %vm777_vm2, %v793_v51, %v802_v13  ;;  %v2178_v24 = vld [vmem:[%s2791_s1 + $0x190] sm:$0xff]  ;;  %v2176_v51 = vld [vmem:[%s2791_s1 + $0x180] sm:$0xff] }
  0x41   : > { %553 = vmatpush.bf16.msrb.mxu2 %v2138_v22  ;;  %v655_v22 = vrot.slane %v2566_v16, 1  ;;  %1355 = vmatpush.bf16.msrb.mxu3 %v2186_v26  ;;  %v647_v40 = vpack.c.b16 %v641_v37, %v641_v37  ;;  %v1394_v37 = vld [vmem:[%s2326_s4 + $0x8] sm:$0x8] }
  0x43   : > { %v656_v30 = vsel %vm483_vm1, %v653_v58, %v655_v22  ;;  %v657_v45 = vrot.slane %v647_v40, 1 }
  0x44   : > { %434 = vmatpush.bf16.msrb.mxu1 %v2121_v34  ;;  %890 = vmatpush.bf16.msrb.mxu0 %v2157_v36  ;;  %v2185_v34 = vld [vmem:[%s2791_s1 + $0x1c8] sm:$0xff]  ;;  %v810_v36 = vrot.slane %v808_v29, 2 }
  0x45   : > { %554 = vmatpush.bf16.msrb.mxu2 %v2137_v35  ;;  %v807_v35 = vrot.slane %v805_v28, 1  ;;  %1356 = vmatpush.bf16.msrb.mxu3 %v2185_v34 }
  0x47   : > { %v811_v39 = vor.u32 %v810_v36, %v807_v35  ;;  %v928_v35 = vld [vmem:[%s2326_s4 + $0x4] sm:$0xc] }
  0x48   : > { %435 = vmatpush.bf16.msrb.mxu1 %v2120_v42  ;;  %891 = vmatpush.bf16.msrb.mxu0 %v2156_v47  ;;  %v1058_v42 = vld [vmem:[%s2326_s4 + $0x8] sm:$0xc]  ;;  %v1098_v47 = vunpack.c.h.b16 %v2363_v23 }
  0x49   : > { %555 = vmatpush.bf16.msrb.mxu2 %v2136_v44  ;;  %v812_v44 = vsel %vm777_vm2, %v802_v13, %v811_v39  ;;  %v1097_v46 = vunpack.c.l.b16 %v1058_v42 }
  0x4b   : > { %436 = vmatmul.bf16.vlgmr.msrb.gmra.mxu1 %v2336_v10  ;;  %892 = vmatmul.bf16.vlgmr.msrb.gmra.mxu0 %v794_v55  ;;  %v2197_v10 = vld [vmem:[%s2791_s1 + $0x228] sm:$0xff]  ;;  %v2164_v55 = vld [vmem:[%s2791_s1 + $0x140] sm:$0xff] }
  0x4c   : > { %1014 = vmatpush.bf16.msra.mxu1 %v2171_v49  ;;  %1480 = vmatpush.bf16.msra.mxu0 %v2199_v52  ;;  %v814_v49 = vshrl.u32 %v2566_v16, 16  ;;  %v2193_v52 = vld [vmem:[%s2791_s1 + $0x208] sm:$0xff] }
  0x4d   : > { %1178 = vmatpush.bf16.msra.mxu2 %v2183_v48  ;;  %v2165_v48 = vld [vmem:[%s2791_s1 + $0x148] sm:$0xff] }
  0x4e   : > { %556 = vmatmul.bf16.vlgmr.msrb.gmra.mxu2 %v486_v54  ;;  %730 = vmatmul.bf16.gmra.mxu3 %v654_v1  ;;  %v2184_v54 = vld [vmem:[%s2791_s1 + $0x1c0] sm:$0xff]  ;;  %v816_v58 = vrot.slane %v814_v49, 1  ;;  %v491_v1 = vrot.slane %v2342_v12, 1  ;;  %v951_v49 = vrot.slane %v2390_v43, 2  ;;  %v2678_v43 = vld [vmem:[%s2326_s4 + $0x28] sm:$0xff] }
  0x4f   : > { %1357 = vmatpush.bf16.msrb.mxu3 %v2184_v54 }
  0x50   : > { %1015 = vmatpush.bf16.msra.mxu1 %v2170_v57  ;;  %1481 = vmatpush.bf16.msra.mxu0 %v2198_v59  ;;  %v2629_v57 = vpack.c.b16 %v1098_v47, %v1097_v46  ;;  %v819_v59 = vrot.slane %v817_v50, 2 }
  0x51   : > { %1179 = vmatpush.bf16.msra.mxu2 %v2182_v56  ;;  %v2625_v56 = vld [vmem:[%s2326_s4 + $0x10] sm:$0xff] }
  0x52   : > { %v1245_v61 = vshrl.u32 %v2629_v57, 16  ;;  %v1248_v62 = vshll.u32 %v2629_v57, 16  ;;  %v1115_v46 = vrot.slane %v2625_v56, 2 }
  0x54   : > { %1016 = vmatpush.bf16.msra.mxu1 %v2169_v0  ;;  %1482 = vmatpush.bf16.msra.mxu0 %v2197_v10  ;;  %v1256_v0 = vshll.u32 %v2625_v56, 16  ;;  %v820_v10 = vor.u32 %v819_v59, %v816_v58  ;;  %v1247_v3 = vrot.slane %v1245_v61, 2  ;;  %v1250_v4 = vrot.slane %v1248_v62, 3 }
  0x55   : > { %1180 = vmatpush.bf16.msra.mxu2 %v2181_v63  ;;  %v1253_v63 = vshrl.u32 %v2625_v56, 16  ;;  %v953_v59 = vrot.slane %v2451_v8, 2 }
  0x56   : > { %v821_v13 = vsel %vm777_vm2, %v811_v39, %v820_v10  ;;  %v1413_v39 = vunpack.c.l.b16 %v1394_v37 }
  0x58   : > { %1017 = vmatpush.bf16.msra.mxu1 %v2168_v6  ;;  %1483 = vmatpush.bf16.msra.mxu0 %v2196_v7  ;;  %v1258_v6 = vrot.slane %v1256_v0, 3  ;;  %v492_v7 = vsel %vm483_vm1, %v489_v38, %v491_v1  ;;  %v947_v38 = vunpack.c.l.b16 %v928_v35  ;;  %v1414_v42 = vpack.c.b16 %v1098_v47, %v1413_v39  ;;  %v1222_v0 = vld [vmem:[%s2326_s4 + $0x30] sm:$0x7] }
  0x59   : > { %1181 = vmatpush.bf16.msra.mxu2 %v2180_v5  ;;  %v1255_v5 = vrot.slane %v1253_v63, 2  ;;  %v957_v39 = vrot.slane %v2566_v16, 2 }
  0x5a   : > { %v1416_v50 = vrot.slane %v1414_v42, 3 }
  0x5b   : > { %441 = vmatmul.bf16.gmra.mxu1 %v2348_v15  ;;  %897 = vmatmul.bf16.gmra.mxu0 %v803_v21  ;;  %v2177_v15 = vld [vmem:[%s2791_s1 + $0x188] sm:$0xff] }
  0x5c   : > { %1018 = vmatpush.bf16.msra.mxu1 %v2167_v17  ;;  %1484 = vmatpush.bf16.msra.mxu0 %v2195_v25  ;;  %v1251_v17 = vor.u32 %v1250_v4, %v1247_v3  ;;  %v2649_v25 = vld [vmem:[%s2326_s4 + $0x18] sm:$0xff] }
  0x5d   : > { %1182 = vmatpush.bf16.msra.mxu2 %v2179_v14  ;;  %v2642_v14 = vpack.c.b16 %v775_v2, %v775_v2  ;;  %v1262_v28 = vshrl.u32 %v2649_v25, 16  ;;  %v1265_v29 = vshll.u32 %v2649_v25, 16  ;;  %v1117_v58 = vrot.slane %v2649_v25, 2 }
  0x5e   : > { %561 = vmatmul.bf16.gmra.mxu2 %v488_v19  ;;  %735 = vmatmul.bf16.gmra.mxu3 %v656_v30  ;;  %v1259_v19 = vor.u32 %v1258_v6, %v1255_v5  ;;  %v1419_v60 = vrot.slane %v2649_v25, 3  ;;  %v954_v2 = vsel %vm949_vm4, %v951_v49, %v953_v59  ;;  %v1241_v5 = vunpack.c.l.b16 %v1222_v0 }
  0x5f   : > { %v823_v21 = vshrl.u32 %v2642_v14, 16  ;;  %v1118_v63 = vsel %vm949_vm4, %v1115_v46, %v1117_v58 }
  0x60   : > { %1019 = vmatpush.bf16.msra.mxu1 %v2166_v27  ;;  %1485 = vmatpush.bf16.msra.mxu0 %v2194_v31  ;;  %v1267_v31 = vrot.slane %v1265_v29, 3  ;;  %v2692_v6 = vpack.c.b16 %v1241_v5, %v1241_v5 }
  0x61   : > { %1183 = vmatpush.bf16.msra.mxu2 %v2178_v24  ;;  %v1260_v24 = vsel %vm1243_vm3, %v1251_v17, %v1259_v19  ;;  %v825_v26 = vrot.slane %v823_v21, 1 }
  0x62   : > { %v1292_v17 = vshll.u32 %v2692_v6, 16 }
  0x64   : > { %1020 = vmatpush.bf16.msra.mxu1 %v2165_v48  ;;  %1486 = vmatpush.bf16.msra.mxu0 %v2193_v52 }
  0x65   : > { %1184 = vmatpush.bf16.msra.mxu2 %v2177_v15  ;;  %v1264_v15 = vrot.slane %v1262_v28, 2 }
  0x67   : > { %v1268_v36 = vor.u32 %v1267_v31, %v1264_v15 }
  0x68   : > { %1021 = vmatpush.bf16.msra.mxu1 %v2164_v55  ;;  %1487 = vmatpush.bf16.msra.mxu0 %v2192_v9 }
  0x69   : > { %1185 = vmatpush.bf16.msra.mxu2 %v2176_v51  ;;  %v1269_v40 = vsel %vm1243_vm3, %v1259_v19, %v1268_v36 }
  0x6b   : > { %446 = vmatmul.bf16.gmra.mxu1 %v2339_v11  ;;  %902 = vmatmul.bf16.gmra.mxu0 %v812_v44  ;;  %v658_v11 = vsel %vm483_vm1, %v655_v22, %v657_v45  ;;  %v826_v22 = vshll.u32 %v2642_v14, 16 }
  0x6d   : > { %v828_v27 = vrot.slane %v826_v22, 2  ;;  %v955_v22 = vrot.slane %v2517_v53, 2 }
  0x6e   : > { %566 = vmatmul.bf16.gmra.mxu2 %v490_v41  ;;  %740 = vmatmul.bf16.gmra.mxu3 %v658_v11  ;;  %v2661_v41 = vld [vmem:[%s2326_s4 + $0x20] sm:$0xff] }
  0x6f   : > { %v829_v30 = vor.u32 %v828_v27, %v825_v26  ;;  %v1271_v44 = vshrl.u32 %v2661_v41, 16  ;;  %v1274_v45 = vshll.u32 %v2661_v41, 16  ;;  %v1119_v19 = vrot.slane %v2661_v41, 2 }
  0x70   : > { %v1294_v26 = vrot.slane %v1292_v17, 3 }
  0x71   : > { %v830_v34 = vsel %vm777_vm2, %v820_v10, %v829_v30  ;;  %v1273_v51 = vrot.slane %v1271_v44, 2  ;;  %v1276_v52 = vrot.slane %v1274_v45, 3  ;;  %v1120_v27 = vsel %vm949_vm4, %v1117_v58, %v1119_v19 }
  0x72   : > { %v958_v45 = vsel %vm949_vm4, %v955_v22, %v957_v39 }
  0x73   : > { %v1277_v11 = vor.u32 %v1276_v52, %v1273_v51 }
  0x75   : > { %v1278_v55 = vsel %vm1243_vm3, %v1268_v36, %v1277_v11  ;;  %v1121_v36 = vrot.slane %v2678_v43, 2 }
  0x7b   : > { %451 = vmatmul.bf16.gmra.mxu1 %v2355_v18  ;;  %907 = vmatmul.bf16.gmra.mxu0 %v821_v13  ;;  %v493_v18 = vrot.slane %v2358_v20, 1  ;;  %v948_v20 = vpack.c.b16 %v632_v33, %v947_v38  ;;  %v1417_v33 = vrot.slane %v2625_v56, 3  ;;  %v1280_v56 = vshrl.u32 %v2678_v43, 16 }
  0x7c   : > { %v1289_v13 = vshrl.u32 %v2692_v6, 16 }
  0x7d   : > { %v494_v32 = vsel %vm483_vm1, %v491_v1, %v493_v18  ;;  %v950_v48 = vrot.slane %v948_v20, 2  ;;  %v1418_v54 = vsel %vm1415_vm5, %v1416_v50, %v1417_v33  ;;  %v1282_v61 = vrot.slane %v1280_v56, 2  ;;  %v1068_v20 = vld [vmem:[%s2326_s4 + $0x30] sm:$0x3] }
  0x7e   : > { %571 = vmatmul.bf16.gmra.mxu2 %v492_v7  ;;  %1358 = vmatmul.bf16.vlgmr.msrb.gmra.mxu3 %v1260_v24  ;;  %v1420_v3 = vsel %vm1415_vm5, %v1417_v33, %v1419_v60  ;;  %v1421_v24 = vrot.slane %v2661_v41, 3  ;;  %v1291_v25 = vrot.slane %v1289_v13, 2  ;;  %v956_v18 = vsel %vm949_vm4, %v953_v59, %v955_v22 }
  0x7f   : > { %v952_v47 = vsel %vm949_vm4, %v950_v48, %v951_v49  ;;  %v1122_v41 = vsel %vm949_vm4, %v1119_v19, %v1121_v36  ;;  %v1107_v48 = vunpack.c.l.b16 %v1068_v20  ;;  %v959_v56 = vrot.slane %v2642_v14, 2 }
  0x80   : > { %v1422_v30 = vsel %vm1415_vm5, %v1419_v60, %v1421_v24  ;;  %v1295_v15 = vor.u32 %v1294_v26, %v1291_v25 }
  0x81   : > { %v1113_v16 = vpack.c.b16 %v1107_v48, %v1107_v48 }
  0x8b   : > { %456 = vmatmul.bf16.gmra.mxu1 %v2342_v12  ;;  %912 = vmatmul.bf16.gmra.mxu0 %v830_v34  ;;  %v1114_v12 = vrot.slane %v2629_v57, 2  ;;  %v1283_v57 = vshll.u32 %v2678_v43, 16 }
  0x8d   : > { %v1116_v23 = vsel %vm949_vm4, %v1114_v12, %v1115_v46  ;;  %v1285_v62 = vrot.slane %v1283_v57, 3  ;;  %v1425_v57 = vrot.slane %v2692_v6, 3 }
  0x8e   : > { %576 = vmatmul.bf16.gmra.mxu2 %v494_v32  ;;  %1363 = vmatmul.bf16.gmra.mxu3 %v1269_v40  ;;  %v1423_v40 = vrot.slane %v2678_v43, 3 }
  0x8f   : > { %v1286_v4 = vor.u32 %v1285_v62, %v1282_v61 }
  0x90   : > { %v1424_v12 = vsel %vm1415_vm5, %v1421_v24, %v1423_v40  ;;  %v1426_v0 = vsel %vm1415_vm5, %v1423_v40, %v1425_v57 }
  0x91   : > { %v1287_v8 = vsel %vm1243_vm3, %v1277_v11, %v1286_v4  ;;  %v1296_v53 = vsel %vm1243_vm3, %v1286_v4, %v1295_v15  ;;  %v1123_v11 = vrot.slane %v1113_v16, 2 }
  0x93   : > { %v1124_v59 = vsel %vm949_vm4, %v1121_v36, %v1123_v11 }
  0x9b   : > { %1022 = vmatmul.bf16.vlgmr.msra.gmra.mxu1 %v952_v47  ;;  %1488 = vmatmul.bf16.vlgmr.msra.gmra.mxu0 %v1418_v54 }
  0x9e   : > { %1186 = vmatmul.bf16.vlgmr.msra.gmra.mxu2 %v1116_v23  ;;  %1368 = vmatmul.bf16.gmra.mxu3 %v1278_v55 }
  0xa8   : > { %v350_v1 = vpop.f32.mrf.mxu0  ;;  %v2687_v10 = vpop.f32.mrf.mxu1 }
  0xab   : > { %1027 = vmatmul.bf16.gmra.mxu1 %v954_v2  ;;  %1493 = vmatmul.bf16.gmra.mxu0 %v1420_v3 }
  0xae   : > { %1191 = vmatmul.bf16.gmra.mxu2 %v1118_v63  ;;  %1373 = vmatmul.bf16.gmra.mxu3 %v1287_v8  ;;  %v960_v63 = vsel %vm949_vm4, %v957_v39, %v959_v56 }
  0xb0   : > { %v352_v7 = vpop.f32.mrf.mxu0  ;;  %v2694_v9 = vpop.f32.mrf.mxu1 }
  0xb1   : > { %v721_v21 = vpop.f32.mrf.mxu3  ;;  %v2706_v31 = vpop.f32.mrf.mxu2 }
  0xb8   : > { %v355_v28 = vpop.f32.mrf.mxu0  ;;  %v2702_v29 = vpop.f32.mrf.mxu1 }
  0xb9   : > { %v723_v32 = vpop.f32.mrf.mxu3  ;;  %v2712_v38 = vpop.f32.mrf.mxu2 }
  0xbb   : > { %1032 = vmatmul.bf16.gmra.mxu1 %v956_v18  ;;  %1498 = vmatmul.bf16.gmra.mxu0 %v1422_v30 }
  0xbe   : > { %1196 = vmatmul.bf16.gmra.mxu2 %v1120_v27  ;;  %1378 = vmatmul.bf16.gmra.mxu3 %v1296_v53 }
  0xc0   : > { %v357_v34 = vpop.f32.mrf.mxu0  ;;  %v2709_v35 = vpop.f32.mrf.mxu1 }
  0xc1   : > { %v726_v37 = vpop.f32.mrf.mxu3 }
  0xc8   : > { %v437_v42 = vpop.f32.mrf.mxu1  ;;  %v893_v44 = vpop.f32.mrf.mxu0 }
  0xc9   : > { %v438_v46 = vadd.f32 %v437_v42, %v350_v1  ;;  %v728_v49 = vpop.f32.mrf.mxu3 }
  0xcb   : > { %1037 = vmatmul.bf16.gmra.mxu1 %v958_v45  ;;  %1503 = vmatmul.bf16.gmra.mxu0 %v1424_v12 }
  0xce   : > { %1201 = vmatmul.bf16.gmra.mxu2 %v1122_v41 }
  0xd0   : > { %v439_v52 = vpop.f32.mrf.mxu1  ;;  %v895_v23 = vpop.f32.mrf.mxu0 }
  0xd1   : > { %v557_v50 = vpop.f32.mrf.mxu2  ;;  %v440_v47 = vadd.f32 %v439_v52, %v352_v7  ;;  %v731_v55 = vpop.f32.mrf.mxu3 }
  0xd2   : > { %v582_v33 = vadd.f32 %v557_v50, %v438_v46 }
  0xd4   : > { %v746_v51 = vadd.f32 %v721_v21, %v582_v33 }
  0xd6   : > { %v2720_v54 = vadd.f32 %v893_v44, %v746_v51 }
  0xd8   : > { %v442_v61 = vpop.f32.mrf.mxu1  ;;  %v898_v62 = vpop.f32.mrf.mxu0 }
  0xd9   : > { %v559_v43 = vpop.f32.mrf.mxu2  ;;  %v443_v1 = vadd.f32 %v442_v61, %v355_v28  ;;  %v733_v3 = vpop.f32.mrf.mxu3 }
  0xda   : > { %v583_v58 = vadd.f32 %v559_v43, %v440_v47 }
  0xdb   : > { %1042 = vmatmul.bf16.gmra.mxu1 %v960_v63  ;;  %1508 = vmatmul.bf16.gmra.mxu0 %v1426_v0 }
  0xdc   : > { %v747_v60 = vadd.f32 %v723_v32, %v583_v58 }
  0xde   : > { %1206 = vmatmul.bf16.gmra.mxu2 %v1124_v59  ;;  %v2727_v2 = vadd.f32 %v895_v23, %v747_v60 }
  0xe0   : > { %v444_v8 = vpop.f32.mrf.mxu1  ;;  %v900_v6 = vpop.f32.mrf.mxu0 }
  0xe1   : > { %v562_v14 = vpop.f32.mrf.mxu2  ;;  %v445_v7 = vadd.f32 %v444_v8, %v357_v34  ;;  %v736_v17 = vpop.f32.mrf.mxu3 }
  0xe2   : > { %v584_v4 = vadd.f32 %v562_v14, %v443_v1 }
  0xe4   : > { %v748_v5 = vadd.f32 %v726_v37, %v584_v4 }
  0xe6   : > { %v2729_v13 = vadd.f32 %v898_v62, %v748_v5 }
  0xe8   : > { %v447_v24 = vpop.f32.mrf.mxu1  ;;  %v903_v25 = vpop.f32.mrf.mxu0 }
  0xe9   : > { %v564_v19 = vpop.f32.mrf.mxu2  ;;  %v448_v26 = vadd.f32 %v447_v24, %v2687_v10  ;;  %v738_v30 = vpop.f32.mrf.mxu3 }
  0xea   : > { %v585_v21 = vadd.f32 %v564_v19, %v445_v7 }
  0xec   : > { %v749_v22 = vadd.f32 %v728_v49, %v585_v21  ;;  %v2756_v21 = vld [vmem:[%s2792_s2] ss:$0 sm:$0xff] }
  0xee   : > { %v2732_v27 = vadd.f32 %v900_v6, %v749_v22 }
  0xf0   : > { %v449_v32 = vpop.f32.mrf.mxu1  ;;  %v905_v53 = vpop.f32.mrf.mxu0 }
  0xf1   : > { %v567_v28 = vpop.f32.mrf.mxu2  ;;  %v450_v34 = vadd.f32 %v449_v32, %v2694_v9  ;;  %v741_v41 = vpop.f32.mrf.mxu3 }
  0xf2   : > { %v586_v18 = vadd.f32 %v567_v28, %v448_v26 }
  0xf4   : > { %v750_v15 = vadd.f32 %v731_v55, %v586_v18 }
  0xf6   : > { %v2735_v36 = vadd.f32 %v903_v25, %v750_v15 }
  0xf8   : > { %v452_v20 = vpop.f32.mrf.mxu1  ;;  %v908_v42 = vpop.f32.mrf.mxu0 }
  0xf9   : > { %v569_v37 = vpop.f32.mrf.mxu2  ;;  %v453_v10 = vadd.f32 %v452_v20, %v2702_v29  ;;  %v743_v9 = vpop.f32.mrf.mxu3 }
  0xfa   : > { %v587_v39 = vadd.f32 %v569_v37, %v450_v34 }
  0xfc   : > { %v751_v40 = vadd.f32 %v733_v3, %v587_v39 }
  0xfe   : > { %v2738_v44 = vadd.f32 %v905_v53, %v751_v40 }
 0x100   : > { %v454_v48 = vpop.f32.mrf.mxu1  ;;  %v910_v49 = vpop.f32.mrf.mxu0 }
 0x101   : > { %v572_v45 = vpop.f32.mrf.mxu2  ;;  %v455_v50 = vadd.f32 %v454_v48, %v2709_v35  ;;  %v1359_v55 = vpop.f32.mrf.mxu3 }
 0x102   : > { %v588_v12 = vadd.f32 %v572_v45, %v453_v10 }
 0x104   : > { %v752_v46 = vadd.f32 %v736_v17, %v588_v12 }
 0x106   : > { %v2741_v33 = vadd.f32 %v908_v42, %v752_v46 }
 0x108   : > { %v457_v23 = vpop.f32.mrf.mxu1  ;;  %v913_v47 = vpop.f32.mrf.mxu0 }
 0x109   : > { %v574_v16 = vpop.f32.mrf.mxu2  ;;  %v458_v11 = vadd.f32 %v457_v23, %v2706_v31  ;;  %v1361_v63 = vpop.f32.mrf.mxu3 }
 0x10a   : > { %v589_v51 = vadd.f32 %v574_v16, %v455_v50 }
 0x10c   : > { %v753_v52 = vadd.f32 %v738_v30, %v589_v51 }
 0x10e   : > { %v2744_v29 = vadd.f32 %v910_v49, %v753_v52 }
 0x110   : > { %v459_v58 = vpop.f32.mrf.mxu1  ;;  %v915_v59 = vpop.f32.mrf.mxu0 }
 0x111   : > { %v577_v43 = vpop.f32.mrf.mxu2  ;;  %v460_v35 = vadd.f32 %v459_v58, %v2712_v38  ;;  %v1364_v6 = vpop.f32.mrf.mxu3 }
 0x112   : > { %v590_v56 = vadd.f32 %v577_v43, %v458_v11 }
 0x114   : > { %v754_v57 = vadd.f32 %v741_v41, %v590_v56 }
 0x116   : > { %v2747_v60 = vadd.f32 %v913_v47, %v754_v57 }
 0x118   : > { %v1023_v1 = vpop.f32.mrf.mxu1  ;;  %v1489_v3 = vpop.f32.mrf.mxu0 }
 0x119   : > { %v579_v61 = vpop.f32.mrf.mxu2  ;;  %v1048_v31 = vadd.f32 %v1023_v1, %v2720_v54  ;;  %v1366_v15 = vpop.f32.mrf.mxu3 }
 0x11a   : > { %v591_v62 = vadd.f32 %v579_v61, %v460_v35 }
 0x11c   : > { %v755_v0 = vadd.f32 %v743_v9, %v591_v62 }
 0x11e   : > { %v2750_v14 = vadd.f32 %v915_v59, %v755_v0 }
 0x120   : > { %v1025_v7 = vpop.f32.mrf.mxu1  ;;  %v1491_v17 = vpop.f32.mrf.mxu0 }
 0x121   : > { %v1187_v4 = vpop.f32.mrf.mxu2  ;;  %v1049_v38 = vadd.f32 %v1025_v7, %v2727_v2  ;;  %v1369_v46 = vpop.f32.mrf.mxu3 }
 0x122   : > { %v1212_v5 = vadd.f32 %v1187_v4, %v1048_v31 }
 0x124   : > { %v1384_v8 = vadd.f32 %v1359_v55, %v1212_v5 }
 0x126   : > { %v1514_v19 = vadd.f32 %v1489_v3, %v1384_v8 }
 0x128   : > { %v1528_v54 = vadd.f32 %v2756_v21, %v1514_v19  ;;  %v1028_v26 = vpop.f32.mrf.mxu1  ;;  %v1494_v28 = vpop.f32.mrf.mxu0 }
 0x129   : > { %v1189_v22 = vpop.f32.mrf.mxu2  ;;  %v1050_v30 = vadd.f32 %v1028_v26, %v2729_v13  ;;  %v1371_v43 = vpop.f32.mrf.mxu3 }
 0x12a   : > { %v1213_v24 = vadd.f32 %v1189_v22, %v1049_v38  ;;  %v1548_v32 = vmul.f32 0.01, %v1528_v54  ;;  %vm1538_vm6 = vcmp.ge.f32.partialorder %v1528_v54, 0.0 }
 0x12c   : > { %v1385_v25 = vadd.f32 %v1361_v63, %v1213_v24  ;;  %v1558_v39 = vsel %vm1538_vm6, %v1528_v54, %v1548_v32 }
 0x12e   : > { %v1515_v18 = vadd.f32 %v1491_v17, %v1385_v25 }
 0x130   : > { %v1529_v2 = vadd.f32 %v2756_v21, %v1515_v18  ;;  %v1030_v20 = vpop.f32.mrf.mxu1  ;;  %v1496_v42 = vpop.f32.mrf.mxu0 }
 0x131   : > { %v1192_v53 = vpop.f32.mrf.mxu2  ;;  %v1051_v10 = vadd.f32 %v1030_v20, %v2732_v27  ;;  %v1374_v31 = vpop.f32.mrf.mxu3 }
 0x132   : > { %vm1539_vm7 = vcmp.ge.f32.partialorder %v1529_v2, 0.0  ;;  %v1549_v34 = vmul.f32 0.01, %v1529_v2  ;;  %v1214_v37 = vadd.f32 %v1192_v53, %v1050_v30 }
 0x134   : > { %v1559_v40 = vsel %vm1539_vm7, %v1529_v2, %v1549_v34  ;;  %v1386_v41 = vadd.f32 %v1364_v6, %v1214_v37 }
 0x135   : > { %v2207_v13 = vpack.c.bf16 %v1559_v40, %v1558_v39 }
 0x136   : > { %v1516_v45 = vadd.f32 %v1494_v28, %v1386_v41 }
 0x137   : > { %2208 = vst [vmem:[%s2765_s21] sm:$0xff] %v2207_v13  }
 0x138   : > { %v1530_v49 = vadd.f32 %v2756_v21, %v1516_v45  ;;  %v1033_v9 = vpop.f32.mrf.mxu1  ;;  %v1499_v16 = vpop.f32.mrf.mxu0 }
 0x139   : > { %v1194_v12 = vpop.f32.mrf.mxu2  ;;  %v1052_v52 = vadd.f32 %v1033_v9, %v2735_v36  ;;  %v1376_v18 = vpop.f32.mrf.mxu3 }
 0x13a   : > { %v1215_v48 = vadd.f32 %v1194_v12, %v1051_v10  ;;  %v1550_v23 = vmul.f32 0.01, %v1530_v49  ;;  %vm1540_vm8 = vcmp.ge.f32.partialorder %v1530_v49, 0.0 }
 0x13c   : > { %v1387_v50 = vadd.f32 %v1366_v15, %v1215_v48  ;;  %v1560_v56 = vsel %vm1540_vm8, %v1530_v49, %v1550_v23 }
 0x13e   : > { %v1517_v51 = vadd.f32 %v1496_v42, %v1387_v50 }
 0x140   : > { %v1531_v47 = vadd.f32 %v2756_v21, %v1517_v51  ;;  %v1035_v35 = vpop.f32.mrf.mxu1  ;;  %v1501_v61 = vpop.f32.mrf.mxu0 }
 0x141   : > { %v1197_v11 = vpop.f32.mrf.mxu2  ;;  %v1053_v62 = vadd.f32 %v1035_v35, %v2738_v44  ;;  %v1379_v13 = vpop.f32.mrf.mxu3 }
 0x142   : > { %vm1541_vm9 = vcmp.ge.f32.partialorder %v1531_v47, 0.0  ;;  %v1551_v27 = vmul.f32 0.01, %v1531_v47  ;;  %v1216_v55 = vadd.f32 %v1197_v11, %v1052_v52 }
 0x144   : > { %v1561_v57 = vsel %vm1541_vm9, %v1531_v47, %v1551_v27  ;;  %v1388_v58 = vadd.f32 %v1369_v46, %v1216_v55 }
 0x145   : > { %v2212_v59 = vpack.c.bf16 %v1561_v57, %v1560_v56 }
 0x146   : > { %v1518_v36 = vadd.f32 %v1499_v16, %v1388_v58 }
 0x147   : > { %2232 = vst [vmem:[%s2765_s21 + $0x8] sm:$0xff] %v2212_v59  }
 0x148   : > { %v1532_v1 = vadd.f32 %v2756_v21, %v1518_v36  ;;  %v1038_v4 = vpop.f32.mrf.mxu1  ;;  %v1504_v6 = vpop.f32.mrf.mxu0 }
 0x149   : > { %v1199_v63 = vpop.f32.mrf.mxu2  ;;  %v1054_v8 = vadd.f32 %v1038_v4, %v2741_v33  ;;  %v1381_v52 = vpop.f32.mrf.mxu3 }
 0x14a   : > { %v1217_v0 = vadd.f32 %v1199_v63, %v1053_v62  ;;  %v1552_v7 = vmul.f32 0.01, %v1532_v1  ;;  %vm1542_vm10 = vcmp.ge.f32.partialorder %v1532_v1, 0.0 }
 0x14c   : > { %v1389_v3 = vadd.f32 %v1371_v43, %v1217_v0  ;;  %v1562_v22 = vsel %vm1542_vm10, %v1532_v1, %v1552_v7 }
 0x14e   : > { %v1519_v5 = vadd.f32 %v1501_v61, %v1389_v3 }
 0x150   : > { %v1533_v17 = vadd.f32 %v2756_v21, %v1519_v5  ;;  %v1040_v26 = vpop.f32.mrf.mxu1  ;;  %v1506_v33 = vpop.f32.mrf.mxu0 }
 0x151   : > { %v1202_v38 = vpop.f32.mrf.mxu2  ;;  %v1055_v28 = vadd.f32 %v1040_v26, %v2744_v29 }
 0x152   : > { %vm1543_vm11 = vcmp.ge.f32.partialorder %v1533_v17, 0.0  ;;  %v1553_v44 = vmul.f32 0.01, %v1533_v17  ;;  %v1218_v19 = vadd.f32 %v1202_v38, %v1054_v8 }
 0x154   : > { %v1563_v24 = vsel %vm1543_vm11, %v1533_v17, %v1553_v44  ;;  %v1390_v54 = vadd.f32 %v1374_v31, %v1218_v19 }
 0x155   : > { %v2217_v25 = vpack.c.bf16 %v1563_v24, %v1562_v22 }
 0x156   : > { %v1520_v30 = vadd.f32 %v1504_v6, %v1390_v54 }
 0x157   : > { %2233 = vst [vmem:[%s2765_s21 + $0x10] sm:$0xff] %v2217_v25  }
 0x158   : > { %v1534_v2 = vadd.f32 %v2756_v21, %v1520_v30  ;;  %v1043_v34 = vpop.f32.mrf.mxu1  ;;  %v1509_v10 = vpop.f32.mrf.mxu0 }
 0x159   : > { %v1204_v15 = vpop.f32.mrf.mxu2  ;;  %v1056_v39 = vadd.f32 %v1043_v34, %v2747_v60 }
 0x15a   : > { %v1219_v32 = vadd.f32 %v1204_v15, %v1055_v28  ;;  %v1554_v40 = vmul.f32 0.01, %v1534_v2  ;;  %vm1544_vm12 = vcmp.ge.f32.partialorder %v1534_v2, 0.0 }
 0x15c   : > { %v1391_v53 = vadd.f32 %v1376_v18, %v1219_v32  ;;  %v1564_v45 = vsel %vm1544_vm12, %v1534_v2, %v1554_v40 }
 0x15e   : > { %v1521_v37 = vadd.f32 %v1506_v33, %v1391_v53 }
 0x160   : > { %v1535_v41 = vadd.f32 %v2756_v21, %v1521_v37  ;;  %v1045_v49 = vpop.f32.mrf.mxu1  ;;  %v1511_v47 = vpop.f32.mrf.mxu0 }
 0x161   : > { %v1207_v29 = vpop.f32.mrf.mxu2  ;;  %v1057_v9 = vadd.f32 %v1045_v49, %v2750_v14 }
 0x162   : > { %vm1545_vm13 = vcmp.ge.f32.partialorder %v1535_v41, 0.0  ;;  %v1555_v20 = vmul.f32 0.01, %v1535_v41  ;;  %v1220_v42 = vadd.f32 %v1207_v29, %v1056_v39 }
 0x164   : > { %v1565_v12 = vsel %vm1545_vm13, %v1535_v41, %v1555_v20  ;;  %v1392_v46 = vadd.f32 %v1379_v13, %v1220_v42 }
 0x165   : > { %v2222_v48 = vpack.c.bf16 %v1565_v12, %v1564_v45 }
 0x166   : > { %v1522_v50 = vadd.f32 %v1509_v10, %v1392_v46 }
 0x167   : > { %2234 = vst [vmem:[%s2765_s21 + $0x18] sm:$0xff] %v2222_v48  }
 0x168   : > { %v1536_v60 = vadd.f32 %v2756_v21, %v1522_v50 }
 0x169   : > { %v1209_v16 = vpop.f32.mrf.mxu2 }
 0x16a   : > { %v1221_v51 = vadd.f32 %v1209_v16, %v1057_v9  ;;  %v1556_v27 = vmul.f32 0.01, %v1536_v60  ;;  %vm1546_vm14 = vcmp.ge.f32.partialorder %v1536_v60, 0.0 }
 0x16c   : > { %v1393_v23 = vadd.f32 %v1381_v52, %v1221_v51  ;;  %v1566_v56 = vsel %vm1546_vm14, %v1536_v60, %v1556_v27 }
 0x16e   : > { %v1523_v11 = vadd.f32 %v1511_v47, %v1393_v23 }
 0x170   : > { %v1537_v55 = vadd.f32 %v2756_v21, %v1523_v11 }
 0x172   : > { %vm1547_vm15 = vcmp.ge.f32.partialorder %v1537_v55, 0.0  ;;  %v1557_v43 = vmul.f32 0.01, %v1537_v55 }
 0x174   : > { %v1567_v57 = vsel %vm1547_vm15, %v1537_v55, %v1557_v43 }
 0x175   : > { %v2227_v58 = vpack.c.bf16 %v1567_v57, %v1566_v56 }
 0x177   : > { %2235 = vst [vmem:[%s2765_s21 + $0x20] sm:$0xff] %v2227_v58  }
 0x178 PF: > { %s13_s12 = sadd.s32 1, %s2269_s12  }
 0x179   : > { %p10_p4 = scmp.ge.s32.totalorder %s13_s12, 4  }
 0x17b   :  { %12 = sbr.rel (!%p10_p4) target bundleno = 1 (0x1), region = 70 }

</bundles_post_ra>
